<compile_context>
chip_gen: v6e
topology: v6e:2x2x1
jax: 0.10.0
libtpu: 0.0.40
codegen_flags: <defaults>
</compile_context>

<pallas_src>
import functools

import jax
import jax.numpy as jnp
from jax import lax
from jax.experimental import pallas as pl
from jax.experimental.pallas import tpu as pltpu


def _make_resblock_kernel(C, S, E, Wp, ksize, d1, d2, eps):
    half = (ksize - 1) // 2

    def conv_as_one_matmul(ext_ref, w_ref, b_ref, d):
        # im2col slab: ksize*ksize lane-shifted views of the zero-extended image,
        # stacked on the sublane axis -> (K*K*C, S); then ONE MXU matmul (K = K*K*C).
        taps = []
        for kh in range(ksize):
            for kw in range(ksize):
                st = E + ((kh - half) * Wp + (kw - half)) * d
                taps.append(ext_ref[:, st:st + S])
        slab = jnp.concatenate(taps, axis=0)                         # (K*K*C, S)
        y = jnp.dot(w_ref[...], slab, preferred_element_type=jnp.float32)
        return y + b_ref[...]                                        # (C, S)

    def group_norm(y, mask, avg, gamma, beta):
        ym = y * mask                                                # zero halo lanes
        s = jnp.sum(ym, axis=1, keepdims=True)                       # (C, 1)
        ss = jnp.sum(ym * ym, axis=1, keepdims=True)                 # (C, 1)
        mean = jnp.dot(avg, s, preferred_element_type=jnp.float32)   # per-group mean
        ex2 = jnp.dot(avg, ss, preferred_element_type=jnp.float32)   # per-group E[x^2]
        var = ex2 - mean * mean
        inv = lax.rsqrt(var + eps)
        scale = gamma * inv
        shift = beta - mean * scale
        return y * scale + shift

    def kernel(x_ref, w1_ref, b1_ref, g1_ref, gb1_ref,
               w2_ref, b2_ref, g2_ref, gb2_ref, mask_ref, avg_ref,
               o_ref, ext_ref):
        mask = mask_ref[...]
        avg = avg_ref[...]

        # Stage the zero-extended padded image for conv1 in VMEM scratch.
        ext_ref[...] = jnp.zeros_like(ext_ref)
        ext_ref[:, E:E + S] = x_ref[0]

        c1 = conv_as_one_matmul(ext_ref, w1_ref, b1_ref, d1)
        t1 = jnp.maximum(group_norm(c1, mask, avg, g1_ref[...], gb1_ref[...]), 0.0)
        t1 = t1 * mask                         # restore exact zero padding

        # Reuse the same scratch as conv2's input (halo lanes are still zero).
        ext_ref[:, E:E + S] = t1

        c2 = conv_as_one_matmul(ext_ref, w2_ref, b2_ref, d2)
        t2 = group_norm(c2, mask, avg, g2_ref[...], gb2_ref[...])

        # residual + final ReLU (lane-dense store; halo lanes are sliced off outside)
        o_ref[0] = jnp.maximum(t2 + x_ref[0], 0.0).astype(o_ref.dtype)

    return kernel


def resnet_block_gn(x, w1, b1, gn1_w, gn1_b, w2, b2, gn2_w, gn2_b,
                    *, kernel_size=3, dilation=(1, 1), group_channel=8,
                    eps=1e-5):
    """Forward pass of ResnetBlockGn.  x: (N, C, H, W);  w*: (C, C, K, K)."""
    N, C, H, W = x.shape
    K = int(kernel_size)
    half = (K - 1) // 2
    d1, d2 = int(dilation[0]), int(dilation[1])
    P = half * max(d1, d2)                       # shared halo for both dilated convs
    Hp, Wp = H + 2 * P, W + 2 * P
    S = Hp * Wp
    # Halo extension of the flattened image so every tap slice is in-bounds,
    # rounded up to the lane width so the body store starts lane-aligned.
    E = (-(-((Wp + 1) * P) // 128)) * 128
    G = int(max(1, C / group_channel))           # same formula as the PyTorch module
    assert C % G == 0, "channels must be divisible by the number of groups"
    cg = C // G
    f32 = jnp.float32

    # Pad to the common grid and flatten spatial onto the lane dimension.
    xp = jnp.pad(x.astype(f32), ((0, 0), (0, 0), (P, P), (P, P))).reshape(N, C, S)

    # (Cout, Cin, K, K) -> (Cout, K*K*Cin) tap-major, single lane-dense weight slab.
    def slab(w):
        return jnp.transpose(w, (0, 2, 3, 1)).reshape(C, K * K * C).astype(f32)

    # Validity mask over the padded grid (1 inside the original HxW image).
    hh = jnp.arange(Hp)
    ww = jnp.arange(Wp)
    valid = ((hh[:, None] >= P) & (hh[:, None] < P + H) &
             (ww[None, :] >= P) & (ww[None, :] < P + W))
    mask = valid.reshape(1, S).astype(f32)

    # Per-group averaging matrix: avg[c, c'] = 1/(cg*H*W) if same group else 0.
    cidx = jnp.arange(C)
    same = (cidx[:, None] // cg) == (cidx[None, :] // cg)
    avg = same.astype(f32) / float(cg * H * W)

    col = lambda v: jnp.reshape(v, (C, 1)).astype(f32)
    vec_spec = pl.BlockSpec((C, 1), lambda n: (0, 0))

    kern = _make_resblock_kernel(C, S, E, Wp, K, d1, d2, float(eps))
    out_flat = pl.pallas_call(
        kern,
        out_shape=jax.ShapeDtypeStruct((N, C, S), f32),
        grid_spec=pltpu.PrefetchScalarGridSpec(
            num_scalar_prefetch=0,
            grid=(N,),
            in_specs=[
                pl.BlockSpec((1, C, S), lambda n: (n, 0, 0)),     # x (padded grid)
                pl.BlockSpec((C, K * K * C), lambda n: (0, 0)),   # conv1 weight slab
                vec_spec,                                         # conv1 bias
                vec_spec,                                         # GN1 gamma
                vec_spec,                                         # GN1 beta
                pl.BlockSpec((C, K * K * C), lambda n: (0, 0)),   # conv2 weight slab
                vec_spec,                                         # conv2 bias
                vec_spec,                                         # GN2 gamma
                vec_spec,                                         # GN2 beta
                pl.BlockSpec((1, S), lambda n: (0, 0)),           # validity mask
                pl.BlockSpec((C, C), lambda n: (0, 0)),           # group-average matrix
            ],
            out_specs=pl.BlockSpec((1, C, S), lambda n: (n, 0, 0)),
            scratch_shapes=[pltpu.VMEM((C, S + 2 * E), f32)],
        ),
        compiler_params=pltpu.CompilerParams(
            dimension_semantics=("parallel",)),
    )(xp, slab(w1), col(b1), col(gn1_w), col(gn1_b),
      slab(w2), col(b2), col(gn2_w), col(gn2_b), mask, avg)

    # Drop halo columns/rows and return NCHW (the kernel works natively in CHW).
    return out_flat.reshape(N, C, Hp, Wp)[:, :, P:P + H, P:P + W]


# ----------------------------------------------------------------------------
# Pure-JAX reference (same math via XLA conv) for a sanity check.
# ----------------------------------------------------------------------------
def _reference(x, w1, b1, gn1_w, gn1_b, w2, b2, gn2_w, gn2_b,
               *, kernel_size=3, dilation=(1, 1), group_channel=8, eps=1e-5):
    C = x.shape[1]
    G = int(max(1, C / group_channel))
    half = (kernel_size - 1) // 2

    def conv(v, w, b, d):
        y = lax.conv_general_dilated(
            v, w, window_strides=(1, 1),
            padding=((half * d, half * d), (half * d, half * d)),
            rhs_dilation=(d, d),
            dimension_numbers=("NCHW", "OIHW", "NCHW"),
            precision=lax.Precision.HIGHEST)
        return y + b.reshape(1, -1, 1, 1)

    def gn(y, gamma, beta):
        n, c, h, w = y.shape
        yg = y.reshape(n, G, c // G, h, w)
        mean = jnp.mean(yg, axis=(2, 3, 4), keepdims=True)
        var = jnp.var(yg, axis=(2, 3, 4), keepdims=True)
        yn = ((yg - mean) / jnp.sqrt(var + eps)).reshape(n, c, h, w)
        return yn * gamma.reshape(1, -1, 1, 1) + beta.reshape(1, -1, 1, 1)

    d1, d2 = dilation
    t = jax.nn.relu(gn(conv(x, w1, b1, d1), gn1_w, gn1_b))
    t = gn(conv(t, w2, b2, d2), gn2_w, gn2_b)
    return jax.nn.relu(t + x)


if __name__ == "__main__":
    N, C, H, W = 2, 32, 16, 16
    dilation = (1, 2)
    group_channel = 8                  # -> 4 groups (PyTorch module default)

    key = jax.random.PRNGKey(0)
    ks = jax.random.split(key, 9)
    x = jax.random.normal(ks[0], (N, C, H, W), jnp.float32)
    w1 = jax.random.normal(ks[1], (C, C, 3, 3), jnp.float32) * 0.1
    b1 = jax.random.normal(ks[2], (C,), jnp.float32) * 0.1
    w2 = jax.random.normal(ks[3], (C, C, 3, 3), jnp.float32) * 0.1
    b2 = jax.random.normal(ks[4], (C,), jnp.float32) * 0.1
    gn1_w = 1.0 + 0.1 * jax.random.normal(ks[5], (C,), jnp.float32)
    gn1_b = 0.1 * jax.random.normal(ks[6], (C,), jnp.float32)
    gn2_w = 1.0 + 0.1 * jax.random.normal(ks[7], (C,), jnp.float32)
    gn2_b = 0.1 * jax.random.normal(ks[8], (C,), jnp.float32)

    run = jax.jit(functools.partial(resnet_block_gn, dilation=dilation,
                                    group_channel=group_channel))
    out = jax.block_until_ready(run(x, w1, b1, gn1_w, gn1_b,
                                    w2, b2, gn2_w, gn2_b))
    ref = jax.block_until_ready(_reference(x, w1, b1, gn1_w, gn1_b,
                                           w2, b2, gn2_w, gn2_b,
                                           dilation=dilation,
                                           group_channel=group_channel))

    assert out.shape == (N, C, H, W), out.shape
    err = float(jnp.max(jnp.abs(out - ref)))
    assert jnp.allclose(out, ref, atol=2e-2, rtol=2e-2), err
    print("KERNEL_OK")
</pallas_src>

<mosaic_0001>
module attributes {stable_mosaic.version = 11 : i64} {
  func.func @kernel(%arg0: i32, %arg1: memref<1x32x400xf32, #tpu.memory_space<vmem>>, %arg2: memref<32x288xf32, #tpu.memory_space<vmem>>, %arg3: memref<32x1xf32, #tpu.memory_space<vmem>>, %arg4: memref<32x1xf32, #tpu.memory_space<vmem>>, %arg5: memref<32x1xf32, #tpu.memory_space<vmem>>, %arg6: memref<32x288xf32, #tpu.memory_space<vmem>>, %arg7: memref<32x1xf32, #tpu.memory_space<vmem>>, %arg8: memref<32x1xf32, #tpu.memory_space<vmem>>, %arg9: memref<32x1xf32, #tpu.memory_space<vmem>>, %arg10: memref<1x400xf32, #tpu.memory_space<vmem>>, %arg11: memref<32x32xf32, #tpu.memory_space<vmem>>, %arg12: memref<1x32x400xf32, #tpu.memory_space<vmem>>, %arg13: memref<32x656xf32, #tpu.memory_space<vmem>>) attributes {dimension_semantics = [#tpu.dimension_semantics<parallel>], iteration_bounds = array<i64: 2>, scalar_prefetch = 0 : i64, scratch_operands = 1 : i64, tpu.core_type = #tpu.core_type<tc>, window_params = [{transform_indices = @transform_0, window_bounds = array<i64: 1, 32, 400>}, {pipeline_mode = #tpu.pipeline_mode<synchronous>, transform_indices = @transform_1, window_bounds = array<i64: 32, 288>}, {pipeline_mode = #tpu.pipeline_mode<synchronous>, transform_indices = @transform_2, window_bounds = array<i64: 32, 1>}, {pipeline_mode = #tpu.pipeline_mode<synchronous>, transform_indices = @transform_3, window_bounds = array<i64: 32, 1>}, {pipeline_mode = #tpu.pipeline_mode<synchronous>, transform_indices = @transform_4, window_bounds = array<i64: 32, 1>}, {pipeline_mode = #tpu.pipeline_mode<synchronous>, transform_indices = @transform_5, window_bounds = array<i64: 32, 288>}, {pipeline_mode = #tpu.pipeline_mode<synchronous>, transform_indices = @transform_6, window_bounds = array<i64: 32, 1>}, {pipeline_mode = #tpu.pipeline_mode<synchronous>, transform_indices = @transform_7, window_bounds = array<i64: 32, 1>}, {pipeline_mode = #tpu.pipeline_mode<synchronous>, transform_indices = @transform_8, window_bounds = array<i64: 32, 1>}, {pipeline_mode = #tpu.pipeline_mode<synchronous>, transform_indices = @transform_9, window_bounds = array<i64: 1, 400>}, {pipeline_mode = #tpu.pipeline_mode<synchronous>, transform_indices = @transform_10, window_bounds = array<i64: 32, 32>}, {transform_indices = @transform_11, window_bounds = array<i64: 1, 32, 400>}]} {
    %c0 = arith.constant 0 : index
    %c0_0 = arith.constant 0 : index
    %0 = vector.load %arg10[%c0, %c0_0] : memref<1x400xf32, #tpu.memory_space<vmem>>, vector<1x400xf32>
    %c0_1 = arith.constant 0 : index
    %c0_2 = arith.constant 0 : index
    %1 = vector.load %arg11[%c0_1, %c0_2] : memref<32x32xf32, #tpu.memory_space<vmem>>, vector<32x32xf32>
    %cst = arith.constant 0.000000e+00 : f32
    %2 = vector.broadcast %cst : f32 to vector<32x656xf32>
    %c0_3 = arith.constant 0 : index
    %c0_4 = arith.constant 0 : index
    %3 = vector.load %arg13[%c0_3, %c0_4] : memref<32x656xf32, #tpu.memory_space<vmem>>, vector<32x656xf32>
    tpu.vector_store %arg13[%c0_3, %c0_4], %2 {strides = array<i32>} : memref<32x656xf32, #tpu.memory_space<vmem>>, vector<32x656xf32>,
    %c0_5 = arith.constant 0 : index
    %c0_6 = arith.constant 0 : index
    %c0_7 = arith.constant 0 : index
    %4 = vector.load %arg1[%c0_5, %c0_6, %c0_7] : memref<1x32x400xf32, #tpu.memory_space<vmem>>, vector<1x32x400xf32>
    %5 = vector.shape_cast %4 : vector<1x32x400xf32> to vector<32x400xf32>
    %c0_8 = arith.constant 0 : index
    %c128 = arith.constant 128 : index
    %6 = vector.load %arg13[%c0_8, %c128] : memref<32x656xf32, #tpu.memory_space<vmem>>, vector<32x400xf32>
    tpu.vector_store %arg13[%c0_8, %c128], %5 {strides = array<i32>} : memref<32x656xf32, #tpu.memory_space<vmem>>, vector<32x400xf32>,
    %c0_9 = arith.constant 0 : index
    %c107 = arith.constant 107 : index
    %7 = vector.load %arg13[%c0_9, %c107] : memref<32x656xf32, #tpu.memory_space<vmem>>, vector<32x400xf32>
    %c0_10 = arith.constant 0 : index
    %c108 = arith.constant 108 : index
    %8 = vector.load %arg13[%c0_10, %c108] : memref<32x656xf32, #tpu.memory_space<vmem>>, vector<32x400xf32>
    %c0_11 = arith.constant 0 : index
    %c109 = arith.constant 109 : index
    %9 = vector.load %arg13[%c0_11, %c109] : memref<32x656xf32, #tpu.memory_space<vmem>>, vector<32x400xf32>
    %c0_12 = arith.constant 0 : index
    %c127 = arith.constant 127 : index
    %10 = vector.load %arg13[%c0_12, %c127] : memref<32x656xf32, #tpu.memory_space<vmem>>, vector<32x400xf32>
    %c0_13 = arith.constant 0 : index
    %c128_14 = arith.constant 128 : index
    %11 = vector.load %arg13[%c0_13, %c128_14] : memref<32x656xf32, #tpu.memory_space<vmem>>, vector<32x400xf32>
    %c0_15 = arith.constant 0 : index
    %c129 = arith.constant 129 : index
    %12 = vector.load %arg13[%c0_15, %c129] : memref<32x656xf32, #tpu.memory_space<vmem>>, vector<32x400xf32>
    %c0_16 = arith.constant 0 : index
    %c147 = arith.constant 147 : index
    %13 = vector.load %arg13[%c0_16, %c147] : memref<32x656xf32, #tpu.memory_space<vmem>>, vector<32x400xf32>
    %c0_17 = arith.constant 0 : index
    %c148 = arith.constant 148 : index
    %14 = vector.load %arg13[%c0_17, %c148] : memref<32x656xf32, #tpu.memory_space<vmem>>, vector<32x400xf32>
    %c0_18 = arith.constant 0 : index
    %c149 = arith.constant 149 : index
    %15 = vector.load %arg13[%c0_18, %c149] : memref<32x656xf32, #tpu.memory_space<vmem>>, vector<32x400xf32>
    %16 = tpu.concatenate %7, %8, %9, %10, %11, %12, %13, %14, %15 in 0 : vector<32x400xf32>, vector<32x400xf32>, vector<32x400xf32>, vector<32x400xf32>, vector<32x400xf32>, vector<32x400xf32>, vector<32x400xf32>, vector<32x400xf32>, vector<32x400xf32> -> vector<288x400xf32>
    %c0_19 = arith.constant 0 : index
    %c0_20 = arith.constant 0 : index
    %17 = vector.load %arg2[%c0_19, %c0_20] : memref<32x288xf32, #tpu.memory_space<vmem>>, vector<32x288xf32>
    %cst_21 = arith.constant dense<0.000000e+00> : vector<32x400xf32>
    %18 = tpu.matmul %17, %16, %cst_21 {dimension_numbers = #tpu.dot_dimension_numbers<[1], [0], [0], [1], [0, 0, 1, 1], [], []>} : vector<32x288xf32>, vector<288x400xf32>, vector<32x400xf32> -> vector<32x400xf32>
    %c0_22 = arith.constant 0 : index
    %c0_23 = arith.constant 0 : index
    %19 = vector.load %arg3[%c0_22, %c0_23] : memref<32x1xf32, #tpu.memory_space<vmem>>, vector<32x1xf32>
    %20 = vector.broadcast %19 : vector<32x1xf32> to vector<32x400xf32>
    %21 = arith.addf %18, %20 : vector<32x400xf32>
    %c0_24 = arith.constant 0 : index
    %c0_25 = arith.constant 0 : index
    %22 = vector.load %arg4[%c0_24, %c0_25] : memref<32x1xf32, #tpu.memory_space<vmem>>, vector<32x1xf32>
    %c0_26 = arith.constant 0 : index
    %c0_27 = arith.constant 0 : index
    %23 = vector.load %arg5[%c0_26, %c0_27] : memref<32x1xf32, #tpu.memory_space<vmem>>, vector<32x1xf32>
    %24 = vector.broadcast %0 : vector<1x400xf32> to vector<32x400xf32>
    %25 = arith.mulf %21, %24 : vector<32x400xf32>
    %cst_28 = arith.constant dense<0.000000e+00> : vector<32xf32>
    %26 = vector.multi_reduction <add>, %25, %cst_28 [1] : vector<32x400xf32> to vector<32xf32>
    %27 = vector.shape_cast %26 : vector<32xf32> to vector<32x1xf32>
    %28 = arith.mulf %25, %25 : vector<32x400xf32>
    %cst_29 = arith.constant dense<0.000000e+00> : vector<32xf32>
    %29 = vector.multi_reduction <add>, %28, %cst_29 [1] : vector<32x400xf32> to vector<32xf32>
    %30 = vector.shape_cast %29 : vector<32xf32> to vector<32x1xf32>
    %cst_30 = arith.constant dense<0.000000e+00> : vector<32x1xf32>
    %31 = tpu.matmul %1, %27, %cst_30 {dimension_numbers = #tpu.dot_dimension_numbers<[1], [0], [0], [1], [0, 0, 1, 1], [], []>} : vector<32x32xf32>, vector<32x1xf32>, vector<32x1xf32> -> vector<32x1xf32>
    %cst_31 = arith.constant dense<0.000000e+00> : vector<32x1xf32>
    %32 = tpu.matmul %1, %30, %cst_31 {dimension_numbers = #tpu.dot_dimension_numbers<[1], [0], [0], [1], [0, 0, 1, 1], [], []>} : vector<32x32xf32>, vector<32x1xf32>, vector<32x1xf32> -> vector<32x1xf32>
    %33 = arith.mulf %31, %31 : vector<32x1xf32>
    %34 = arith.subf %32, %33 : vector<32x1xf32>
    %cst_32 = arith.constant 9.99999974E-6 : f32
    %35 = vector.broadcast %cst_32 : f32 to vector<32x1xf32>
    %36 = arith.addf %34, %35 : vector<32x1xf32>
    %37 = math.rsqrt %36 : vector<32x1xf32>
    %38 = arith.mulf %22, %37 : vector<32x1xf32>
    %39 = arith.mulf %31, %38 : vector<32x1xf32>
    %40 = arith.subf %23, %39 : vector<32x1xf32>
    %41 = vector.broadcast %38 : vector<32x1xf32> to vector<32x400xf32>
    %42 = arith.mulf %21, %41 : vector<32x400xf32>
    %43 = vector.broadcast %40 : vector<32x1xf32> to vector<32x400xf32>
    %44 = arith.addf %42, %43 : vector<32x400xf32>
    %cst_33 = arith.constant 0.000000e+00 : f32
    %45 = vector.broadcast %cst_33 : f32 to vector<32x400xf32>
    %46 = arith.maximumf %44, %45 : vector<32x400xf32>
    %47 = vector.broadcast %0 : vector<1x400xf32> to vector<32x400xf32>
    %48 = arith.mulf %46, %47 : vector<32x400xf32>
    %c0_34 = arith.constant 0 : index
    %c128_35 = arith.constant 128 : index
    %49 = vector.load %arg13[%c0_34, %c128_35] : memref<32x656xf32, #tpu.memory_space<vmem>>, vector<32x400xf32>
    tpu.vector_store %arg13[%c0_34, %c128_35], %48 {strides = array<i32>} : memref<32x656xf32, #tpu.memory_space<vmem>>, vector<32x400xf32>,
    %c0_36 = arith.constant 0 : index
    %c86 = arith.constant 86 : index
    %50 = vector.load %arg13[%c0_36, %c86] : memref<32x656xf32, #tpu.memory_space<vmem>>, vector<32x400xf32>
    %c0_37 = arith.constant 0 : index
    %c88 = arith.constant 88 : index
    %51 = vector.load %arg13[%c0_37, %c88] : memref<32x656xf32, #tpu.memory_space<vmem>>, vector<32x400xf32>
    %c0_38 = arith.constant 0 : index
    %c90 = arith.constant 90 : index
    %52 = vector.load %arg13[%c0_38, %c90] : memref<32x656xf32, #tpu.memory_space<vmem>>, vector<32x400xf32>
    %c0_39 = arith.constant 0 : index
    %c126 = arith.constant 126 : index
    %53 = vector.load %arg13[%c0_39, %c126] : memref<32x656xf32, #tpu.memory_space<vmem>>, vector<32x400xf32>
    %c0_40 = arith.constant 0 : index
    %c128_41 = arith.constant 128 : index
    %54 = vector.load %arg13[%c0_40, %c128_41] : memref<32x656xf32, #tpu.memory_space<vmem>>, vector<32x400xf32>
    %c0_42 = arith.constant 0 : index
    %c130 = arith.constant 130 : index
    %55 = vector.load %arg13[%c0_42, %c130] : memref<32x656xf32, #tpu.memory_space<vmem>>, vector<32x400xf32>
    %c0_43 = arith.constant 0 : index
    %c166 = arith.constant 166 : index
    %56 = vector.load %arg13[%c0_43, %c166] : memref<32x656xf32, #tpu.memory_space<vmem>>, vector<32x400xf32>
    %c0_44 = arith.constant 0 : index
    %c168 = arith.constant 168 : index
    %57 = vector.load %arg13[%c0_44, %c168] : memref<32x656xf32, #tpu.memory_space<vmem>>, vector<32x400xf32>
    %c0_45 = arith.constant 0 : index
    %c170 = arith.constant 170 : index
    %58 = vector.load %arg13[%c0_45, %c170] : memref<32x656xf32, #tpu.memory_space<vmem>>, vector<32x400xf32>
    %59 = tpu.concatenate %50, %51, %52, %53, %54, %55, %56, %57, %58 in 0 : vector<32x400xf32>, vector<32x400xf32>, vector<32x400xf32>, vector<32x400xf32>, vector<32x400xf32>, vector<32x400xf32>, vector<32x400xf32>, vector<32x400xf32>, vector<32x400xf32> -> vector<288x400xf32>
    %c0_46 = arith.constant 0 : index
    %c0_47 = arith.constant 0 : index
    %60 = vector.load %arg6[%c0_46, %c0_47] : memref<32x288xf32, #tpu.memory_space<vmem>>, vector<32x288xf32>
    %cst_48 = arith.constant dense<0.000000e+00> : vector<32x400xf32>
    %61 = tpu.matmul %60, %59, %cst_48 {dimension_numbers = #tpu.dot_dimension_numbers<[1], [0], [0], [1], [0, 0, 1, 1], [], []>} : vector<32x288xf32>, vector<288x400xf32>, vector<32x400xf32> -> vector<32x400xf32>
    %c0_49 = arith.constant 0 : index
    %c0_50 = arith.constant 0 : index
    %62 = vector.load %arg7[%c0_49, %c0_50] : memref<32x1xf32, #tpu.memory_space<vmem>>, vector<32x1xf32>
    %63 = vector.broadcast %62 : vector<32x1xf32> to vector<32x400xf32>
    %64 = arith.addf %61, %63 : vector<32x400xf32>
    %c0_51 = arith.constant 0 : index
    %c0_52 = arith.constant 0 : index
    %65 = vector.load %arg8[%c0_51, %c0_52] : memref<32x1xf32, #tpu.memory_space<vmem>>, vector<32x1xf32>
    %c0_53 = arith.constant 0 : index
    %c0_54 = arith.constant 0 : index
    %66 = vector.load %arg9[%c0_53, %c0_54] : memref<32x1xf32, #tpu.memory_space<vmem>>, vector<32x1xf32>
    %67 = vector.broadcast %0 : vector<1x400xf32> to vector<32x400xf32>
    %68 = arith.mulf %64, %67 : vector<32x400xf32>
    %cst_55 = arith.constant dense<0.000000e+00> : vector<32xf32>
    %69 = vector.multi_reduction <add>, %68, %cst_55 [1] : vector<32x400xf32> to vector<32xf32>
    %70 = vector.shape_cast %69 : vector<32xf32> to vector<32x1xf32>
    %71 = arith.mulf %68, %68 : vector<32x400xf32>
    %cst_56 = arith.constant dense<0.000000e+00> : vector<32xf32>
    %72 = vector.multi_reduction <add>, %71, %cst_56 [1] : vector<32x400xf32> to vector<32xf32>
    %73 = vector.shape_cast %72 : vector<32xf32> to vector<32x1xf32>
    %cst_57 = arith.constant dense<0.000000e+00> : vector<32x1xf32>
    %74 = tpu.matmul %1, %70, %cst_57 {dimension_numbers = #tpu.dot_dimension_numbers<[1], [0], [0], [1], [0, 0, 1, 1], [], []>} : vector<32x32xf32>, vector<32x1xf32>, vector<32x1xf32> -> vector<32x1xf32>
    %cst_58 = arith.constant dense<0.000000e+00> : vector<32x1xf32>
    %75 = tpu.matmul %1, %73, %cst_58 {dimension_numbers = #tpu.dot_dimension_numbers<[1], [0], [0], [1], [0, 0, 1, 1], [], []>} : vector<32x32xf32>, vector<32x1xf32>, vector<32x1xf32> -> vector<32x1xf32>
    %76 = arith.mulf %74, %74 : vector<32x1xf32>
    %77 = arith.subf %75, %76 : vector<32x1xf32>
    %cst_59 = arith.constant 9.99999974E-6 : f32
    %78 = vector.broadcast %cst_59 : f32 to vector<32x1xf32>
    %79 = arith.addf %77, %78 : vector<32x1xf32>
    %80 = math.rsqrt %79 : vector<32x1xf32>
    %81 = arith.mulf %65, %80 : vector<32x1xf32>
    %82 = arith.mulf %74, %81 : vector<32x1xf32>
    %83 = arith.subf %66, %82 : vector<32x1xf32>
    %84 = vector.broadcast %81 : vector<32x1xf32> to vector<32x400xf32>
    %85 = arith.mulf %64, %84 : vector<32x400xf32>
    %86 = vector.broadcast %83 : vector<32x1xf32> to vector<32x400xf32>
    %87 = arith.addf %85, %86 : vector<32x400xf32>
    %c0_60 = arith.constant 0 : index
    %c0_61 = arith.constant 0 : index
    %c0_62 = arith.constant 0 : index
    %88 = vector.load %arg1[%c0_60, %c0_61, %c0_62] : memref<1x32x400xf32, #tpu.memory_space<vmem>>, vector<1x32x400xf32>
    %89 = vector.shape_cast %88 : vector<1x32x400xf32> to vector<32x400xf32>
    %90 = arith.addf %87, %89 : vector<32x400xf32>
    %cst_63 = arith.constant 0.000000e+00 : f32
    %91 = vector.broadcast %cst_63 : f32 to vector<32x400xf32>
    %92 = arith.maximumf %90, %91 : vector<32x400xf32>
    %c0_64 = arith.constant 0 : index
    %c0_65 = arith.constant 0 : index
    %c0_66 = arith.constant 0 : index
    %93 = vector.load %arg12[%c0_64, %c0_65, %c0_66] : memref<1x32x400xf32, #tpu.memory_space<vmem>>, vector<1x32x400xf32>
    %94 = vector.shape_cast %93 : vector<1x32x400xf32> to vector<32x400xf32>
    %95 = vector.shape_cast %92 : vector<32x400xf32> to vector<1x32x400xf32>
    tpu.vector_store %arg12[%c0_64, %c0_65, %c0_66], %95 {strides = array<i32>} : memref<1x32x400xf32, #tpu.memory_space<vmem>>, vector<1x32x400xf32>,
    return
  }
  func.func @transform_0(%arg0: i32) -> (i32, i32, i32) {
    %c0_i32 = arith.constant 0 : i32
    %c0_i32_0 = arith.constant 0 : i32
    %c0_i32_1 = arith.constant 0 : i32
    return %arg0, %c0_i32, %c0_i32_0 : i32, i32, i32
  }
  func.func @transform_1(%arg0: i32) -> (i32, i32) {
    %c0_i32 = arith.constant 0 : i32
    %c0_i32_0 = arith.constant 0 : i32
    %c0_i32_1 = arith.constant 0 : i32
    return %c0_i32, %c0_i32_0 : i32, i32
  }
  func.func @transform_2(%arg0: i32) -> (i32, i32) {
    %c0_i32 = arith.constant 0 : i32
    %c0_i32_0 = arith.constant 0 : i32
    %c0_i32_1 = arith.constant 0 : i32
    return %c0_i32, %c0_i32_0 : i32, i32
  }
  func.func @transform_3(%arg0: i32) -> (i32, i32) {
    %c0_i32 = arith.constant 0 : i32
    %c0_i32_0 = arith.constant 0 : i32
    %c0_i32_1 = arith.constant 0 : i32
    return %c0_i32, %c0_i32_0 : i32, i32
  }
  func.func @transform_4(%arg0: i32) -> (i32, i32) {
    %c0_i32 = arith.constant 0 : i32
    %c0_i32_0 = arith.constant 0 : i32
    %c0_i32_1 = arith.constant 0 : i32
    return %c0_i32, %c0_i32_0 : i32, i32
  }
  func.func @transform_5(%arg0: i32) -> (i32, i32) {
    %c0_i32 = arith.constant 0 : i32
    %c0_i32_0 = arith.constant 0 : i32
    %c0_i32_1 = arith.constant 0 : i32
    return %c0_i32, %c0_i32_0 : i32, i32
  }
  func.func @transform_6(%arg0: i32) -> (i32, i32) {
    %c0_i32 = arith.constant 0 : i32
    %c0_i32_0 = arith.constant 0 : i32
    %c0_i32_1 = arith.constant 0 : i32
    return %c0_i32, %c0_i32_0 : i32, i32
  }
  func.func @transform_7(%arg0: i32) -> (i32, i32) {
    %c0_i32 = arith.constant 0 : i32
    %c0_i32_0 = arith.constant 0 : i32
    %c0_i32_1 = arith.constant 0 : i32
    return %c0_i32, %c0_i32_0 : i32, i32
  }
  func.func @transform_8(%arg0: i32) -> (i32, i32) {
    %c0_i32 = arith.constant 0 : i32
    %c0_i32_0 = arith.constant 0 : i32
    %c0_i32_1 = arith.constant 0 : i32
    return %c0_i32, %c0_i32_0 : i32, i32
  }
  func.func @transform_9(%arg0: i32) -> (i32, i32) {
    %c0_i32 = arith.constant 0 : i32
    %c0_i32_0 = arith.constant 0 : i32
    %c0_i32_1 = arith.constant 0 : i32
    return %c0_i32, %c0_i32_0 : i32, i32
  }
  func.func @transform_10(%arg0: i32) -> (i32, i32) {
    %c0_i32 = arith.constant 0 : i32
    %c0_i32_0 = arith.constant 0 : i32
    %c0_i32_1 = arith.constant 0 : i32
    return %c0_i32, %c0_i32_0 : i32, i32
  }
  func.func @transform_11(%arg0: i32) -> (i32, i32, i32) {
    %c0_i32 = arith.constant 0 : i32
    %c0_i32_0 = arith.constant 0 : i32
    %c0_i32_1 = arith.constant 0 : i32
    return %arg0, %c0_i32, %c0_i32_0 : i32, i32, i32
  }
}

</mosaic_0001>

<bundles_post_ra>
// kernel: resnet_block_gn.1
= control target key start
LH: loop header
LB: loop body
LE: loop exit
PB: predicated region body
PF: predicated region fallthrough
CT: control target
= control target key end

     0   :  { %s4426_s17 = smov 0   ;;  %s7753_s0 = inlined_call_operand.vmem [shape: f32[2,32,400], index: 0, kind: input, shape index: {}]   ;;  %s7754_s1 = inlined_call_operand.vmem [shape: f32[32,288], index: 1, kind: input, shape index: {}]   ;;  %s7755_s2 = inlined_call_operand.vmem [shape: f32[32,1], index: 2, kind: input, shape index: {}]   ;;  %s7756_s3 = inlined_call_operand.vmem [shape: f32[32,1], index: 3, kind: input, shape index: {}]   ;;  %s7757_s4 = inlined_call_operand.vmem [shape: f32[32,1], index: 4, kind: input, shape index: {}]   ;;  %s7758_s5 = inlined_call_operand.vmem [shape: f32[32,288], index: 5, kind: input, shape index: {}]   ;;  %s7759_s6 = inlined_call_operand.vmem [shape: f32[32,1], index: 6, kind: input, shape index: {}]   ;;  %s7760_s7 = inlined_call_operand.vmem [shape: f32[32,1], index: 7, kind: input, shape index: {}]   ;;  %s7761_s8 = inlined_call_operand.vmem [shape: f32[32,1], index: 8, kind: input, shape index: {}]   ;;  %s7762_s9 = inlined_call_operand.vmem [shape: f32[1,400], index: 9, kind: input, shape index: {}]   ;;  %s7763_s10 = inlined_call_operand.vmem [shape: f32[32,32], index: 10, kind: input, shape index: {}]   ;;  %s7764_s11 = inlined_call_operand.vmem [shape: f32[2,32,400], index: 11, kind: output, shape index: {}]  }
   0x1 LB: > { %s4077_s18 = sadd.s32 4294967295, %s4347_s17   ;;  %p4081_p0 = scmp.ge.s32.totalorder %s4347_s17, 1  ;;  %s4347_s17 = sphi %s4426_s17, %s21_s17  }
   0x2   : > { %p337_p1 = scmp.lt.s32.totalorder %s4347_s17, 3 }
   0x4   : > { %p338_p2 = pnand %p4081_p0, %p337_p1 }
   0x6   : > { %341 = sbr.rel (%p338_p2) target bundleno = 2746 (0xaba), region = 64 }
   0xb   : > { %p377_p3 = scmp.lt.s32.totalorder %s4077_s18, 1  ;;  %vm397_vm0 = vcmask 130048   ;;  %v7765_v0 = vmov 0.0   ;;  %s4350_s19 = smov 108   ;;  %vm619_vm1 = vcmask 883712   ;;  %vm848_vm2 = vcmask 703488  }
   0xc   : > { %405 = vst [vmem:[#allocation2 + $0x60] sm:$0xff] %v7765_v0  ;;  %396 = vst [vmem:[#allocation2 + $0x20] sm:$0xff] %v7765_v0  ;;  %1604 = vmatprep.mubr.f32.mxu1 %v7765_v0  ;;  %4236 = vrot.lane.b32.xlu1 %v7765_v0, %s4350_s19  ;;  %s4351_s24 = smov 86   ;;  %s4352_s25 = smov 126   ;;  %vm562_vm3 = vcmask 1031168   ;;  %vm517_vm4 = vcmask 1039360  }
   0xd   : > { %403 = vst [vmem:[#allocation2 + $0x50] sm:$0xff] %v7765_v0  ;;  %409 = vst [vmem:[#allocation2 + $0x80] sm:$0xff] %v7765_v0  ;;  %s8088_s18 = smov (!%p377_p3, %s4077_s18), 1  ;;  %s4353_s26 = smov 127   ;;  %vm1185_vm5 = vcmask 171008   ;;  %vm803_vm6 = vcmask 711680  }
   0xe   : > { %415 = vst [vmem:[#allocation2 + $0xb0] sm:$0xff] %v7765_v0  ;;  %s4120_s20 = sshll.u32 %s8088_s18, 7  ;;  %s4354_s27 = smov 87   ;;  %vm758_vm7 = vcmask 719872   ;;  %vm1438_vm8 = vcmask 261120   ;;  %vm713_vm9 = vcmask 867328  }
   0xf   : > { %s4450_s23 = scalar_lea.vmem %s7753_s0, %s4120_s20  ;;  %s4355_s28 = smov 88   ;;  %vm668_vm10 = vcmask 875520   ;;  %vm2642_vm11 = vcmask 359424   ;;  %vm2358_vm12 = vcmask 1014784   ;;  %vm2597_vm13 = vcmask 375808  }
  0x10   : > { %v4453_v1 = vld [vmem:[%s4450_s23 + $0x70] sm:$0xff]  ;;  %v4456_v2 = vld [vmem:[%s4450_s23 + $0x60] sm:$0xff]  ;;  %v4463_v3 = vld [vmem:[%s4450_s23 + $0x68] sm:$0xff]  ;;  %s4356_s29 = smov 106   ;;  %s4357_s30 = smov 107   ;;  %vm2552_vm14 = vcmask 392192  }
  0x11   : > { %7860 = vst [vmem:[#allocation3_spill] sm:$0xff] %v4453_v1  ;;  %7861 = vst [vmem:[#allocation4_spill] sm:$0xff] %v4456_v2  ;;  %615 = vrot.lane.b32.xlu1 %v4453_v1, %s4350_s19  ;;  %611 = vrot.lane.b32.xlu0 %v4456_v2, %s4350_s19  ;;  %v4466_v4 = vld [vmem:[%s4450_s23 + $0x48] sm:$0xff]  ;;  %v432_v5 = vld [vmem:[%s4450_s23 + $0x78] sm:$0xff]  ;;  %s4358_s12 = smov 21   ;;  %s4360_s22 = smov 124  }
  0x12   : > { %7862 = vst [vmem:[#allocation5_spill] sm:$0xff] %v4463_v3  ;;  %7863 = vst [vmem:[#allocation6_spill] sm:$0xff] %v4466_v4  ;;  %v428_v6 = vld [vmem:[%s4450_s23 + $0x58] sm:$0xff]  ;;  %v4479_v9 = vld [vmem:[%s4450_s23 + $0x40] sm:$0xff]  ;;  %s4363_s16 = smov 46   ;;  %s4365_s21 = smov 84  }
  0x13   : > { %448 = vst.msk [vmem:[#allocation2 + $0xb0] sm:$0xff] %vm397_vm0, %v432_v5  ;;  %444 = vst.msk [vmem:[#allocation2 + $0x80] sm:$0xff] %vm397_vm0, %v428_v6  ;;  %v424_v7 = vld [vmem:[%s4450_s23 + $0x38] sm:$0xff]  ;;  %v4482_v10 = vld [vmem:[%s4450_s23 + $0x20] sm:$0xff]  ;;  %vm2507_vm15 = vcmask 687104  }
  0x14   : > { %v420_v8 = vld [vmem:[%s4450_s23 + $0x18] sm:$0xff]  ;;  %7864 = vst [vmem:[#allocation7_spill] sm:$0xff] %v4479_v9  ;;  %7865 = vst [vmem:[#allocation8_spill] sm:$0xff] %v4482_v10  ;;  %v4491_v11 = vld [vmem:[%s4450_s23 + $0x50] sm:$0xff] }
  0x15   : > { %613 = vrot.lane.b32.xlu0 %v4463_v3, %s4350_s19  ;;  %603 = vrot.lane.b32.xlu1 %v4466_v4, %s4350_s19  ;;  %440 = vst.msk [vmem:[#allocation2 + $0x50] sm:$0xff] %vm397_vm0, %v424_v7  ;;  %436 = vst.msk [vmem:[#allocation2 + $0x20] sm:$0xff] %vm397_vm0, %v420_v8  ;;  %v4494_v12 = vld [vmem:[%s4450_s23 + $0x30] sm:$0xff]  ;;  %v4501_v13 = vld [vmem:[%s4450_s23 + $0x28] sm:$0xff] }
  0x16   : > { %7866 = vst [vmem:[#allocation9_spill] sm:$0xff] %v4491_v11  ;;  %7867 = vst [vmem:[#allocation10_spill] sm:$0xff] %v4494_v12  ;;  %v4504_v14 = vld [vmem:[%s4450_s23] sm:$0xff]  ;;  %v4511_v15 = vld [vmem:[%s4450_s23 + $0x10] sm:$0xff] }
  0x17   : > { %7868 = vst [vmem:[#allocation11_spill] sm:$0xff] %v4501_v13  ;;  %v4518_v16 = vld [vmem:[%s4450_s23 + $0x8] sm:$0xff] }
  0x19   : > { %601 = vrot.lane.b32.xlu0 %v4479_v9, %s4350_s19  ;;  %591 = vrot.lane.b32.xlu1 %v4482_v10, %s4350_s19 }
  0x1a   : > { %v4575_v17 = vld [vmem:[#allocation2 + $0xb0] sm:$0xff]  ;;  %v4580_v18 = vld [vmem:[#allocation2 + $0x80] sm:$0xff] }
  0x1c   : > { %v4587_v19 = vld [vmem:[#allocation2 + $0x50] sm:$0xff]  ;;  %v4598_v20 = vld [vmem:[#allocation2 + $0x20] sm:$0xff] }
  0x1d   : > { %605 = vrot.lane.b32.xlu0 %v4491_v11, %s4350_s19  ;;  %595 = vrot.lane.b32.xlu1 %v4494_v12, %s4350_s19 }
  0x21   : > { %593 = vrot.lane.b32.xlu0 %v4501_v13, %s4350_s19  ;;  %581 = vrot.lane.b32.xlu1 %v4504_v14, %s4350_s19 }
  0x25   : > { %4241 = vrot.lane.b32.xlu0 %v7765_v0, %s4350_s19  ;;  %585 = vrot.lane.b32.xlu1 %v4511_v15, %s4350_s19 }
  0x29   : > { %583 = vrot.lane.b32.xlu0 %v4518_v16, %s4350_s19  ;;  %842 = vrot.lane.b32.xlu1 %v4463_v3, %s4351_s24 }
  0x2d   : > { %840 = vrot.lane.b32.xlu0 %v4456_v2, %s4351_s24  ;;  %556 = vrot.lane.b32.xlu1 %v4456_v2, %s4352_s25 }
  0x31   : > { %844 = vrot.lane.b32.xlu0 %v4453_v1, %s4351_s24  ;;  %560 = vrot.lane.b32.xlu1 %v4453_v1, %s4352_s25 }
  0x35   : > { %558 = vrot.lane.b32.xlu0 %v4463_v3, %s4352_s25  ;;  %834 = vrot.lane.b32.xlu1 %v4466_v4, %s4351_s24 }
  0x39   : > { %832 = vrot.lane.b32.xlu0 %v4479_v9, %s4351_s24  ;;  %4246 = vrot.lane.b32.xlu1 %v7765_v0, %s4352_s25 }
  0x3d   : > { %836 = vrot.lane.b32.xlu0 %v4491_v11, %s4351_s24  ;;  %550 = vrot.lane.b32.xlu1 %v4466_v4, %s4352_s25 }
  0x41   : > { %548 = vrot.lane.b32.xlu0 %v4479_v9, %s4352_s25  ;;  %824 = vrot.lane.b32.xlu1 %v4482_v10, %s4351_s24 }
  0x45   : > { %552 = vrot.lane.b32.xlu0 %v4491_v11, %s4352_s25  ;;  %828 = vrot.lane.b32.xlu1 %v4494_v12, %s4351_s24 }
  0x49   : > { %826 = vrot.lane.b32.xlu0 %v4501_v13, %s4351_s24  ;;  %542 = vrot.lane.b32.xlu1 %v4501_v13, %s4352_s25 }
  0x4d   : > { %540 = vrot.lane.b32.xlu0 %v4482_v10, %s4352_s25  ;;  %816 = vrot.lane.b32.xlu1 %v4504_v14, %s4351_s24 }
  0x51   : > { %544 = vrot.lane.b32.xlu0 %v4494_v12, %s4352_s25  ;;  %820 = vrot.lane.b32.xlu1 %v4511_v15, %s4351_s24 }
  0x55   : > { %818 = vrot.lane.b32.xlu0 %v4518_v16, %s4351_s24  ;;  %532 = vrot.lane.b32.xlu1 %v4504_v14, %s4352_s25 }
  0x59   : > { %4251 = vrot.lane.b32.xlu0 %v7765_v0, %s4352_s25  ;;  %536 = vrot.lane.b32.xlu1 %v4511_v15, %s4352_s25 }
  0x5d   : > { %534 = vrot.lane.b32.xlu0 %v4518_v16, %s4352_s25  ;;  %511 = vrot.lane.b32.xlu1 %v4456_v2, %s4353_s26 }
  0x61   : > { %617 = vrot.lane.b32.xlu0 %v4575_v17, %s4350_s19  ;;  %515 = vrot.lane.b32.xlu1 %v4453_v1, %s4353_s26 }
  0x65   : > { %513 = vrot.lane.b32.xlu0 %v4463_v3, %s4353_s26  ;;  %607 = vrot.lane.b32.xlu1 %v4580_v18, %s4350_s19 }
  0x69   : > { %4256 = vrot.lane.b32.xlu0 %v7765_v0, %s4353_s26  ;;  %505 = vrot.lane.b32.xlu1 %v4466_v4, %s4353_s26 }
  0x6d   : > { %503 = vrot.lane.b32.xlu0 %v4479_v9, %s4353_s26  ;;  %597 = vrot.lane.b32.xlu1 %v4587_v19, %s4350_s19 }
  0x71   : > { %507 = vrot.lane.b32.xlu0 %v4491_v11, %s4353_s26  ;;  %497 = vrot.lane.b32.xlu1 %v4501_v13, %s4353_s26 }
  0x75   : > { %495 = vrot.lane.b32.xlu0 %v4482_v10, %s4353_s26  ;;  %4261 = vrot.lane.b32.xlu1 %v7765_v0, %s4353_s26 }
  0x79   : > { %499 = vrot.lane.b32.xlu0 %v4494_v12, %s4353_s26  ;;  %487 = vrot.lane.b32.xlu1 %v4504_v14, %s4353_s26 }
  0x7d   : > { %587 = vrot.lane.b32.xlu0 %v4598_v20, %s4350_s19  ;;  %491 = vrot.lane.b32.xlu1 %v4511_v15, %s4353_s26  ;;  %s4364_s19 = smov 48  }
  0x7e   : > { %v4603_v21 = vpop.permute.xlu1 %4236 }
  0x81   : > { %489 = vrot.lane.b32.xlu0 %v4518_v16, %s4353_s26  ;;  %797 = vrot.lane.b32.xlu1 %v4463_v3, %s4354_s27  ;;  %s4361_s26 = smov 42  }
  0x83   : > { %v4608_v22 = vpop.permute.xlu1 %615  ;;  %v4610_v23 = vpop.permute.xlu0 %611 }
  0x85   : > { %795 = vrot.lane.b32.xlu0 %v4456_v2, %s4354_s27  ;;  %787 = vrot.lane.b32.xlu1 %v4479_v9, %s4354_s27 }
  0x87   : > { %v4616_v24 = vpop.permute.xlu0 %613  ;;  %v4618_v25 = vpop.permute.xlu1 %603 }
  0x89   : > { %799 = vrot.lane.b32.xlu0 %v4453_v1, %s4354_s27  ;;  %791 = vrot.lane.b32.xlu1 %v4491_v11, %s4354_s27 }
  0x8b   : > { %v4624_v26 = vpop.permute.xlu0 %601  ;;  %v4626_v27 = vpop.permute.xlu1 %591 }
  0x8d   : > { %789 = vrot.lane.b32.xlu0 %v4466_v4, %s4354_s27  ;;  %781 = vrot.lane.b32.xlu1 %v4501_v13, %s4354_s27 }
  0x8f   : > { %v4632_v28 = vpop.permute.xlu0 %605  ;;  %v4634_v29 = vpop.permute.xlu1 %595 }
  0x91   : > { %779 = vrot.lane.b32.xlu0 %v4482_v10, %s4354_s27  ;;  %771 = vrot.lane.b32.xlu1 %v4504_v14, %s4354_s27 }
  0x93   : > { %v4640_v30 = vpop.permute.xlu0 %593  ;;  %v4642_v31 = vpop.permute.xlu1 %581 }
  0x95   : > { %783 = vrot.lane.b32.xlu0 %v4494_v12, %s4354_s27  ;;  %775 = vrot.lane.b32.xlu1 %v4511_v15, %s4354_s27 }
  0x97   : > { %v4648_v32 = vpop.permute.xlu0 %4241  ;;  %v4650_v33 = vpop.permute.xlu1 %585 }
  0x99   : > { %773 = vrot.lane.b32.xlu0 %v4518_v16, %s4354_s27  ;;  %752 = vrot.lane.b32.xlu1 %v4463_v3, %s4355_s28 }
  0x9b   : > { %v4656_v34 = vpop.permute.xlu0 %583  ;;  %v4658_v35 = vpop.permute.xlu1 %842 }
  0x9d   : > { %750 = vrot.lane.b32.xlu0 %v4456_v2, %s4355_s28  ;;  %742 = vrot.lane.b32.xlu1 %v4479_v9, %s4355_s28 }
  0x9f   : > { %v4664_v36 = vpop.permute.xlu0 %840  ;;  %v4666_v37 = vpop.permute.xlu1 %556 }
  0xa1   : > { %754 = vrot.lane.b32.xlu0 %v4453_v1, %s4355_s28  ;;  %746 = vrot.lane.b32.xlu1 %v4491_v11, %s4355_s28 }
  0xa3   : > { %v4672_v38 = vpop.permute.xlu0 %844  ;;  %v4674_v39 = vpop.permute.xlu1 %560 }
  0xa4   : > { %7869 = vst [vmem:[#allocation12_spill] sm:$0xff] %v4672_v38 }
  0xa5   : > { %744 = vrot.lane.b32.xlu0 %v4466_v4, %s4355_s28  ;;  %736 = vrot.lane.b32.xlu1 %v4501_v13, %s4355_s28 }
  0xa7   : > { %v4680_v40 = vpop.permute.xlu0 %558  ;;  %v4682_v41 = vpop.permute.xlu1 %834 }
  0xa9   : > { %734 = vrot.lane.b32.xlu0 %v4482_v10, %s4355_s28  ;;  %726 = vrot.lane.b32.xlu1 %v4504_v14, %s4355_s28 }
  0xab   : > { %v4688_v42 = vpop.permute.xlu0 %832  ;;  %v4690_v43 = vpop.permute.xlu1 %4246 }
  0xad   : > { %738 = vrot.lane.b32.xlu0 %v4494_v12, %s4355_s28  ;;  %730 = vrot.lane.b32.xlu1 %v4511_v15, %s4355_s28 }
  0xaf   : > { %v4696_v44 = vpop.permute.xlu0 %836  ;;  %v4698_v45 = vpop.permute.xlu1 %550 }
  0xb0   : > { %7870 = vst [vmem:[#allocation13_spill] sm:$0xff] %v4696_v44 }
  0xb1   : > { %728 = vrot.lane.b32.xlu0 %v4518_v16, %s4355_s28  ;;  %705 = vrot.lane.b32.xlu1 %v4456_v2, %s4356_s29 }
  0xb3   : > { %v4704_v46 = vpop.permute.xlu0 %548  ;;  %v4706_v47 = vpop.permute.xlu1 %824 }
  0xb5   : > { %801 = vrot.lane.b32.xlu0 %v4575_v17, %s4354_s27  ;;  %709 = vrot.lane.b32.xlu1 %v4453_v1, %s4356_s29 }
  0xb7   : > { %v4712_v48 = vpop.permute.xlu0 %552  ;;  %v4714_v49 = vpop.permute.xlu1 %828 }
  0xb8   : > { %7871 = vst [vmem:[#allocation14_spill] sm:$0xff] %v4714_v49 }
  0xb9   : > { %707 = vrot.lane.b32.xlu0 %v4463_v3, %s4356_s29  ;;  %697 = vrot.lane.b32.xlu1 %v4479_v9, %s4356_s29 }
  0xbb   : > { %v4720_v50 = vpop.permute.xlu0 %826  ;;  %v4722_v51 = vpop.permute.xlu1 %542 }
  0xbd   : > { %793 = vrot.lane.b32.xlu0 %v4580_v18, %s4354_s27  ;;  %701 = vrot.lane.b32.xlu1 %v4491_v11, %s4356_s29 }
  0xbf   : > { %v4728_v52 = vpop.permute.xlu0 %540  ;;  %v4730_v53 = vpop.permute.xlu1 %816 }
  0xc1   : > { %699 = vrot.lane.b32.xlu0 %v4466_v4, %s4356_s29  ;;  %689 = vrot.lane.b32.xlu1 %v4482_v10, %s4356_s29 }
  0xc3   : > { %v4736_v54 = vpop.permute.xlu0 %544  ;;  %v4738_v55 = vpop.permute.xlu1 %820 }
  0xc4   : > { %7872 = vst [vmem:[#allocation15_spill] sm:$0xff] %v4738_v55 }
  0xc5   : > { %785 = vrot.lane.b32.xlu0 %v4587_v19, %s4354_s27  ;;  %693 = vrot.lane.b32.xlu1 %v4494_v12, %s4356_s29 }
  0xc7   : > { %v4744_v56 = vpop.permute.xlu0 %818  ;;  %v4746_v57 = vpop.permute.xlu1 %532 }
  0xc9   : > { %691 = vrot.lane.b32.xlu0 %v4501_v13, %s4356_s29  ;;  %681 = vrot.lane.b32.xlu1 %v4504_v14, %s4356_s29 }
  0xcb   : > { %v4752_v58 = vpop.permute.xlu0 %4251  ;;  %v4754_v59 = vpop.permute.xlu1 %536 }
  0xcd   : > { %777 = vrot.lane.b32.xlu0 %v4598_v20, %s4354_s27  ;;  %685 = vrot.lane.b32.xlu1 %v4511_v15, %s4356_s29 }
  0xcf   : > { %v4760_v60 = vpop.permute.xlu0 %534  ;;  %v4762_v61 = vpop.permute.xlu1 %511 }
  0xd1   : > { %683 = vrot.lane.b32.xlu0 %v4518_v16, %s4356_s29  ;;  %660 = vrot.lane.b32.xlu1 %v4456_v2, %s4357_s30 }
  0xd3   : > { %v4768_v62 = vpop.permute.xlu0 %617  ;;  %v4770_v63 = vpop.permute.xlu1 %515 }
  0xd5   : > { %756 = vrot.lane.b32.xlu0 %v4575_v17, %s4355_s28  ;;  %664 = vrot.lane.b32.xlu1 %v4453_v1, %s4357_s30 }
  0xd7   : > { %v4776_v5 = vpop.permute.xlu0 %513  ;;  %v4778_v6 = vpop.permute.xlu1 %607 }
  0xd9   : > { %662 = vrot.lane.b32.xlu0 %v4463_v3, %s4357_s30  ;;  %652 = vrot.lane.b32.xlu1 %v4479_v9, %s4357_s30  ;;  %v633_v3 = vsel %vm619_vm1, %v4610_v23, %v4616_v24 }
  0xdb   : > { %v4784_v7 = vpop.permute.xlu0 %4256  ;;  %v4786_v8 = vpop.permute.xlu1 %505 }
  0xdd   : > { %748 = vrot.lane.b32.xlu0 %v4580_v18, %s4355_s28  ;;  %656 = vrot.lane.b32.xlu1 %v4491_v11, %s4357_s30 }
  0xdf   : > { %v4792_v0 = vpop.permute.xlu0 %503  ;;  %v4794_v1 = vpop.permute.xlu1 %597 }
  0xe0   : > { %7873 = vst [vmem:[#allocation16_spill] sm:$0xff] %v4792_v0  ;;  %7874 = vst [vmem:[#allocation17_spill] sm:$0xff] %v4794_v1  ;;  %v4238_v1 = vunpack.i.l.bf16 %v4603_v21 }
  0xe1   : > { %654 = vrot.lane.b32.xlu0 %v4466_v4, %s4357_s30  ;;  %1019 = vrot.lane.b32.xlu1 %v633_v3, %s4358_s12  ;;  %v634_v4 = vsel %vm619_vm1, %v4616_v24, %v4608_v22 }
  0xe3   : > { %v4802_v9 = vpop.permute.xlu0 %507  ;;  %v4804_v2 = vpop.permute.xlu1 %497 }
  0xe4   : > { %7875 = vst [vmem:[#allocation18_spill] sm:$0xff] %v4804_v2 }
  0xe5   : > { %740 = vrot.lane.b32.xlu0 %v4587_v19, %s4355_s28  ;;  %644 = vrot.lane.b32.xlu1 %v4482_v10, %s4357_s30 }
  0xe7   : > { %v4810_v11 = vpop.permute.xlu0 %495  ;;  %v4812_v0 = vpop.permute.xlu1 %4261 }
  0xe9   : > { %1021 = vrot.lane.b32.xlu0 %v634_v4, %s4358_s12  ;;  %648 = vrot.lane.b32.xlu1 %v4494_v12, %s4357_s30  ;;  %v632_v4 = vsel %vm619_vm1, %v4238_v1, %v4610_v23  ;;  %v630_v12 = vsel %vm619_vm1, %v4618_v25, %v4632_v28  ;;  %v4239_v1 = vunpack.i.h.bf16 %v4603_v21  ;;  %v625_v21 = vsel %vm619_vm1, %v4626_v27, %v4640_v30 }
  0xeb   : > { %v4820_v3 = vpop.permute.xlu0 %499  ;;  %v4822_v2 = vpop.permute.xlu1 %487 }
  0xec   : > { %7876 = vst [vmem:[#allocation19_spill] sm:$0xff] %v4820_v3 }
  0xed   : > { %646 = vrot.lane.b32.xlu0 %v4501_v13, %s4357_s30  ;;  %732 = vrot.lane.b32.xlu1 %v4598_v20, %s4355_s28 }
  0xef   : > { %v4829_v10 = vpop.permute.xlu0 %587  ;;  %v4831_v24 = vpop.permute.xlu1 %491 }
  0xf0   : > { %7877 = vst [vmem:[#allocation20_spill] sm:$0xff] %v4829_v10  ;;  %v629_v10 = vsel %vm619_vm1, %v4624_v26, %v4618_v25 }
  0xf1   : > { %1017 = vrot.lane.b32.xlu0 %v632_v4, %s4358_s12  ;;  %1013 = vrot.lane.b32.xlu1 %v630_v12, %s4358_s12  ;;  %v628_v12 = vsel %vm619_vm1, %v4239_v1, %v4624_v26 }
  0xf3   : > { %v4840_v3 = vpop.permute.xlu0 %489  ;;  %v4842_v13 = vpop.permute.xlu1 %797 }
  0xf4   : > { %7878 = vst [vmem:[#allocation21_spill] sm:$0xff] %v4842_v13  ;;  %v4243_v13 = vunpack.i.l.bf16 %v4648_v32 }
  0xf5   : > { %1011 = vrot.lane.b32.xlu0 %v629_v10, %s4358_s12  ;;  %638 = vrot.lane.b32.xlu1 %v4518_v16, %s4357_s30 }
  0xf7   : > { %v4851_v23 = vpop.permute.xlu0 %795  ;;  %v4853_v4 = vpop.permute.xlu1 %787 }
  0xf9   : > { %636 = vrot.lane.b32.xlu0 %v4504_v14, %s4357_s30  ;;  %1009 = vrot.lane.b32.xlu1 %v628_v12, %s4358_s12  ;;  %v624_v12 = vsel %vm619_vm1, %v4243_v13, %v4626_v27 }
  0xfb   : > { %v4860_v25 = vpop.permute.xlu0 %799  ;;  %v4862_v10 = vpop.permute.xlu1 %791 }
  0xfc   : > { %7879 = vst [vmem:[#allocation22_spill] sm:$0xff] %v4860_v25  ;;  %7880 = vst [vmem:[#allocation23_spill] sm:$0xff] %v4862_v10 }
  0xfd   : > { %640 = vrot.lane.b32.xlu0 %v4511_v15, %s4357_s30  ;;  %1003 = vrot.lane.b32.xlu1 %v625_v21, %s4358_s12  ;;  %v626_v15 = vsel %vm619_vm1, %v4640_v30, %v4634_v29  ;;  %v621_v21 = vsel %vm619_vm1, %v4642_v31, %v4656_v34 }
  0xff   : > { %v4871_v26 = vpop.permute.xlu0 %789  ;;  %v4873_v1 = vpop.permute.xlu1 %781 }
 0x101   : > { %711 = vrot.lane.b32.xlu0 %v4575_v17, %s4356_s29  ;;  %1001 = vrot.lane.b32.xlu1 %v624_v12, %s4358_s12  ;;  %v4244_v12 = vunpack.i.h.bf16 %v4648_v32 }
 0x103   : > { %v4880_v10 = vpop.permute.xlu0 %779  ;;  %v4882_v25 = vpop.permute.xlu1 %771  ;;  %v620_v32 = vsel %vm619_vm1, %v4244_v12, %v4642_v31  ;;  %v574_v12 = vsel %vm562_vm3, %v4680_v40, %v4674_v39 }
 0x104   : > { %7881 = vst [vmem:[#allocation24_spill] sm:$0xff] %v4882_v25  ;;  %v858_v25 = vsel %vm848_vm2, %v4664_v36, %v4658_v35 }
 0x105   : > { %1005 = vrot.lane.b32.xlu0 %v626_v15, %s4358_s12  ;;  %995 = vrot.lane.b32.xlu1 %v621_v21, %s4358_s12  ;;  %v622_v21 = vsel %vm619_vm1, %v4656_v34, %v4650_v33 }
 0x107   : > { %v4892_v13 = vpop.permute.xlu0 %783  ;;  %v4894_v27 = vpop.permute.xlu1 %775 }
 0x108   : > { %7882 = vst [vmem:[#allocation25_spill] sm:$0xff] %v4892_v13  ;;  %7883 = vst [vmem:[#allocation26_spill] sm:$0xff] %v4894_v27 }
 0x109   : > { %703 = vrot.lane.b32.xlu0 %v4580_v18, %s4356_s29  ;;  %1179 = vrot.lane.b32.xlu1 %v858_v25, %s4358_s12  ;;  %v859_v25 = vsel %vm848_vm2, %v4658_v35, %v4672_v38 }
 0x10b   : > { %v4903_v30 = vpop.permute.xlu0 %773  ;;  %v4905_v15 = vpop.permute.xlu1 %752 }
 0x10d   : > { %997 = vrot.lane.b32.xlu0 %v622_v21, %s4358_s12  ;;  %993 = vrot.lane.b32.xlu1 %v620_v32, %s4358_s12  ;;  %v573_v32 = vsel %vm562_vm3, %v4666_v37, %v4680_v40 }
 0x10f   : > { %v4914_v27 = vpop.permute.xlu0 %750  ;;  %v4916_v13 = vpop.permute.xlu1 %742 }
 0x111   : > { %1181 = vrot.lane.b32.xlu0 %v859_v25, %s4358_s12  ;;  %695 = vrot.lane.b32.xlu1 %v4587_v19, %s4356_s29  ;;  %v856_v25 = vsel %vm848_vm2, %v4682_v41, %v4696_v44 }
 0x113   : > { %v4924_v34 = vpop.permute.xlu0 %754  ;;  %v4926_v31 = vpop.permute.xlu1 %746 }
 0x114   : > { %7884 = vst [vmem:[#allocation27_spill] sm:$0xff] %v4926_v31  ;;  %v855_v31 = vsel %vm848_vm2, %v4688_v42, %v4682_v41 }
 0x115   : > { %1177 = vrot.lane.b32.xlu0 %v4664_v36, %s4358_s12  ;;  %989 = vrot.lane.b32.xlu1 %v574_v12, %s4358_s12  ;;  %v4248_v12 = vunpack.i.l.bf16 %v4690_v43 }
 0x117   : > { %v4934_v35 = vpop.permute.xlu0 %744  ;;  %v4936_v21 = vpop.permute.xlu1 %736  ;;  %v572_v44 = vsel %vm562_vm3, %v4248_v12, %v4666_v37 }
 0x119   : > { %987 = vrot.lane.b32.xlu0 %v573_v32, %s4358_s12  ;;  %1173 = vrot.lane.b32.xlu1 %v856_v25, %s4358_s12  ;;  %v570_v25 = vsel %vm562_vm3, %v4704_v46, %v4698_v45 }
 0x11b   : > { %v4946_v38 = vpop.permute.xlu0 %734  ;;  %v4948_v36 = vpop.permute.xlu1 %726 }
 0x11d   : > { %1171 = vrot.lane.b32.xlu0 %v855_v31, %s4358_s12  ;;  %1169 = vrot.lane.b32.xlu1 %v4688_v42, %s4358_s12  ;;  %v4249_v42 = vunpack.i.h.bf16 %v4690_v43  ;;  %v571_v43 = vsel %vm562_vm3, %v4698_v45, %v4712_v48 }
 0x11f   : > { %v4957_v40 = vpop.permute.xlu0 %738  ;;  %v4959_v32 = vpop.permute.xlu1 %730 }
 0x120   : > { %7885 = vst [vmem:[#allocation28_spill] sm:$0xff] %v4959_v32  ;;  %v852_v32 = vsel %vm848_vm2, %v4706_v47, %v4720_v50 }
 0x121   : > { %979 = vrot.lane.b32.xlu1 %v570_v25, %s4358_s12  ;;  %985 = vrot.lane.b32.xlu0 %v572_v44, %s4358_s12  ;;  %v569_v44 = vsel %vm562_vm3, %v4249_v42, %v4704_v46  ;;  %v568_v42 = vsel %vm562_vm3, %v4722_v51, %v4736_v54 }
 0x123   : > { %v4968_v41 = vpop.permute.xlu0 %728  ;;  %v4970_v31 = vpop.permute.xlu1 %705 }
 0x125   : > { %1163 = vrot.lane.b32.xlu1 %v852_v32, %s4358_s12  ;;  %687 = vrot.lane.b32.xlu0 %v4598_v20, %s4356_s29 }
 0x127   : > { %v4979_v37 = vpop.permute.xlu0 %801  ;;  %v4981_v12 = vpop.permute.xlu1 %709 }
 0x128   : > { %7886 = vst [vmem:[#allocation29_spill] sm:$0xff] %v4979_v37  ;;  %v853_v37 = vsel %vm848_vm2, %v4720_v50, %v4714_v49 }
 0x129   : > { %977 = vrot.lane.b32.xlu1 %v569_v44, %s4358_s12  ;;  %981 = vrot.lane.b32.xlu0 %v571_v43, %s4358_s12  ;;  %v567_v43 = vsel %vm562_vm3, %v4728_v52, %v4722_v51 }
 0x12b   : > { %v4990_v25 = vpop.permute.xlu0 %707  ;;  %v4992_v32 = vpop.permute.xlu1 %697 }
 0x12d   : > { %666 = vrot.lane.b32.xlu1 %v4575_v17, %s4357_s30  ;;  %1165 = vrot.lane.b32.xlu0 %v853_v37, %s4358_s12  ;;  %v850_v37 = vsel %vm848_vm2, %v4744_v56, %v4738_v55 }
 0x12f   : > { %v5000_v46 = vpop.permute.xlu0 %793  ;;  %v5002_v45 = vpop.permute.xlu1 %701 }
 0x130   : > { %7887 = vst [vmem:[#allocation30_spill] sm:$0xff] %v5002_v45  ;;  %v849_v45 = vsel %vm848_vm2, %v4730_v53, %v4744_v56 }
 0x131   : > { %973 = vrot.lane.b32.xlu1 %v568_v42, %s4358_s12  ;;  %1161 = vrot.lane.b32.xlu0 %v4706_v47, %s4358_s12  ;;  %v4253_v47 = vunpack.i.l.bf16 %v4752_v58 }
 0x133   : > { %v5010_v44 = vpop.permute.xlu0 %699  ;;  %v5012_v50 = vpop.permute.xlu1 %689 }
 0x135   : > { %1157 = vrot.lane.b32.xlu1 %v850_v37, %s4358_s12  ;;  %971 = vrot.lane.b32.xlu0 %v567_v43, %s4358_s12  ;;  %v566_v43 = vsel %vm562_vm3, %v4253_v47, %v4728_v52  ;;  %v635_v47 = vsel %vm619_vm1, %v4608_v22, %v4768_v62 }
 0x137   : > { %v5022_v42 = vpop.permute.xlu0 %785  ;;  %v5024_v49 = vpop.permute.xlu1 %693 }
 0x139   : > { %1153 = vrot.lane.b32.xlu1 %v4730_v53, %s4358_s12  ;;  %1155 = vrot.lane.b32.xlu0 %v849_v45, %s4358_s12  ;;  %v565_v53 = vsel %vm562_vm3, %v4760_v60, %v4754_v59 }
 0x13b   : > { %v5033_v51 = vpop.permute.xlu0 %691  ;;  %v5035_v37 = vpop.permute.xlu1 %681 }
 0x13d   : > { %846 = vrot.lane.b32.xlu1 %v4575_v17, %s4351_s24  ;;  %969 = vrot.lane.b32.xlu0 %v566_v43, %s4358_s12  ;;  %v4254_v17 = vunpack.i.h.bf16 %v4752_v58  ;;  %v564_v43 = vsel %vm562_vm3, %v4746_v57, %v4760_v60  ;;  %v529_v60 = vsel %vm517_vm4, %v4776_v5, %v4770_v63 }
 0x13f   : > { %v5042_v55 = vpop.permute.xlu0 %777  ;;  %v5044_v56 = vpop.permute.xlu1 %685 }
 0x140   : > { %7888 = vst [vmem:[#allocation31_spill] sm:$0xff] %v5044_v56 }
 0x141   : > { %965 = vrot.lane.b32.xlu1 %v565_v53, %s4358_s12  ;;  %658 = vrot.lane.b32.xlu0 %v4580_v18, %s4357_s30 }
 0x143   : > { %v5052_v45 = vpop.permute.xlu0 %683  ;;  %v5054_v52 = vpop.permute.xlu1 %660 }
 0x144   : > { %7889 = vst [vmem:[#allocation32_spill] sm:$0xff] %v5054_v52  ;;  %v563_v52 = vsel %vm562_vm3, %v4254_v17, %v4746_v57  ;;  %v528_v17 = vsel %vm517_vm4, %v4762_v61, %v4776_v5  ;;  %v526_v5 = vsel %vm517_vm4, %v4786_v8, %v4802_v9 }
 0x145   : > { %1023 = vrot.lane.b32.xlu1 %v635_v47, %s4358_s12  ;;  %963 = vrot.lane.b32.xlu0 %v564_v43, %s4358_s12 }
 0x147   : > { %v5065_v53 = vpop.permute.xlu0 %756  ;;  %v5067_v56 = vpop.permute.xlu1 %664 }
 0x149   : > { %838 = vrot.lane.b32.xlu1 %v4580_v18, %s4351_s24  ;;  %961 = vrot.lane.b32.xlu0 %v563_v52, %s4358_s12  ;;  %v631_v18 = vsel %vm619_vm1, %v4632_v28, %v4778_v6  ;;  %v4258_v52 = vunpack.i.l.bf16 %v4784_v7 }
 0x14b   : > { %v5074_v22 = vpop.permute.xlu0 %662  ;;  %v5076_v58 = vpop.permute.xlu1 %652 }
 0x14d   : > { %957 = vrot.lane.b32.xlu1 %v529_v60, %s4358_s12  ;;  %650 = vrot.lane.b32.xlu0 %v4587_v19, %s4357_s30  ;;  %v527_v60 = vsel %vm517_vm4, %v4258_v52, %v4762_v61 }
 0x14f   : > { %v5084_v57 = vpop.permute.xlu0 %748  ;;  %v5086_v62 = vpop.permute.xlu1 %656 }
 0x150   : > { %7890 = vst [vmem:[#allocation33_spill] sm:$0xff] %v5086_v62 }
 0x151   : > { %1015 = vrot.lane.b32.xlu1 %v631_v18, %s4358_s12  ;;  %955 = vrot.lane.b32.xlu0 %v528_v17, %s4358_s12 }
 0x153   : > { %v5097_v47 = vpop.permute.xlu0 %654  ;;  %v1020_v43 = vpop.permute.xlu1 %1019 }
 0x155   : > { %830 = vrot.lane.b32.xlu1 %v4587_v19, %s4351_s24  ;;  %953 = vrot.lane.b32.xlu0 %v527_v60, %s4358_s12  ;;  %v7894_v19 = vld [vmem:[#allocation17_spill] sm:$0xff]  ;;  %v7895_v60 = vld [vmem:[#allocation16_spill] sm:$0xff] }
 0x156   : > { %v627_v52 = vsel %vm619_vm1, %v4634_v29, %v7894_v19  ;;  %v4263_v29 = vunpack.i.l.bf16 %v4812_v0  ;;  %v7897_v19 = vld [vmem:[#allocation18_spill] sm:$0xff] }
 0x157   : > { %v5104_v28 = vpop.permute.xlu0 %740  ;;  %v5106_v6 = vpop.permute.xlu1 %644 }
 0x158   : > { %7891 = vst [vmem:[#allocation34_spill] sm:$0xff] %v5104_v28  ;;  %7892 = vst [vmem:[#allocation35_spill] sm:$0xff] %v5106_v6  ;;  %v4259_v28 = vunpack.i.h.bf16 %v4784_v7 }
 0x159   : > { %949 = vrot.lane.b32.xlu1 %v526_v5, %s4358_s12  ;;  %642 = vrot.lane.b32.xlu0 %v4598_v20, %s4357_s30  ;;  %v525_v5 = vsel %vm517_vm4, %v7895_v60, %v4786_v8 }
 0x15b   : > { %v5114_v61 = vpop.permute.xlu0 %1021  ;;  %v5116_v18 = vpop.permute.xlu1 %648 }
 0x15c   : > { %7893 = vst [vmem:[#allocation36_spill] sm:$0xff] %v5116_v18  ;;  %v1232_v17 = vsel %vm1185_vm5, %v1020_v43, %v5114_v61 }
 0x15d   : > { %1451 = vmatprep.subr.mxu0 %v1232_v17  ;;  %1007 = vrot.lane.b32.xlu1 %v627_v52, %s4358_s12  ;;  %v522_v17 = vsel %vm517_vm4, %v4810_v11, %v7897_v19  ;;  %v524_v52 = vsel %vm517_vm4, %v4259_v28, %v7895_v60  ;;  %v4264_v28 = vunpack.i.h.bf16 %v4812_v0 }
 0x15e   : > { %947 = vrot.lane.b32.xlu0 %v525_v5, %s4358_s12 }
 0x15f   : > { %v5129_v62 = vpop.permute.xlu0 %646  ;;  %v5131_v18 = vpop.permute.xlu1 %732 }
 0x160   : > { %7896 = vst [vmem:[#allocation17_spill] sm:$0xff] %v5131_v18  ;;  %v521_v18 = vsel %vm517_vm4, %v4263_v29, %v4810_v11  ;;  %v7898_v11 = vld [vmem:[#allocation19_spill] sm:$0xff] }
 0x161   : > { %939 = vrot.lane.b32.xlu1 %v522_v17, %s4358_s12 }
 0x162   : > { %945 = vrot.lane.b32.xlu0 %v524_v52, %s4358_s12  ;;  %v518_v52 = vsel %vm517_vm4, %v4264_v28, %v4822_v2  ;;  %v7901_v28 = vmov 0.0  }
 0x163   : > { %v1018_v8 = vpop.permute.xlu0 %1017  ;;  %v5141_v5 = vpop.permute.xlu1 %1013 }
 0x164   : > { %v1231_v7 = vsel %vm1185_vm5, %v1018_v8, %v1020_v43  ;;  %v519_v43 = vsel %vm517_vm4, %v4822_v2, %v4840_v3  ;;  %v7899_v8 = vld [vmem:[#allocation20_spill] sm:$0xff] }
 0x165   : > { %1452 = vmatpush1.msra.mxu0 %v1231_v7  ;;  %937 = vrot.lane.b32.xlu1 %v521_v18, %s4358_s12  ;;  %v523_v18 = vsel %vm517_vm4, %v7897_v19, %v7898_v11  ;;  %v623_v7 = vsel %vm619_vm1, %v4650_v33, %v7899_v8  ;;  %v7903_v8 = vld [vmem:[#allocation5_spill] sm:$0xff]  ;;  %vm2979_vm1 = vcmask 343040  }
 0x166   : > { %822 = vrot.lane.b32.xlu0 %v4598_v20, %s4351_s24 }
 0x167   : > { %v1012_v17 = vpop.permute.xlu0 %1011  ;;  %v5149_v6 = vpop.permute.xlu1 %638 }
 0x168   : > { %v1229_v60 = vsel %vm1185_vm5, %v1012_v17, %v5141_v5 }
 0x169   : > { %1453 = vmatprep.subr.mxu0 %v1229_v60  ;;  %931 = vrot.lane.b32.xlu1 %v519_v43, %s4358_s12  ;;  %v7900_v43 = vld [vmem:[#allocation4_spill] sm:$0xff] }
 0x16a   : > { %941 = vrot.lane.b32.xlu0 %v523_v18, %s4358_s12 }
 0x16b   : > { %v5162_v20 = vpop.permute.xlu0 %636  ;;  %v1010_v29 = vpop.permute.xlu1 %1009 }
 0x16c   : > { %v1228_v0 = vsel %vm1185_vm5, %v1010_v29, %v1012_v17  ;;  %v520_v17 = vsel %vm517_vm4, %v4840_v3, %v4831_v24  ;;  %v7902_v3 = vld [vmem:[#allocation7_spill] sm:$0xff] }
 0x16d   : > { %1454 = vmatpush1.msra.mxu0 %v1228_v0  ;;  %929 = vrot.lane.b32.xlu1 %v518_v52, %s4358_s12 }
 0x16e   : > { %999 = vrot.lane.b32.xlu0 %v623_v7, %s4358_s12 }
 0x16f   : > { %v5172_v19 = vpop.permute.xlu0 %640  ;;  %v1004_v60 = vpop.permute.xlu1 %1003 }
 0x171   : > { %923 = vrot.lane.b32.xlu1 %v7900_v43, %s4358_s12 }
 0x172   : > { %933 = vrot.lane.b32.xlu0 %v520_v17, %s4358_s12 }
 0x173   : > { %v5180_v2 = vpop.permute.xlu0 %711  ;;  %v1002_v33 = vpop.permute.xlu1 %1001 }
 0x174   : > { %v1225_v52 = vsel %vm1185_vm5, %v1002_v33, %v1004_v60  ;;  %v7904_v33 = vld [vmem:[#allocation11_spill] sm:$0xff] }
 0x175   : > { %4266 = vrot.lane.b32.xlu1 %v7901_v28, %s4358_s12 }
 0x176   : > { %991 = vrot.lane.b32.xlu0 %v4674_v39, %s4358_s12 }
 0x177   : > { %v5186_v18 = vpop.permute.xlu0 %1005  ;;  %v996_v29 = vpop.permute.xlu1 %995 }
 0x178   : > { %v1226_v0 = vsel %vm1185_vm5, %v1004_v60, %v5186_v18 }
 0x179   : > { %1455 = vmatprep.subr.mxu0 %v1226_v0  ;;  %915 = vrot.lane.b32.xlu1 %v7902_v3, %s4358_s12  ;;  %v7905_v3 = vld [vmem:[#allocation6_spill] sm:$0xff] }
 0x17a   : > { %925 = vrot.lane.b32.xlu0 %v7903_v8, %s4358_s12  ;;  %1456 = vmatpush1.msra.mxu0 %v1225_v52 }
 0x17b   : > { %v5195_v7 = vpop.permute.xlu0 %703  ;;  %v1180_v43 = vpop.permute.xlu1 %1179 }
 0x17d   : > { %975 = vrot.lane.b32.xlu1 %v4736_v54, %s4358_s12 }
 0x17e   : > { %983 = vrot.lane.b32.xlu0 %v4712_v48, %s4358_s12 }
 0x17f   : > { %v5201_v39 = vpop.permute.xlu0 %997  ;;  %v994_v17 = vpop.permute.xlu1 %993 }
 0x180   : > { %v1223_v0 = vsel %vm1185_vm5, %v996_v29, %v5201_v39  ;;  %v1222_v60 = vsel %vm1185_vm5, %v994_v17, %v996_v29  ;;  %v7906_v29 = vld [vmem:[#allocation8_spill] sm:$0xff] }
 0x181   : > { %1457 = vmatprep.subr.mxu0 %v1223_v0  ;;  %909 = vrot.lane.b32.xlu1 %v7904_v33, %s4358_s12 }
 0x182   : > { %917 = vrot.lane.b32.xlu0 %v7905_v3, %s4358_s12  ;;  %1458 = vmatpush1.msra.mxu0 %v1222_v60  ;;  %v7907_v3 = vld [vmem:[#allocation21_spill] sm:$0xff] }
 0x183   : > { %v5210_v54 = vpop.permute.xlu0 %1181  ;;  %v5212_v52 = vpop.permute.xlu1 %695 }
 0x184   : > { %v1292_v48 = vsel %vm1185_vm5, %v1180_v43, %v5210_v54 }
 0x185   : > { %1564 = vmatprep.subr.mxu1 %v1292_v48  ;;  %967 = vrot.lane.b32.xlu1 %v4754_v59, %s4358_s12  ;;  %v813_v48 = vsel %vm803_vm6, %v4851_v23, %v7907_v3 }
 0x186   : > { %907 = vrot.lane.b32.xlu0 %v7906_v29, %s4358_s12 }
 0x187   : > { %v1178_v8 = vpop.permute.xlu0 %1177  ;;  %v5220_v17 = vpop.permute.xlu1 %989 }
 0x188   : > { %v1291_v0 = vsel %vm1185_vm5, %v1178_v8, %v1180_v43 }
 0x189   : > { %1565 = vmatpush1.msra.mxu1 %v1291_v0  ;;  %901 = vrot.lane.b32.xlu1 %v4518_v16, %s4358_s12 }
 0x18a   : > { %4271 = vrot.lane.b32.xlu0 %v7901_v28, %s4358_s12 }
 0x18b   : > { %v988_v60 = vpop.permute.xlu0 %987  ;;  %v5227_v33 = vpop.permute.xlu1 %1173 }
 0x18c   : > { %v1220_v59 = vsel %vm1185_vm5, %v988_v60, %v5220_v17 }
 0x18d   : > { %1459 = vmatprep.subr.mxu0 %v1220_v59  ;;  %1147 = vrot.lane.b32.xlu1 %v813_v48, %s4358_s12  ;;  %v7908_v48 = vld [vmem:[#allocation22_spill] sm:$0xff] }
 0x18e   : > { %899 = vrot.lane.b32.xlu0 %v4504_v14, %s4358_s12  ;;  %v810_v14 = vsel %vm803_vm6, %v4853_v4, %v4871_v26 }
 0x18f   : > { %v1172_v16 = vpop.permute.xlu0 %1171  ;;  %v1170_v43 = vpop.permute.xlu1 %1169 }
 0x190   : > { %v1289_v28 = vsel %vm1185_vm5, %v1172_v16, %v5227_v33  ;;  %v1288_v29 = vsel %vm1185_vm5, %v1170_v43, %v1172_v16  ;;  %v814_v16 = vsel %vm803_vm6, %v7907_v3, %v7908_v48 }
 0x191   : > { %1566 = vmatprep.subr.mxu1 %v1289_v28  ;;  %951 = vrot.lane.b32.xlu1 %v4802_v9, %s4358_s12  ;;  %v807_v28 = vsel %vm803_vm6, %v4880_v10, %v4873_v1 }
 0x192   : > { %959 = vrot.lane.b32.xlu0 %v4770_v63, %s4358_s12  ;;  %1567 = vmatpush1.msra.mxu1 %v1288_v29 }
 0x193   : > { %v980_v8 = vpop.permute.xlu1 %979  ;;  %v986_v0 = vpop.permute.xlu0 %985 }
 0x194   : > { %v1219_v59 = vsel %vm1185_vm5, %v986_v0, %v988_v60  ;;  %v7909_v0 = vld [vmem:[#allocation23_spill] sm:$0xff] }
 0x195   : > { %1139 = vrot.lane.b32.xlu1 %v810_v14, %s4358_s12  ;;  %1460 = vmatpush1.msra.mxu0 %v1219_v59 }
 0x196   : > { %1149 = vrot.lane.b32.xlu0 %v814_v16, %s4358_s12  ;;  %v7910_v16 = vld [vmem:[#allocation24_spill] sm:$0xff] }
 0x197   : > { %v1164_v9 = vpop.permute.xlu1 %1163  ;;  %v5253_v63 = vpop.permute.xlu0 %687 }
 0x199   : > { %943 = vrot.lane.b32.xlu1 %v7898_v11, %s4358_s12  ;;  %v811_v11 = vsel %vm803_vm6, %v4871_v26, %v7909_v0 }
 0x19a   : > { %1145 = vrot.lane.b32.xlu0 %v4851_v23, %s4358_s12 }
 0x19b   : > { %v978_v43 = vpop.permute.xlu1 %977  ;;  %v5259_v60 = vpop.permute.xlu0 %981 }
 0x19c   : > { %v1217_v3 = vsel %vm1185_vm5, %v980_v8, %v5259_v60  ;;  %v1216_v29 = vsel %vm1185_vm5, %v978_v43, %v980_v8  ;;  %v804_v43 = vsel %vm803_vm6, %v7910_v16, %v4903_v30 }
 0x19d   : > { %1131 = vrot.lane.b32.xlu1 %v807_v28, %s4358_s12  ;;  %1461 = vmatprep.subr.mxu0 %v1217_v3  ;;  %v7911_v3 = vld [vmem:[#allocation25_spill] sm:$0xff] }
 0x19e   : > { %1141 = vrot.lane.b32.xlu0 %v811_v11, %s4358_s12  ;;  %1462 = vmatpush1.msra.mxu0 %v1216_v29  ;;  %v808_v29 = vsel %vm803_vm6, %v4873_v1, %v7911_v3  ;;  %v768_v1 = vsel %vm758_vm7, %v4914_v27, %v4905_v15 }
 0x19f   : > { %v5272_v23 = vpop.permute.xlu1 %666  ;;  %v5274_v14 = vpop.permute.xlu0 %1165 }
 0x1a0   : > { %v1286_v59 = vsel %vm1185_vm5, %v1164_v9, %v5274_v14 }
 0x1a1   : > { %935 = vrot.lane.b32.xlu1 %v4831_v24, %s4358_s12  ;;  %1568 = vmatprep.subr.mxu1 %v1286_v59  ;;  %v7913_v59 = vld [vmem:[#allocation3_spill] sm:$0xff] }
 0x1a2   : > { %1137 = vrot.lane.b32.xlu0 %v4853_v4, %s4358_s12 }
 0x1a3   : > { %v5282_v8 = vpop.permute.xlu1 %973  ;;  %v1162_v26 = vpop.permute.xlu0 %1161 }
 0x1a4   : > { %v1285_v28 = vsel %vm1185_vm5, %v1162_v26, %v1164_v9 }
 0x1a5   : > { %1123 = vrot.lane.b32.xlu1 %v804_v43, %s4358_s12  ;;  %1569 = vmatpush1.msra.mxu1 %v1285_v28 }
 0x1a6   : > { %1133 = vrot.lane.b32.xlu0 %v808_v29, %s4358_s12  ;;  %v5310_v29 = vld [vmem:[%s7754_s1 + $0x10] sm:$0xff] }
 0x1a7   : > { %v5293_v24 = vpop.permute.xlu1 %1157  ;;  %v972_v4 = vpop.permute.xlu0 %971  ;;  %7914 = vst [vmem:[#allocation18_spill] sm:$0xff] %v5310_v29 }
 0x1a8   : > { %7912 = vst [vmem:[#allocation16_spill] sm:$0xff] %v5293_v24  ;;  %v1214_v11 = vsel %vm1185_vm5, %v972_v4, %v5282_v8 }
 0x1a9   : > { %927 = vrot.lane.b32.xlu1 %v7913_v59, %s4358_s12  ;;  %1463 = vmatprep.subr.mxu0 %v1214_v11 }
 0x1aa   : > { %1129 = vrot.lane.b32.xlu0 %v4880_v10, %s4358_s12  ;;  %v7915_v10 = vld [vmem:[#allocation26_spill] sm:$0xff] }
 0x1ab   : > { %v1154_v9 = vpop.permute.xlu1 %1153  ;;  %v1156_v26 = vpop.permute.xlu0 %1155  ;;  %v805_v11 = vsel %vm803_vm6, %v4903_v30, %v7915_v10 }
 0x1ac   : > { %v1283_v43 = vsel %vm1185_vm5, %v1156_v26, %v5293_v24  ;;  %v1282_v28 = vsel %vm1185_vm5, %v1154_v9, %v1156_v26  ;;  %v5322_v26 = vld [vmem:[#allocation2 + $0x60] sm:$0xff] }
 0x1ad   : > { %1115 = vrot.lane.b32.xlu1 %v768_v1, %s4358_s12  ;;  %1570 = vmatprep.subr.mxu1 %v1283_v43  ;;  %v7916_v1 = vld [vmem:[#allocation9_spill] sm:$0xff] }
 0x1ae   : > { %1125 = vrot.lane.b32.xlu0 %v805_v11, %s4358_s12  ;;  %1571 = vmatpush1.msra.mxu1 %v1282_v28  ;;  %v765_v28 = vsel %vm758_vm7, %v4916_v13, %v4934_v35 }
 0x1af   : > { %v5317_v59 = vpop.permute.xlu1 %846  ;;  %v970_v24 = vpop.permute.xlu0 %969  ;;  %4086 = vmatmul.mubr.msk.f32.vlgmr.msra.gmra.mxu1 %vm1438_vm8, %v5310_v29 }
 0x1b0   : > { %v1213_v9 = vsel %vm1185_vm5, %v970_v24, %v972_v4  ;;  %1610 = vmatprep.mubr.f32.mxu1 %v5322_v26  ;;  %v769_v24 = vsel %vm758_vm7, %v4905_v15, %v4924_v34 }
 0x1b1   : > { %919 = vrot.lane.b32.xlu1 %v7916_v1, %s4358_s12  ;;  %1464 = vmatpush1.msra.mxu0 %v1213_v9  ;;  %v7917_v1 = vld [vmem:[#allocation10_spill] sm:$0xff] }
 0x1b2   : > { %1121 = vrot.lane.b32.xlu0 %v7910_v16, %s4358_s12 }
 0x1b3   : > { %v5329_v30 = vpop.permute.xlu1 %965  ;;  %v5331_v43 = vpop.permute.xlu0 %658 }
 0x1b5   : > { %1107 = vrot.lane.b32.xlu1 %v765_v28, %s4358_s12 }
 0x1b6   : > { %1117 = vrot.lane.b32.xlu0 %v769_v24, %s4358_s12  ;;  %v762_v24 = vsel %vm758_vm7, %v4946_v38, %v4936_v21 }
 0x1b7   : > { %v1024_v4 = vpop.permute.xlu1 %1023  ;;  %v964_v11 = vpop.permute.xlu0 %963 }
 0x1b8   : > { %1629 = vmatprep.subr.mxu1 %v1024_v4  ;;  %v1211_v16 = vsel %vm1185_vm5, %v964_v11, %v5329_v30  ;;  %v1233_v9 = vsel %vm1185_vm5, %v5114_v61, %v1024_v4  ;;  %v7918_v61 = vld [vmem:[#allocation27_spill] sm:$0xff] }
 0x1b9   : > { %911 = vrot.lane.b32.xlu1 %v7917_v1, %s4358_s12  ;;  %1465 = vmatprep.subr.mxu0 %v1211_v16  ;;  %v766_v4 = vsel %vm758_vm7, %v4934_v35, %v7918_v61  ;;  %v759_v35 = vsel %vm758_vm7, %v4948_v36, %v4968_v41 }
 0x1ba   : > { %1113 = vrot.lane.b32.xlu0 %v4914_v27, %s4358_s12  ;;  %1630 = vmatpush1.msra.mxu1 %v1233_v9  ;;  %v4334_v9 = vld [vmem:[%s4450_s23 + $0x10] sm:$0xff] }
 0x1bb   : > { %v5349_v15 = vpop.permute.xlu1 %838  ;;  %v962_v28 = vpop.permute.xlu0 %961 }
 0x1bc   : > { %v1210_v29 = vsel %vm1185_vm5, %v962_v28, %v964_v11 }
 0x1bd   : > { %1099 = vrot.lane.b32.xlu1 %v762_v24, %s4358_s12  ;;  %1466 = vmatpush1.msra.mxu0 %v1210_v29  ;;  %v763_v24 = vsel %vm758_vm7, %v4936_v21, %v4957_v40 }
 0x1be   : > { %1109 = vrot.lane.b32.xlu0 %v766_v4, %s4358_s12 }
 0x1bf   : > { %v5360_v27 = vpop.permute.xlu1 %957  ;;  %v5362_v16 = vpop.permute.xlu0 %650 }
 0x1c1   : > { %903 = vrot.lane.b32.xlu1 %v4334_v9, %s4358_s12 }
 0x1c2   : > { %1105 = vrot.lane.b32.xlu0 %v4916_v13, %s4358_s12 }
 0x1c3   : > { %v1016_v11 = vpop.permute.xlu1 %1015  ;;  %v956_v1 = vpop.permute.xlu0 %955 }
 0x1c4   : > { %1631 = vmatprep.subr.mxu1 %v1016_v11  ;;  %v1208_v29 = vsel %vm1185_vm5, %v956_v1, %v5360_v27  ;;  %v1230_v28 = vsel %vm1185_vm5, %v5141_v5, %v1016_v11  ;;  %v723_v11 = vsel %vm713_vm9, %v4970_v31, %v4990_v25 }
 0x1c5   : > { %1091 = vrot.lane.b32.xlu1 %v759_v35, %s4358_s12  ;;  %1467 = vmatprep.subr.mxu0 %v1208_v29  ;;  %v7919_v35 = vld [vmem:[#allocation28_spill] sm:$0xff] }
 0x1c6   : > { %1101 = vrot.lane.b32.xlu0 %v763_v24, %s4358_s12  ;;  %1632 = vmatpush1.msra.mxu1 %v1230_v28  ;;  %v7920_v28 = vld [vmem:[#allocation29_spill] sm:$0xff] }
 0x1c7   : > { %v5380_v13 = vpop.permute.xlu1 %830  ;;  %v954_v4 = vpop.permute.xlu0 %953  ;;  %v815_v24 = vsel %vm803_vm6, %v7908_v48, %v7920_v28  ;;  %v724_v48 = vsel %vm713_vm9, %v4990_v25, %v4981_v12  ;;  %v717_v25 = vsel %vm713_vm9, %v5012_v50, %v5033_v51 }
 0x1c8   : > { %v1207_v9 = vsel %vm1185_vm5, %v954_v4, %v956_v1  ;;  %v760_v1 = vsel %vm758_vm7, %v4968_v41, %v7919_v35 }
 0x1c9   : > { %1089 = vrot.lane.b32.xlu1 %v4948_v36, %s4358_s12  ;;  %1468 = vmatpush1.msra.mxu0 %v1207_v9 }
 0x1ca   : > { %1097 = vrot.lane.b32.xlu0 %v4946_v38, %s4358_s12 }
 0x1cb   : > { %v5387_v5 = vpop.permute.xlu1 %949  ;;  %v5389_v21 = vpop.permute.xlu0 %642 }
 0x1cd   : > { %1083 = vrot.lane.b32.xlu1 %v723_v11, %s4358_s12 }
 0x1ce   : > { %1093 = vrot.lane.b32.xlu0 %v760_v1, %s4358_s12 }
 0x1cf   : > { %v1008_v36 = vpop.permute.xlu1 %1007 }
 0x1d0   : > { %v948_v29 = vpop.permute.xlu0 %947  ;;  %1633 = vmatprep.subr.mxu1 %v1008_v36  ;;  %v1227_v38 = vsel %vm1185_vm5, %v5186_v18, %v1008_v36  ;;  %v720_v18 = vsel %vm713_vm9, %v4992_v32, %v5010_v44  ;;  %v812_v36 = vsel %vm803_vm6, %v7909_v0, %v5000_v46 }
 0x1d1   : > { %1081 = vrot.lane.b32.xlu1 %v4970_v31, %s4358_s12  ;;  %v1205_v4 = vsel %vm1185_vm5, %v948_v29, %v5387_v5  ;;  %1634 = vmatpush1.msra.mxu1 %v1227_v38 }
 0x1d2   : > { %1151 = vrot.lane.b32.xlu0 %v815_v24, %s4358_s12  ;;  %1469 = vmatprep.subr.mxu0 %v1205_v4 }
 0x1d3   : > { %v940_v41 = vpop.permute.xlu1 %939 }
 0x1d4   : > { %v946_v9 = vpop.permute.xlu0 %945 }
 0x1d5   : > { %1075 = vrot.lane.b32.xlu1 %v720_v18, %s4358_s12  ;;  %v1204_v31 = vsel %vm1185_vm5, %v946_v9, %v948_v29  ;;  %v7921_v29 = vld [vmem:[#allocation30_spill] sm:$0xff]  ;;  %v809_v9 = vsel %vm803_vm6, %v7911_v3, %v5022_v42  ;;  %v718_v42 = vsel %vm713_vm9, %v5033_v51, %v5024_v49 }
 0x1d6   : > { %1085 = vrot.lane.b32.xlu0 %v724_v48, %s4358_s12  ;;  %1470 = vmatpush1.msra.mxu0 %v1204_v31  ;;  %v721_v24 = vsel %vm713_vm9, %v5010_v44, %v7921_v29 }
 0x1d7   : > { %v938_v11 = vpop.permute.xlu1 %937 }
 0x1d8   : > { %v5418_v1 = vpop.permute.xlu0 %822 }
 0x1d9   : > { %1073 = vrot.lane.b32.xlu1 %v4992_v32, %s4358_s12  ;;  %v1201_v32 = vsel %vm1185_vm5, %v938_v11, %v940_v41  ;;  %v806_v11 = vsel %vm803_vm6, %v7915_v10, %v5042_v55  ;;  %v7923_v55 = vld [vmem:[#allocation31_spill] sm:$0xff] }
 0x1da   : > { %1143 = vrot.lane.b32.xlu0 %v812_v36, %s4358_s12 }
 0x1db   : > { %v932_v38 = vpop.permute.xlu1 %931 }
 0x1dc   : > { %v5426_v28 = vpop.permute.xlu0 %941 }
 0x1dd   : > { %1067 = vrot.lane.b32.xlu1 %v717_v25, %s4358_s12  ;;  %v1202_v46 = vsel %vm1185_vm5, %v940_v41, %v5426_v28  ;;  %v714_v41 = vsel %vm713_vm9, %v5035_v37, %v5052_v45 }
 0x1de   : > { %1077 = vrot.lane.b32.xlu0 %v721_v24, %s4358_s12  ;;  %1471 = vmatprep.subr.mxu0 %v1202_v46  ;;  %v7922_v24 = vld [vmem:[#allocation32_spill] sm:$0xff] }
 0x1df   : > { %1472 = vmatpush1.msra.mxu0 %v1201_v32  ;;  %v930_v0 = vpop.permute.xlu1 %929  ;;  %v678_v46 = vsel %vm668_vm10, %v7922_v24, %v5074_v22 }
 0x1e0   : > { %v1000_v4 = vpop.permute.xlu0 %999 }
 0x1e1   : > { %1635 = vmatprep.subr.mxu1 %v1000_v4  ;;  %1065 = vrot.lane.b32.xlu1 %v5012_v50, %s4358_s12  ;;  %v1224_v44 = vsel %vm1185_vm5, %v5201_v39, %v1000_v4  ;;  %v1198_v39 = vsel %vm1185_vm5, %v930_v0, %v932_v38  ;;  %v770_v4 = vsel %vm758_vm7, %v4924_v34, %v5065_v53 }
 0x1e2   : > { %1135 = vrot.lane.b32.xlu0 %v809_v9, %s4358_s12  ;;  %1636 = vmatpush1.msra.mxu1 %v1224_v44  ;;  %v675_v34 = vsel %vm668_vm10, %v5076_v58, %v5097_v47  ;;  %v679_v53 = vsel %vm668_vm10, %v5074_v22, %v5067_v56 }
 0x1e3   : > { %v924_v18 = vpop.permute.xlu1 %923 }
 0x1e4   : > { %v5447_v48 = vpop.permute.xlu0 %933 }
 0x1e5   : > { %1059 = vrot.lane.b32.xlu1 %v714_v41, %s4358_s12  ;;  %v1199_v50 = vsel %vm1185_vm5, %v932_v38, %v5447_v48 }
 0x1e6   : > { %1069 = vrot.lane.b32.xlu0 %v718_v42, %s4358_s12  ;;  %1473 = vmatprep.subr.mxu0 %v1199_v50 }
 0x1e7   : > { %1474 = vmatpush1.msra.mxu0 %v1198_v39  ;;  %v4267_v3 = vpop.permute.xlu1 %4266 }
 0x1e8   : > { %v992_v31 = vpop.permute.xlu0 %991  ;;  %v4268_v36 = vunpack.i.l.bf16 %v4267_v3  ;;  %v4269_v9 = vunpack.i.h.bf16 %v4267_v3  ;;  %v767_v3 = vsel %vm758_vm7, %v7918_v61, %v5084_v57  ;;  %v7925_v57 = vld [vmem:[#allocation33_spill] sm:$0xff] }
 0x1e9   : > { %1637 = vmatprep.subr.mxu1 %v992_v31  ;;  %1057 = vrot.lane.b32.xlu1 %v5035_v37, %s4358_s12  ;;  %v1221_v51 = vsel %vm1185_vm5, %v5220_v17, %v992_v31  ;;  %v715_v37 = vsel %vm713_vm9, %v5052_v45, %v7923_v55 }
 0x1ea   : > { %1127 = vrot.lane.b32.xlu0 %v806_v11, %s4358_s12  ;;  %1638 = vmatpush1.msra.mxu1 %v1221_v51  ;;  %v1195_v10 = vsel %vm1185_vm5, %v4268_v36, %v924_v18  ;;  %v7924_v51 = vld [vmem:[#allocation35_spill] sm:$0xff] }
 0x1eb   : > { %v916_v38 = vpop.permute.xlu1 %915 }
 0x1ec   : > { %v5468_v25 = vpop.permute.xlu0 %925 }
 0x1ed   : > { %1051 = vrot.lane.b32.xlu1 %v678_v46, %s4358_s12  ;;  %v1196_v17 = vsel %vm1185_vm5, %v924_v18, %v5468_v25 }
 0x1ee   : > { %1061 = vrot.lane.b32.xlu0 %v715_v37, %s4358_s12  ;;  %1475 = vmatprep.subr.mxu0 %v1196_v17  ;;  %v7926_v37 = vld [vmem:[#allocation34_spill] sm:$0xff] }
 0x1ef   : > { %1476 = vmatpush1.msra.mxu0 %v1195_v10  ;;  %v976_v32 = vpop.permute.xlu1 %975  ;;  %v764_v17 = vsel %vm758_vm7, %v4957_v40, %v7926_v37  ;;  %v669_v40 = vsel %vm668_vm10, %v5162_v20, %v5149_v6 }
 0x1f0   : > { %v984_v0 = vpop.permute.xlu0 %983  ;;  %v1215_v18 = vsel %vm1185_vm5, %v5282_v8, %v976_v32  ;;  %v1192_v8 = vsel %vm1185_vm5, %v4269_v9, %v916_v38 }
 0x1f1   : > { %1639 = vmatprep.subr.mxu1 %v984_v0  ;;  %1049 = vrot.lane.b32.xlu1 %v7922_v24, %s4358_s12  ;;  %v1218_v45 = vsel %vm1185_vm5, %v5259_v60, %v984_v0 }
 0x1f2   : > { %1119 = vrot.lane.b32.xlu0 %v770_v4, %s4358_s12  ;;  %1640 = vmatpush1.msra.mxu1 %v1218_v45  ;;  %v7927_v45 = vld [vmem:[#allocation36_spill] sm:$0xff] }
 0x1f3   : > { %1641 = vmatprep.subr.mxu1 %v976_v32  ;;  %v5489_v44 = vpop.permute.xlu1 %909  ;;  %v862_v32 = vld [vmem:[%s7754_s1 + $0x8] sm:$0xff]  ;;  %v673_v9 = vsel %vm668_vm10, %v5129_v62, %v7927_v45 }
 0x1f4   : > { %1642 = vmatpush1.msra.mxu1 %v1215_v18  ;;  %v5493_v41 = vpop.permute.xlu0 %917  ;;  %1515 = vmatprep.mubr.f32.mxu0 %v862_v32 }
 0x1f5   : > { %1043 = vrot.lane.b32.xlu1 %v675_v34, %s4358_s12  ;;  %v1193_v60 = vsel %vm1185_vm5, %v916_v38, %v5493_v41 }
 0x1f6   : > { %1053 = vrot.lane.b32.xlu0 %v679_v53, %s4358_s12  ;;  %1477 = vmatprep.subr.mxu0 %v1193_v60 }
 0x1f7   : > { %1478 = vmatpush1.msra.mxu0 %v1192_v8  ;;  %v968_v42 = vpop.permute.xlu1 %967  ;;  %v7928_v8 = vld [vmem:[#allocation17_spill] sm:$0xff] }
 0x1f8   : > { %v908_v50 = vpop.permute.xlu0 %907  ;;  %1643 = vmatprep.subr.mxu1 %v968_v42  ;;  %v1212_v39 = vsel %vm1185_vm5, %v5329_v30, %v968_v42  ;;  %v672_v30 = vsel %vm668_vm10, %v7924_v51, %v5129_v62  ;;  %v761_v42 = vsel %vm758_vm7, %v7919_v35, %v7928_v8  ;;  %v873_v8 = vld [vmem:[%s7755_s2] sm:$0xff] }
 0x1f9   : > { %1041 = vrot.lane.b32.xlu1 %v5076_v58, %s4358_s12  ;;  %v1190_v22 = vsel %vm1185_vm5, %v908_v50, %v5489_v44  ;;  %1644 = vmatpush1.msra.mxu1 %v1212_v39  ;;  %v676_v58 = vsel %vm668_vm10, %v5097_v47, %v7925_v57  ;;  %v670_v39 = vsel %vm668_vm10, %v5149_v6, %v5172_v19 }
 0x1fa   : > { %1111 = vrot.lane.b32.xlu0 %v767_v3, %s4358_s12  ;;  %1479 = vmatprep.subr.mxu0 %v1190_v22  ;;  %v725_v6 = vsel %vm713_vm9, %v4981_v12, %v5180_v2  ;;  %v677_v12 = vsel %vm668_vm10, %v7925_v57, %v5331_v43 }
 0x1fb   : > { %v5516_v31 = vpop.permute.xlu1 %901 }
 0x1fc   : > { %v4272_v11 = vpop.permute.xlu0 %4271 }
 0x1fd   : > { %v4273_v36 = vunpack.i.l.bf16 %v4272_v11  ;;  %1035 = vrot.lane.b32.xlu1 %v672_v30, %s4358_s12  ;;  %v4274_v61 = vunpack.i.h.bf16 %v4272_v11  ;;  %v719_v30 = vsel %vm713_vm9, %v5024_v49, %v5212_v52  ;;  %v680_v49 = vsel %vm668_vm10, %v5067_v56, %v5272_v23  ;;  %v7929_v56 = vld [vmem:[#allocation12_spill] sm:$0xff] }
 0x1fe   : > { %1045 = vrot.lane.b32.xlu0 %v676_v58, %s4358_s12  ;;  %v860_v23 = vsel %vm848_vm2, %v7929_v56, %v5317_v59 }
 0x1ff   : > { %v1148_v38 = vpop.permute.xlu1 %1147  ;;  %v1189_v24 = vsel %vm1185_vm5, %v4273_v36, %v908_v50  ;;  %v722_v50 = vsel %vm713_vm9, %v7921_v29, %v5195_v7  ;;  %v716_v29 = vsel %vm713_vm9, %v7923_v55, %v5253_v63  ;;  %v5603_v55 = vld [vmem:[%s7754_s1 + $0x58] sm:$0xff] }
 0x200   : > { %v900_v46 = vpop.permute.xlu0 %899  ;;  %1480 = vmatpush1.msra.mxu0 %v1189_v24 }
 0x201   : > { %1033 = vrot.lane.b32.xlu1 %v7924_v51, %s4358_s12  ;;  %v1187_v10 = vsel %vm1185_vm5, %v900_v46, %v5516_v31  ;;  %v1186_v47 = vsel %vm1185_vm5, %v4274_v61, %v900_v46  ;;  %v671_v61 = vsel %vm668_vm10, %v5172_v19, %v5389_v21  ;;  %v7930_v19 = vld [vmem:[#allocation15_spill] sm:$0xff] }
 0x202   : > { %1103 = vrot.lane.b32.xlu0 %v764_v17, %s4358_s12  ;;  %1481 = vmatprep.subr.mxu0 %v1187_v10  ;;  %v851_v21 = vsel %vm848_vm2, %v7930_v19, %v5418_v1 }
 0x203   : > { %1482 = vmatpush1.msra.mxu0 %v1186_v47  ;;  %v952_v0 = vpop.permute.xlu1 %951 }
 0x204   : > { %v960_v4 = vpop.permute.xlu0 %959  ;;  %v1206_v53 = vsel %vm1185_vm5, %v5387_v5, %v952_v0  ;;  %v5564_v5 = vld [vmem:[%s7754_s1 + $0x28] sm:$0xff] }
 0x205   : > { %1645 = vmatprep.subr.mxu1 %v960_v4  ;;  %1027 = vrot.lane.b32.xlu1 %v669_v40, %s4358_s12  ;;  %v1209_v18 = vsel %vm1185_vm5, %v5360_v27, %v960_v4 }
 0x206   : > { %1037 = vrot.lane.b32.xlu0 %v673_v9, %s4358_s12  ;;  %1646 = vmatpush1.msra.mxu1 %v1209_v18  ;;  %v4359_v9 = vmov 0  }
 0x207   : > { %1647 = vmatprep.subr.mxu1 %v952_v0  ;;  %v1140_v34 = vpop.permute.xlu1 %1139  ;;  %4087 = vmatmul.mubr.msk.f32.gmra.mxu1 %vm1438_vm8, %v5564_v5 }
 0x208   : > { %1648 = vmatpush1.msra.mxu1 %v1206_v53  ;;  %v5551_v60 = vpop.permute.xlu0 %1149  ;;  %1616 = vmatprep.mubr.f32.mxu1 %v5322_v26 }
 0x209   : > { %1025 = vrot.lane.b32.xlu1 %v5162_v20, %s4358_s12  ;;  %v1280_v62 = vsel %vm1185_vm5, %v1148_v38, %v5551_v60  ;;  %4275 = vset.pattern.permute.xlu0 %v4359_v9 }
 0x20a   : > { %1095 = vrot.lane.b32.xlu0 %v761_v42, %s4358_s12  ;;  %1483 = vmatprep.subr.mxu0 %v1280_v62  ;;  %v874_v62 = vld [vmem:[%s7755_s2 + $0x8] sm:$0xff] }
 0x20b   : > { %v944_v27 = vpop.permute.xlu1 %943  ;;  %4276 = vset.pattern.permute.xlu1 %v4359_v9 }
 0x20c   : > { %v1146_v35 = vpop.permute.xlu0 %1145  ;;  %1649 = vmatprep.subr.mxu1 %v944_v27  ;;  %v1203_v20 = vsel %vm1185_vm5, %v5426_v28, %v944_v27  ;;  %v5583_v28 = vld [vmem:[%s7754_s1 + $0x40] sm:$0xff] }
 0x20d   : > { %1079 = vrot.lane.b32.xlu1 %v722_v50, %s4358_s12  ;;  %v1279_v3 = vsel %vm1185_vm5, %v1146_v35, %v1148_v38  ;;  %1650 = vmatpush1.msra.mxu1 %v1203_v20 }
 0x20e   : > { %1029 = vrot.lane.b32.xlu0 %v670_v39, %s4358_s12  ;;  %1484 = vmatpush2.msra.mxu0 %v1279_v3 }
 0x20f   : > { %v1132_v7 = vpop.permute.xlu1 %1131  ;;  %4088 = vmatmul.mubr.msk.f32.gmra.mxu1 %vm1438_vm8, %v5583_v28 }
 0x210   : > { %v5588_v22 = vpop.permute.xlu0 %1141  ;;  %1622 = vmatprep.mubr.f32.mxu1 %v5322_v26 }
 0x211   : > { %1063 = vrot.lane.b32.xlu1 %v716_v29, %s4358_s12  ;;  %v1277_v11 = vsel %vm1185_vm5, %v1140_v34, %v5588_v22 }
 0x212   : > { %1087 = vrot.lane.b32.xlu0 %v725_v6, %s4358_s12  ;;  %1485 = vmatprep.subr.mxu0 %v1277_v11 }
 0x213   : > { %v936_v63 = vpop.permute.xlu1 %935  ;;  %4089 = vmatmul.mubr.msk.f32.gmra.mxu1 %vm1438_vm8, %v5603_v55 }
 0x214   : > { %v1138_v2 = vpop.permute.xlu0 %1137  ;;  %1651 = vmatprep.subr.mxu1 %v936_v63  ;;  %v1200_v51 = vsel %vm1185_vm5, %v5447_v48, %v936_v63  ;;  %1693 = vmatprep.mubr.f32.mxu1 %v862_v32  ;;  %v674_v48 = vsel %vm668_vm10, %v7927_v45, %v5362_v16  ;;  %v7932_v32 = vld [vmem:[#allocation14_spill] sm:$0xff] }
 0x215   : > { %1047 = vrot.lane.b32.xlu1 %v677_v12, %s4358_s12  ;;  %v1276_v36 = vsel %vm1185_vm5, %v1138_v2, %v1140_v34  ;;  %1652 = vmatpush1.msra.mxu1 %v1200_v51  ;;  %v854_v0 = vsel %vm848_vm2, %v7932_v32, %v5380_v13  ;;  %v875_v13 = vld [vmem:[%s7755_s2 + $0x10] sm:$0xff] }
 0x216   : > { %1071 = vrot.lane.b32.xlu0 %v719_v30, %s4358_s12  ;;  %1486 = vmatpush2.msra.mxu0 %v1276_v36 }
 0x217   : > { %v1124_v43 = vpop.permute.xlu1 %1123 }
 0x218   : > { %v5621_v57 = vpop.permute.xlu0 %1133 }
 0x219   : > { %1039 = vrot.lane.b32.xlu1 %v674_v48, %s4358_s12  ;;  %v1274_v52 = vsel %vm1185_vm5, %v1132_v7, %v5621_v57 }
 0x21a   : > { %1055 = vrot.lane.b32.xlu0 %v680_v49, %s4358_s12  ;;  %1487 = vmatprep.subr.mxu0 %v1274_v52 }
 0x21b   : > { %v928_v58 = vpop.permute.xlu1 %927 }
 0x21c   : > { %v1130_v16 = vpop.permute.xlu0 %1129  ;;  %1653 = vmatprep.subr.mxu1 %v928_v58  ;;  %v1197_v38 = vsel %vm1185_vm5, %v5468_v25, %v928_v58  ;;  %v7931_v25 = vld [vmem:[#allocation13_spill] sm:$0xff] }
 0x21d   : > { %1031 = vrot.lane.b32.xlu1 %v671_v61, %s4358_s12  ;;  %v1273_v24 = vsel %vm1185_vm5, %v1130_v16, %v1132_v7  ;;  %1654 = vmatpush1.msra.mxu1 %v1197_v38  ;;  %v857_v17 = vsel %vm848_vm2, %v7931_v25, %v5349_v15 }
 0x21e   : > { %1183 = vrot.lane.b32.xlu0 %v860_v23, %s4358_s12  ;;  %1488 = vmatpush2.msra.mxu0 %v1273_v24 }
 0x21f   : > { %v1116_v46 = vpop.permute.xlu1 %1115 }
 0x220   : > { %v5644_v37 = vpop.permute.xlu0 %1125 }
 0x221   : > { %1159 = vrot.lane.b32.xlu1 %v851_v21, %s4358_s12  ;;  %v1271_v59 = vsel %vm1185_vm5, %v1124_v43, %v5644_v37 }
 0x222   : > { %1175 = vrot.lane.b32.xlu0 %v857_v17, %s4358_s12  ;;  %1489 = vmatprep.subr.mxu0 %v1271_v59 }
 0x223   : > { %v920_v10 = vpop.permute.xlu1 %919 }
 0x224   : > { %v1122_v47 = vpop.permute.xlu0 %1121  ;;  %1655 = vmatprep.subr.mxu1 %v920_v10  ;;  %v1194_v1 = vsel %vm1185_vm5, %v5493_v41, %v920_v10  ;;  %v876_v41 = vld [vmem:[%s7755_s2 + $0x18] sm:$0xff] }
 0x225   : > { %v1270_v15 = vsel %vm1185_vm5, %v1122_v47, %v1124_v43  ;;  %1656 = vmatpush1.msra.mxu1 %v1194_v1  ;;  %889 = vperm.xlu1 %4276, %v875_v13  }
 0x226   : > { %1167 = vrot.lane.b32.xlu0 %v854_v0, %s4358_s12  ;;  %1490 = vmatpush2.msra.mxu0 %v1270_v15  ;;  %s4362_s12 = smov 44  }
 0x227   : > { %v1108_v4 = vpop.permute.xlu1 %1107 }
 0x228   : > { %v5660_v40 = vpop.permute.xlu0 %1117 }
 0x229   : > { %v1268_v45 = vsel %vm1185_vm5, %v1116_v46, %v5660_v40  ;;  %884 = vperm.xlu1 %4276, %v874_v62  }
 0x22a   : > { %1491 = vmatprep.subr.mxu0 %v1268_v45  ;;  %894 = vperm.xlu0 %4275, %v876_v41  }
 0x22b   : > { %v912_v18 = vpop.permute.xlu1 %911 }
 0x22c   : > { %v1114_v34 = vpop.permute.xlu0 %1113  ;;  %1657 = vmatprep.subr.mxu1 %v912_v18  ;;  %v1191_v53 = vsel %vm1185_vm5, %v5489_v44, %v912_v18 }
 0x22d   : > { %v1267_v42 = vsel %vm1185_vm5, %v1114_v34, %v1116_v46  ;;  %1658 = vmatpush1.msra.mxu1 %v1191_v53 }
 0x22e   : > { %1492 = vmatpush2.msra.mxu0 %v1267_v42  ;;  %879 = vperm.xlu0 %4275, %v873_v8  }
 0x22f   : > { %v1100_v27 = vpop.permute.xlu1 %1099 }
 0x230   : > { %v5679_v50 = vpop.permute.xlu0 %1109 }
 0x231   : > { %v1265_v44 = vsel %vm1185_vm5, %v1108_v4, %v5679_v50 }
 0x232   : > { %1493 = vmatprep.subr.mxu0 %v1265_v44 }
 0x233   : > { %v904_v35 = vpop.permute.xlu1 %903 }
 0x234   : > { %v1106_v20 = vpop.permute.xlu0 %1105  ;;  %1659 = vmatprep.subr.mxu1 %v904_v35  ;;  %v1188_v39 = vsel %vm1185_vm5, %v5516_v31, %v904_v35 }
 0x235   : > { %v1264_v3 = vsel %vm1185_vm5, %v1106_v20, %v1108_v4  ;;  %1660 = vmatpush1.msra.mxu1 %v1188_v39 }
 0x236   : > { %1494 = vmatpush2.msra.mxu0 %v1264_v3 }
 0x237   : > { %v1092_v7 = vpop.permute.xlu1 %1091 }
 0x238   : > { %v5686_v29 = vpop.permute.xlu0 %1101 }
 0x239   : > { %v1262_v6 = vsel %vm1185_vm5, %v1100_v27, %v5686_v29 }
 0x23a   : > { %1495 = vmatprep.subr.mxu0 %v1262_v6 }
 0x23b   : > { %v1090_v11 = vpop.permute.xlu1 %1089 }
 0x23c   : > { %v1098_v63 = vpop.permute.xlu0 %1097  ;;  %v1258_v30 = vsel %vm1185_vm5, %v1090_v11, %v1092_v7 }
 0x23d   : > { %v1261_v12 = vsel %vm1185_vm5, %v1098_v63, %v1100_v27 }
 0x23e   : > { %1496 = vmatpush2.msra.mxu0 %v1261_v12 }
 0x23f   : > { %v1084_v2 = vpop.permute.xlu1 %1083 }
 0x240   : > { %v5691_v51 = vpop.permute.xlu0 %1093 }
 0x241   : > { %v1259_v31 = vsel %vm1185_vm5, %v1092_v7, %v5691_v51 }
 0x242   : > { %1497 = vmatprep.subr.mxu0 %v1259_v31 }
 0x243   : > { %1498 = vmatpush2.msra.mxu0 %v1258_v30  ;;  %v1082_v36 = vpop.permute.xlu1 %1081  ;;  %v861_v30 = vld [vmem:[%s7754_s1] sm:$0xff] }
 0x244   : > { %v1152_v43 = vpop.permute.xlu0 %1151  ;;  %v1255_v61 = vsel %vm1185_vm5, %v1082_v36, %v1084_v2 }
 0x245   : > { %1661 = vmatprep.subr.mxu1 %v1152_v43  ;;  %v1281_v48 = vsel %vm1185_vm5, %v5551_v60, %v1152_v43  ;;  %v865_v43 = vld [vmem:[%s7754_s1 + $0x20] sm:$0xff] }
 0x246   : > { %1662 = vmatpush2.msra.mxu1 %v1281_v48 }
 0x247   : > { %v1076_v49 = vpop.permute.xlu1 %1075 }
 0x248   : > { %v5698_v52 = vpop.permute.xlu0 %1085 }
 0x249   : > { %v1256_v58 = vsel %vm1185_vm5, %v1084_v2, %v5698_v52 }
 0x24a   : > { %1499 = vmatprep.subr.mxu0 %v1256_v58  ;;  %v864_v58 = vld [vmem:[%s7754_s1 + $0x18] sm:$0xff] }
 0x24b   : > { %1500 = vmatpush2.msra.mxu0 %v1255_v61  ;;  %v1074_v16 = vpop.permute.xlu1 %1073  ;;  %v868_v61 = vld [vmem:[%s7754_s1 + $0x38] sm:$0xff] }
 0x24c   : > { %v1144_v38 = vpop.permute.xlu0 %1143  ;;  %v1252_v46 = vsel %vm1185_vm5, %v1074_v16, %v1076_v49 }
 0x24d   : > { %1663 = vmatprep.subr.mxu1 %v1144_v38  ;;  %v1278_v56 = vsel %vm1185_vm5, %v5588_v22, %v1144_v38 }
 0x24e   : > { %1664 = vmatpush2.msra.mxu1 %v1278_v56 }
 0x24f   : > { %v1068_v23 = vpop.permute.xlu1 %1067 }
 0x250   : > { %v5705_v60 = vpop.permute.xlu0 %1077 }
 0x251   : > { %v1253_v24 = vsel %vm1185_vm5, %v1076_v49, %v5705_v60 }
 0x252   : > { %1501 = vmatprep.subr.mxu0 %v1253_v24  ;;  %v871_v24 = vld [vmem:[%s7754_s1 + $0x50] sm:$0xff] }
 0x253   : > { %1502 = vmatpush2.msra.mxu0 %v1252_v46  ;;  %v1066_v19 = vpop.permute.xlu1 %1065 }
 0x254   : > { %v1136_v21 = vpop.permute.xlu0 %1135  ;;  %v1249_v10 = vsel %vm1185_vm5, %v1066_v19, %v1068_v23 }
 0x255   : > { %1665 = vmatprep.subr.mxu1 %v1136_v21  ;;  %v1275_v25 = vsel %vm1185_vm5, %v5621_v57, %v1136_v21 }
 0x256   : > { %1666 = vmatpush2.msra.mxu1 %v1275_v25  ;;  %v870_v25 = vld [vmem:[%s7754_s1 + $0x48] sm:$0xff] }
 0x257   : > { %v1060_v17 = vpop.permute.xlu1 %1059 }
 0x258   : > { %v5712_v22 = vpop.permute.xlu0 %1069 }
 0x259   : > { %v1250_v59 = vsel %vm1185_vm5, %v1068_v23, %v5712_v22  ;;  %v867_v23 = vld [vmem:[%s7754_s1 + $0x30] sm:$0xff] }
 0x25a   : > { %1503 = vmatprep.subr.mxu0 %v1250_v59 }
 0x25b   : > { %1504 = vmatpush2.msra.mxu0 %v1249_v10  ;;  %v1058_v47 = vpop.permute.xlu1 %1057 }
 0x25c   : > { %v1128_v1 = vpop.permute.xlu0 %1127  ;;  %v1246_v4 = vsel %vm1185_vm5, %v1058_v47, %v1060_v17 }
 0x25d   : > { %1667 = vmatprep.subr.mxu1 %v1128_v1  ;;  %v1272_v32 = vsel %vm1185_vm5, %v5644_v37, %v1128_v1 }
 0x25e   : > { %1668 = vmatpush2.msra.mxu1 %v1272_v32 }
 0x25f   : > { %v1052_v0 = vpop.permute.xlu1 %1051 }
 0x260   : > { %v5719_v57 = vpop.permute.xlu0 %1061 }
 0x261   : > { %v1247_v15 = vsel %vm1185_vm5, %v1060_v17, %v5719_v57 }
 0x262   : > { %1505 = vmatprep.subr.mxu0 %v1247_v15 }
 0x263   : > { %1506 = vmatpush2.msra.mxu0 %v1246_v4  ;;  %v1050_v45 = vpop.permute.xlu1 %1049  ;;  %v7933_v4 = vld [vmem:[#allocation16_spill] sm:$0xff] }
 0x264   : > { %v1120_v41 = vpop.permute.xlu0 %1119  ;;  %v1243_v34 = vsel %vm1185_vm5, %v1050_v45, %v1052_v0 }
 0x265   : > { %1669 = vmatprep.subr.mxu1 %v1120_v41  ;;  %v1269_v13 = vsel %vm1185_vm5, %v5660_v40, %v1120_v41  ;;  %v7934_v41 = vld [vmem:[#allocation18_spill] sm:$0xff] }
 0x266   : > { %1670 = vmatpush2.msra.mxu1 %v1269_v13 }
 0x267   : > { %v1044_v9 = vpop.permute.xlu1 %1043 }
 0x268   : > { %v5726_v37 = vpop.permute.xlu0 %1053 }
 0x269   : > { %v1244_v18 = vsel %vm1185_vm5, %v1052_v0, %v5726_v37 }
 0x26a   : > { %1507 = vmatprep.subr.mxu0 %v1244_v18 }
 0x26b   : > { %1508 = vmatpush2.msra.mxu0 %v1243_v34  ;;  %v1042_v53 = vpop.permute.xlu1 %1041 }
 0x26c   : > { %v1112_v8 = vpop.permute.xlu0 %1111  ;;  %v1240_v44 = vsel %vm1185_vm5, %v1042_v53, %v1044_v9 }
 0x26d   : > { %1671 = vmatprep.subr.mxu1 %v1112_v8  ;;  %v1266_v42 = vsel %vm1185_vm5, %v5679_v50, %v1112_v8 }
 0x26e   : > { %1672 = vmatpush2.msra.mxu1 %v1266_v42 }
 0x26f   : > { %v1036_v62 = vpop.permute.xlu1 %1035 }
 0x270   : > { %v5733_v40 = vpop.permute.xlu0 %1045 }
 0x271   : > { %v1241_v27 = vsel %vm1185_vm5, %v1044_v9, %v5733_v40 }
 0x272   : > { %1509 = vmatprep.subr.mxu0 %v1241_v27 }
 0x273   : > { %1510 = vmatpush2.msra.mxu0 %v1240_v44  ;;  %v1034_v35 = vpop.permute.xlu1 %1033 }
 0x274   : > { %v1104_v20 = vpop.permute.xlu0 %1103  ;;  %v1237_v6 = vsel %vm1185_vm5, %v1034_v35, %v1036_v62 }
 0x275   : > { %1673 = vmatprep.subr.mxu1 %v1104_v20  ;;  %v1263_v39 = vsel %vm1185_vm5, %v5686_v29, %v1104_v20 }
 0x276   : > { %1674 = vmatpush2.msra.mxu1 %v1263_v39 }
 0x277   : > { %v1028_v3 = vpop.permute.xlu1 %1027 }
 0x278   : > { %v1038_v50 = vpop.permute.xlu0 %1037 }
 0x279   : > { %v1238_v7 = vsel %vm1185_vm5, %v1036_v62, %v1038_v50 }
 0x27a   : > { %1511 = vmatprep.subr.mxu0 %v1238_v7 }
 0x27b   : > { %1512 = vmatpush2.msra.mxu0 %v1237_v6  ;;  %v1026_v11 = vpop.permute.xlu1 %1025 }
 0x27c   : > { %v1096_v63 = vpop.permute.xlu0 %1095  ;;  %v1234_v36 = vsel %vm1185_vm5, %v1026_v11, %v1028_v3 }
 0x27d   : > { %1675 = vmatprep.subr.mxu1 %v1096_v63  ;;  %v1260_v12 = vsel %vm1185_vm5, %v5691_v51, %v1096_v63 }
 0x27e   : > { %1676 = vmatpush2.msra.mxu1 %v1260_v12 }
 0x27f   : > { %v1080_v2 = vpop.permute.xlu1 %1079 }
 0x280   : > { %v1030_v31 = vpop.permute.xlu0 %1029  ;;  %v1254_v38 = vsel %vm1185_vm5, %v5705_v60, %v1080_v2 }
 0x281   : > { %v1235_v29 = vsel %vm1185_vm5, %v1028_v3, %v1030_v31 }
 0x282   : > { %1513 = vmatprep.subr.mxu0 %v1235_v29 }
 0x283   : > { %1514 = vmatpush2.msra.mxu0 %v1234_v36  ;;  %v1064_v48 = vpop.permute.xlu1 %1063 }
 0x284   : > { %v1088_v49 = vpop.permute.xlu0 %1087  ;;  %1516 = vmatmul.mubr.f32.vlgmr.msra.gmra.mxu0 %v861_v30  ;;  %v1248_v60 = vsel %vm1185_vm5, %v5719_v57, %v1064_v48 }
 0x285   : > { %1677 = vmatprep.subr.mxu1 %v1088_v49  ;;  %v1257_v51 = vsel %vm1185_vm5, %v5698_v52, %v1088_v49  ;;  %1521 = vmatprep.mubr.f32.mxu0 %v865_v43 }
 0x286   : > { %1678 = vmatpush2.msra.mxu1 %v1257_v51 }
 0x287   : > { %1679 = vmatprep.subr.mxu1 %v1080_v2  ;;  %v1048_v16 = vpop.permute.xlu1 %1047 }
 0x288   : > { %1680 = vmatpush2.msra.mxu1 %v1254_v38  ;;  %v1072_v56 = vpop.permute.xlu0 %1071  ;;  %1522 = vmatmul.mubr.f32.gmra.mxu0 %v864_v58  ;;  %v1242_v17 = vsel %vm1185_vm5, %v5733_v40, %v1048_v16 }
 0x289   : > { %1681 = vmatprep.subr.mxu1 %v1072_v56  ;;  %v1251_v52 = vsel %vm1185_vm5, %v5712_v22, %v1072_v56  ;;  %1527 = vmatprep.mubr.f32.mxu0 %v868_v61 }
 0x28a   : > { %1682 = vmatpush2.msra.mxu1 %v1251_v52 }
 0x28b   : > { %1683 = vmatprep.subr.mxu1 %v1064_v48  ;;  %v1040_v46 = vpop.permute.xlu1 %1039 }
 0x28c   : > { %1684 = vmatpush2.msra.mxu1 %v1248_v60  ;;  %v1056_v19 = vpop.permute.xlu0 %1055  ;;  %1528 = vmatmul.mubr.f32.gmra.mxu0 %v867_v23  ;;  %v1239_v10 = vsel %vm1185_vm5, %v1038_v50, %v1040_v46 }
 0x28d   : > { %1685 = vmatprep.subr.mxu1 %v1056_v19  ;;  %v1245_v21 = vsel %vm1185_vm5, %v5726_v37, %v1056_v19  ;;  %1533 = vmatprep.mubr.f32.mxu0 %v871_v24 }
 0x28e   : > { %1686 = vmatpush2.msra.mxu1 %v1245_v21 }
 0x28f   : > { %1687 = vmatprep.subr.mxu1 %v1048_v16  ;;  %v1032_v22 = vpop.permute.xlu1 %1031 }
 0x290   : > { %1688 = vmatpush2.msra.mxu1 %v1242_v17  ;;  %v1184_v59 = vpop.permute.xlu0 %1183  ;;  %1534 = vmatmul.mubr.f32.gmra.mxu0 %v870_v25  ;;  %v1236_v1 = vsel %vm1185_vm5, %v1030_v31, %v1032_v22 }
 0x291   : > { %1689 = vmatprep.subr.mxu1 %v1040_v46  ;;  %1742 = vmatprep.subr.mxu0 %v1184_v59  ;;  %v1293_v47 = vsel %vm1185_vm5, %v5210_v54, %v1184_v59 }
 0x292   : > { %1690 = vmatpush2.msra.mxu1 %v1239_v10  ;;  %1743 = vmatpush1.msra.mxu0 %v1293_v47 }
 0x293   : > { %1691 = vmatprep.subr.mxu1 %v1032_v22  ;;  %1782 = vmatprep.mubr.f32.mxu0 %v5322_v26  ;;  %v1160_v57 = vpop.permute.xlu1 %1159 }
 0x294   : > { %1692 = vmatpush2.msra.mxu1 %v1236_v1  ;;  %v1176_v32 = vpop.permute.xlu0 %1175  ;;  %v1284_v45 = vsel %vm1185_vm5, %v7933_v4, %v1160_v57 }
 0x295   : > { %1744 = vmatprep.subr.mxu0 %v1176_v32  ;;  %v1290_v0 = vsel %vm1185_vm5, %v5227_v33, %v1176_v32  ;;  %1694 = vmatmul.mubr.f32.vlgmr.msra.gmra.mxu1 %v861_v30  ;;  %v1606_v33 = vpop.f32.mrf.mxu1  ;;  %v387_v30 = vld [vmem:[%s7762_s9] sm:$0xf] }
 0x296   : > { %1745 = vmatpush1.msra.mxu0 %v1290_v0  ;;  %1699 = vmatprep.mubr.f32.mxu1 %v865_v43 }
 0x298   : > { %v1168_v15 = vpop.permute.xlu0 %1167 }
 0x299   : > { %1746 = vmatprep.subr.mxu0 %v1168_v15  ;;  %v1287_v54 = vsel %vm1185_vm5, %v5274_v14, %v1168_v15  ;;  %1700 = vmatmul.mubr.f32.gmra.mxu1 %v864_v58  ;;  %v1608_v14 = vpop.f32.mrf.mxu1 }
 0x29a   : > { %1747 = vmatpush1.msra.mxu0 %v1287_v54  ;;  %1705 = vmatprep.mubr.f32.mxu1 %v868_v61 }
 0x29b   : > { %1748 = vmatprep.subr.mxu0 %v1160_v57 }
 0x29c   : > { %1749 = vmatpush1.msra.mxu0 %v1284_v45 }
 0x29d   : > { %4090 = vmatmul.mubr.msk.f32.vlgmr.msra.gmra.mxu0 %vm1438_vm8, %v7934_v41  ;;  %1706 = vmatmul.mubr.f32.gmra.mxu1 %v867_v23 }
 0x29e   : > { %1788 = vmatprep.mubr.f32.mxu0 %v5322_v26  ;;  %1711 = vmatprep.mubr.f32.mxu1 %v871_v24 }
 0x2a1   : > { %4091 = vmatmul.mubr.msk.f32.gmra.mxu0 %vm1438_vm8, %v5564_v5  ;;  %1712 = vmatmul.mubr.f32.gmra.mxu1 %v870_v25 }
 0x2a2   : > { %1794 = vmatprep.mubr.f32.mxu0 %v5322_v26 }
 0x2a5   : > { %4092 = vmatmul.mubr.msk.f32.gmra.mxu0 %vm1438_vm8, %v5583_v28  ;;  %v5801_v28 = vpop.permute.xlu0 %894 }
 0x2a6   : > { %1800 = vmatprep.mubr.f32.mxu0 %v5322_v26  ;;  %v1816_v26 = vlaneseq }
 0x2a8   : > { %v1817_v39 = vshrl.u32 %v1816_v26, 7 }
 0x2a9   : > { %4093 = vmatmul.mubr.msk.f32.gmra.mxu0 %vm1438_vm8, %v5603_v55  ;;  %v890_v55 = vpop.permute.xlu1 %889  ;;  %v5807_v7 = vpop.permute.xlu0 %879 }
 0x2aa   : > { %v1818_v12 = vsub.s32 0, %v1817_v39  ;;  %v1822_v36 = vsub.s32 1, %v1817_v39  ;;  %v1826_v19 = vsub.s32 2, %v1817_v39  ;;  %v1830_v21 = vsub.s32 3, %v1817_v39 }
 0x2ac   : > { %v5822_v52 = vrot.slane %v387_v30, %v1818_v12  ;;  %v5828_v46 = vrot.slane %v387_v30, %v1822_v36  ;;  %v5846_v45 = vrot.slane %v387_v30, %v1826_v19  ;;  %v5848_v41 = vrot.slane %v387_v30, %v1830_v21 }
 0x2ad   : > { %v885_v2 = vpop.permute.xlu1 %884 }
 0x2ae   : > { %7935 = vst [vmem:[#allocation19_spill] sm:$0xff] %v5822_v52  ;;  %7936 = vst [vmem:[#allocation20_spill] sm:$0xff] %v5828_v46 }
 0x2af   : > { %7937 = vst [vmem:[#allocation4_spill] sm:$0xff] %v5846_v45  ;;  %7938 = vst [vmem:[#allocation7_spill] sm:$0xff] %v5848_v41 }
 0x2c7   : > { %v1612_v13 = vpop.f32.mrf.mxu1 }
 0x2c9   : > { %v1614_v9 = vpop.f32.mrf.mxu1 }
 0x2cf   : > { %v1618_v18 = vpop.f32.mrf.mxu1 }
 0x2d1   : > { %v1620_v5 = vpop.f32.mrf.mxu1 }
 0x2d3   : > { %v1624_v62 = vpop.f32.mrf.mxu1 }
 0x2d5   : > { %v1626_v27 = vpop.f32.mrf.mxu1 }
 0x344   : > { %v1517_v37 = vpop.f32.mrf.mxu0 }
 0x345   : > { %v1518_v49 = vadd.f32 %v1517_v37, %v5807_v7 }
 0x346   : > { %v1519_v34 = vpop.f32.mrf.mxu0 }
 0x347   : > { %v1520_v51 = vadd.f32 %v1519_v34, %v5807_v7  ;;  %v5830_v17 = vadd.f32 %v1606_v33, %v1518_v49 }
 0x348   : > { %v1523_v53 = vpop.f32.mrf.mxu0 }
 0x349   : > { %v1524_v58 = vadd.f32 %v1523_v53, %v885_v2  ;;  %v5832_v59 = vadd.f32 %v1608_v14, %v1520_v51  ;;  %v1836_v14 = vmul.f32 %v5822_v52, %v5830_v17 }
 0x34a   : > { %v1525_v8 = vpop.f32.mrf.mxu0 }
 0x34b   : > { %v1526_v60 = vadd.f32 %v1525_v8, %v885_v2  ;;  %v5834_v10 = vadd.f32 %v1612_v13, %v1524_v58  ;;  %v1837_v34 = vmul.f32 %v5828_v46, %v5832_v59 }
 0x34c   : > { %v1529_v42 = vpop.f32.mrf.mxu0 }
 0x34d   : > { %v1530_v6 = vadd.f32 %v1529_v42, %v890_v55  ;;  %v5844_v54 = vadd.f32 %v1614_v9, %v1526_v60  ;;  %v1840_v9 = vmul.f32 %v5822_v52, %v5834_v10 }
 0x34e   : > { %v1531_v40 = vpop.f32.mrf.mxu0 }
 0x34f   : > { %v1532_v11 = vadd.f32 %v1531_v40, %v890_v55  ;;  %v5818_v61 = vadd.f32 %v1618_v18, %v1530_v6 }
 0x350   : > { %v1535_v44 = vpop.f32.mrf.mxu0 }
 0x351   : > { %v1536_v31 = vadd.f32 %v1535_v44, %v5801_v28  ;;  %v5820_v16 = vadd.f32 %v1620_v5, %v1532_v11  ;;  %v1844_v47 = vmul.f32 %v5822_v52, %v5818_v61  ;;  %v1841_v44 = vmul.f32 %v5828_v46, %v5844_v54 }
 0x352   : > { %v1537_v3 = vpop.f32.mrf.mxu0 }
 0x353   : > { %v1538_v29 = vadd.f32 %v1537_v3, %v5801_v28  ;;  %v5824_v23 = vadd.f32 %v1624_v62, %v1536_v31  ;;  %v1845_v1 = vmul.f32 %v5828_v46, %v5820_v16 }
 0x355   : > { %v5803_v35 = vpop.f32.mrf.mxu1  ;;  %v5826_v24 = vadd.f32 %v1626_v27, %v1538_v29  ;;  %v1848_v57 = vmul.f32 %v5822_v52, %v5824_v23  ;;  %v1864_v53 = vadd.f32 %v1845_v1, %v1844_v47  ;;  %v1885_v31 = vmul.f32 %v1845_v1, %v1845_v1 }
 0x357   : > { %v5805_v20 = vpop.f32.mrf.mxu1  ;;  %v1849_v15 = vmul.f32 %v5828_v46, %v5826_v24  ;;  %v1888_v62 = vmul.f32 %v1848_v57, %v1848_v57 }
 0x358   : > { %v1698_v30 = vadd.f32 %v5805_v20, %v5807_v7 }
 0x359   : > { %v1701_v50 = vpop.f32.mrf.mxu1  ;;  %v1889_v40 = vmul.f32 %v1849_v15, %v1849_v15  ;;  %v1870_v29 = vadd.f32 %v1849_v15, %v1848_v57 }
 0x35a   : > { %v1702_v4 = vadd.f32 %v1701_v50, %v885_v2 }
 0x35b   : > { %v1703_v63 = vpop.f32.mrf.mxu1  ;;  %v1910_v36 = vadd.f32 %v1889_v40, %v1888_v62  ;;  %v1876_v40 = vmul.f32 %v1836_v14, %v1836_v14 }
 0x35c   : > { %v1704_v5 = vadd.f32 %v1703_v63, %v885_v2  ;;  %v1884_v2 = vmul.f32 %v1844_v47, %v1844_v47  ;;  %v1881_v47 = vmul.f32 %v1841_v44, %v1841_v44 }
 0x35d   : > { %v5814_v43 = vpop.f32.mrf.mxu0  ;;  %v1707_v48 = vpop.f32.mrf.mxu1 }
 0x35e   : > { %v1708_v22 = vadd.f32 %v1707_v48, %v890_v55  ;;  %v1904_v57 = vadd.f32 %v1885_v31, %v1884_v2 }
 0x35f   : > { %v1786_v38 = vpop.f32.mrf.mxu0  ;;  %v1709_v56 = vpop.f32.mrf.mxu1 }
 0x360   : > { %v1710_v13 = vadd.f32 %v1709_v56, %v890_v55  ;;  %v1696_v55 = vadd.f32 %v5803_v35, %v5807_v7  ;;  %v5886_v58 = vadd.f32 %v1786_v38, %v1698_v30 }
 0x361   : > { %v1790_v25 = vpop.f32.mrf.mxu0  ;;  %v1713_v0 = vpop.f32.mrf.mxu1 }
 0x362   : > { %v1714_v37 = vadd.f32 %v1713_v0, %v5801_v28  ;;  %v5867_v39 = vadd.f32 %v1790_v25, %v1702_v4  ;;  %v1858_v25 = vadd.f32 %v1841_v44, %v1840_v9 }
 0x363   : > { %v1792_v32 = vpop.f32.mrf.mxu0  ;;  %v1715_v8 = vpop.f32.mrf.mxu1 }
 0x364   : > { %v5869_v3 = vadd.f32 %v1792_v32, %v1704_v5  ;;  %v1716_v11 = vadd.f32 %v1715_v8, %v5801_v28  ;;  %v5884_v28 = vadd.f32 %v5814_v43, %v1696_v55  ;;  %v1842_v56 = vmul.f32 %v5846_v45, %v5867_v39 }
 0x365   : > { %v1796_v33 = vpop.f32.mrf.mxu0  ;;  %v1852_v5 = vadd.f32 %v1837_v34, %v1836_v14 }
 0x366   : > { %v5853_v18 = vadd.f32 %v1796_v33, %v1708_v22  ;;  %v1843_v20 = vmul.f32 %v5848_v41, %v5869_v3  ;;  %v1880_v22 = vmul.f32 %v1840_v9, %v1840_v9  ;;  %v1838_v15 = vmul.f32 %v5846_v45, %v5884_v28 }
 0x367   : > { %v1798_v42 = vpop.f32.mrf.mxu0  ;;  %v1859_v4 = vadd.f32 %v1858_v25, %v1842_v56  ;;  %v1882_v8 = vmul.f32 %v1842_v56, %v1842_v56  ;;  %v388_v56 = vld [vmem:[%s7763_s10] sm:$0xff] }
 0x368   : > { %v1846_v27 = vmul.f32 %v5846_v45, %v5853_v18  ;;  %v5861_v26 = vadd.f32 %v1798_v42, %v1710_v13  ;;  %v1877_v13 = vmul.f32 %v1837_v34, %v1837_v34  ;;  %v1860_v9 = vsel %vm397_vm0, %v1843_v20, 0.0  ;;  %4162 = vmatprep.mubr.msk.f32.mxu1 %vm1438_vm8, %v388_v56  ;;  %4176 = vmatprep.mubr.msk.f32.mxu0 %vm1438_vm8, %v388_v56 }
 0x369   : > { %v1802_v50 = vpop.f32.mrf.mxu0  ;;  %v1898_v55 = vadd.f32 %v1881_v47, %v1880_v22  ;;  %v389_v22 = vld [vmem:[%s7763_s10 + $0x8] sm:$0xff]  ;;  %v390_v47 = vld [vmem:[%s7763_s10 + $0x10] sm:$0xff] }
 0x36a   : > { %v1865_v6 = vadd.f32 %v1864_v53, %v1846_v27  ;;  %v1847_v63 = vmul.f32 %v5848_v41, %v5861_v26  ;;  %v5874_v12 = vadd.f32 %v1802_v50, %v1714_v37  ;;  %v1886_v1 = vmul.f32 %v1846_v27, %v1846_v27 }
 0x36b   : > { %v1804_v35 = vpop.f32.mrf.mxu0  ;;  %v1839_v37 = vmul.f32 %v5848_v41, %v5886_v58  ;;  %v1883_v27 = vmul.f32 %v1843_v20, %v1843_v20  ;;  %v1853_v50 = vadd.f32 %v1852_v5, %v1838_v15  ;;  %v1892_v34 = vadd.f32 %v1877_v13, %v1876_v40 }
 0x36c   : > { %v1866_v48 = vsel %vm397_vm0, %v1847_v63, 0.0  ;;  %v1850_v49 = vmul.f32 %v5846_v45, %v5874_v12  ;;  %v5881_v51 = vadd.f32 %v1804_v35, %v1716_v11  ;;  %v1887_v43 = vmul.f32 %v1847_v63, %v1847_v63 }
 0x36d   : > { %v1867_v60 = vadd.f32 %v1866_v48, %v1865_v6  ;;  %v1905_v62 = vadd.f32 %v1904_v57, %v1886_v1  ;;  %v1878_v6 = vmul.f32 %v1838_v15, %v1838_v15  ;;  %v1861_v11 = vadd.f32 %v1860_v9, %v1859_v4 }
 0x36e   : > { %v1871_v7 = vadd.f32 %v1870_v29, %v1850_v49  ;;  %v1890_v19 = vmul.f32 %v1850_v49, %v1850_v49  ;;  %v1851_v21 = vmul.f32 %v5848_v41, %v5881_v51  ;;  %v1906_v44 = vsel %vm397_vm0, %v1887_v43, 0.0 }
 0x36f   : > { %1868 = vadd.xlane.f32.xlu0 %v1867_v60  ;;  %v1854_v63 = vsel %vm397_vm0, %v1839_v37, 0.0  ;;  %v1879_v2 = vmul.f32 %v1839_v37, %v1839_v37  ;;  %v1907_v31 = vadd.f32 %v1906_v44, %v1905_v62  ;;  %v1899_v29 = vadd.f32 %v1898_v55, %v1882_v8 }
 0x370   : > { %v1872_v38 = vsel %vm397_vm0, %v1851_v21, 0.0  ;;  %v1891_v32 = vmul.f32 %v1851_v21, %v1851_v21  ;;  %v1911_v0 = vadd.f32 %v1910_v36, %v1890_v19  ;;  %v1900_v30 = vsel %vm397_vm0, %v1883_v27, 0.0 }
 0x371   : > { %v1873_v33 = vadd.f32 %v1872_v38, %v1871_v7  ;;  %v1855_v35 = vadd.f32 %v1854_v63, %v1853_v50  ;;  %v1893_v14 = vadd.f32 %v1892_v34, %v1878_v6  ;;  %v1894_v36 = vsel %vm397_vm0, %v1879_v2, 0.0  ;;  %v391_v38 = vld [vmem:[%s7763_s10 + $0x18] sm:$0xff]  ;;  %v1808_v2 = vld [vmem:[%s7756_s3 + $0x8] sm:$0xff] }
 0x372   : > { %v1912_v53 = vsel %vm397_vm0, %v1891_v32, 0.0  ;;  %v1901_v48 = vadd.f32 %v1900_v30, %v1899_v29  ;;  %v4335_v32 = vld [vmem:[#allocation2 + $0x60] sm:$0xff]  ;;  %v1812_v30 = vld [vmem:[%s7757_s4 + $0x8] sm:$0xff] }
 0x373   : > { %1874 = vadd.xlane.f32.xlu1 %v1873_v33  ;;  %v1913_v42 = vadd.f32 %v1912_v53, %v1911_v0  ;;  %v1895_v49 = vadd.f32 %v1894_v36, %v1893_v14  ;;  %v4277_v0 = vpack.i.bf16 %v4335_v32, %v4335_v32  ;;  %v1810_v14 = vld [vmem:[%s7756_s3 + $0x18] sm:$0xff] }
 0x375   : > { %1914 = vadd.xlane.f32.xlu0 %v1913_v42 }
 0x377   : > { %1862 = vadd.xlane.f32.xlu1 %v1861_v11 }
 0x379   : > { %1908 = vadd.xlane.f32.xlu0 %v1907_v31 }
 0x37b   : > { %1856 = vadd.xlane.f32.xlu1 %v1855_v35  ;;  %v1807_v35 = vld [vmem:[%s7756_s3] sm:$0xff] }
 0x37d   : > { %1902 = vadd.xlane.f32.xlu0 %v1901_v48 }
 0x37f   : > { %1896 = vadd.xlane.f32.xlu1 %v1895_v49  ;;  %v1809_v49 = vld [vmem:[%s7756_s3 + $0x10] sm:$0xff] }
 0x390   : > { %4283 = vrot.lane.b32.xlu1 %v4277_v0, %s4355_s28 }
 0x393   : > { %4278 = vrot.lane.b32.xlu0 %v4277_v0, %s4355_s28 }
 0x394   : > { %4293 = vrot.lane.b32.xlu1 %v4277_v0, %s4360_s22 }
 0x397   : > { %4288 = vrot.lane.b32.xlu0 %v4277_v0, %s4360_s22 }
 0x398   : > { %4298 = vrot.lane.b32.xlu1 %v4277_v0, %s4352_s25 }
 0x39b   : > { %4303 = vrot.lane.b32.xlu0 %v4277_v0, %s4352_s25 }
 0x39c   : > { %4313 = vrot.lane.b32.xlu1 %v4277_v0, %s4361_s26 }
 0x39f   : > { %4308 = vrot.lane.b32.xlu0 %v4277_v0, %s4361_s26 }
 0x3f8   : > { %v1869_v60 = vpop.xlane.xlu0 %1868 }
 0x3fc   : > { %v1875_v20 = vpop.xlane.xlu1 %1874 }
 0x3fd   : > { %4154 = vmatprep.subr.mxu1 %v1875_v20 }
 0x3fe   : > { %4155 = vmatpush3.msra.mxu1 %v1875_v20  ;;  %v1915_v7 = vpop.xlane.xlu0 %1914 }
 0x3ff   : > { %4156 = vmatprep.subr.mxu1 %v1869_v60  ;;  %4168 = vmatprep.subr.mxu0 %v1915_v7 }
 0x400   : > { %4157 = vmatpush3.msra.mxu1 %v1869_v60  ;;  %4169 = vmatpush3.msra.mxu0 %v1915_v7  ;;  %v1863_v19 = vpop.xlane.xlu1 %1862 }
 0x401   : > { %4158 = vmatprep.subr.mxu1 %v1863_v19 }
 0x402   : > { %v1909_v21 = vpop.xlane.xlu0 %1908  ;;  %4159 = vmatpush3.msra.mxu1 %v1863_v19 }
 0x403   : > { %4170 = vmatprep.subr.mxu0 %v1909_v21 }
 0x404   : > { %4171 = vmatpush3.msra.mxu0 %v1909_v21  ;;  %v1857_v25 = vpop.xlane.xlu1 %1856 }
 0x405   : > { %4160 = vmatprep.subr.mxu1 %v1857_v25 }
 0x406   : > { %v1903_v1 = vpop.xlane.xlu0 %1902  ;;  %4161 = vmatpush3.msra.mxu1 %v1857_v25  ;;  %v1814_v25 = vld [vmem:[%s7757_s4 + $0x18] sm:$0xff] }
 0x407   : > { %4163 = vmatmul.mubr.msk.f32.vlgmr.msra.gmra.mxu1 %vm1438_vm8, %v389_v22  ;;  %4172 = vmatprep.subr.mxu0 %v1903_v1 }
 0x408   : > { %4173 = vmatpush3.msra.mxu0 %v1903_v1  ;;  %v1897_v43 = vpop.xlane.xlu1 %1896  ;;  %4165 = vmatprep.mubr.msk.f32.mxu1 %vm1438_vm8, %v390_v47 }
 0x409   : > { %4174 = vmatprep.subr.mxu0 %v1897_v43 }
 0x40a   : > { %4175 = vmatpush3.msra.mxu0 %v1897_v43 }
 0x40b   : > { %4177 = vmatmul.mubr.msk.f32.vlgmr.msra.gmra.mxu0 %vm1438_vm8, %v389_v22  ;;  %4166 = vmatmul.mubr.msk.f32.gmra.mxu1 %vm1438_vm8, %v391_v38 }
 0x40c   : > { %4179 = vmatprep.mubr.msk.f32.mxu0 %vm1438_vm8, %v390_v47  ;;  %v1811_v47 = vld [vmem:[%s7757_s4] sm:$0xff] }
 0x40f   : > { %4180 = vmatmul.mubr.msk.f32.gmra.mxu0 %vm1438_vm8, %v391_v38  ;;  %v1813_v38 = vld [vmem:[%s7757_s4 + $0x10] sm:$0xff] }
 0x410   : > { %3397 = vmatprep.mubr.f32.mxu0 %v4335_v32 }
 0x4c7   : > { %v4164_v57 = vpop.f32.mrf.mxu1 }
 0x4c8   : > { %v2099_v15 = vmul.f32 %v4164_v57, %v4164_v57 }
 0x4c9   : > { %v1994_v4 = vpop.f32.mrf.mxu1 }
 0x4ca   : > { %v2098_v37 = vmul.f32 %v1994_v4, %v1994_v4 }
 0x4cb   : > { %v4178_v33 = vpop.f32.mrf.mxu0  ;;  %v4167_v13 = vpop.f32.mrf.mxu1 }
 0x4cc   : > { %v2103_v9 = vsub.f32 %v4178_v33, %v2099_v15  ;;  %v2101_v53 = vmul.f32 %v4167_v13, %v4167_v13  ;;  %v5959_v15 = vpop.permute.xlu1 %4283 }
 0x4cd   : > { %v2079_v5 = vpop.f32.mrf.mxu0  ;;  %v2004_v8 = vpop.f32.mrf.mxu1 }
 0x4ce   : > { %v2107_v42 = vadd.f32 1e-05, %v2103_v9  ;;  %v2102_v62 = vsub.f32 %v2079_v5, %v2098_v37  ;;  %v2100_v40 = vmul.f32 %v2004_v8, %v2004_v8 }
 0x4cf   : > { %v4181_v27 = vpop.f32.mrf.mxu0 }
 0x4d0   : > { %4317 = vrsqrt.f32 %v2107_v42  ;;  %v2106_v44 = vadd.f32 1e-05, %v2102_v62  ;;  %v2105_v55 = vsub.f32 %v4181_v27, %v2101_v53  ;;  %v5963_v33 = vpop.permute.xlu1 %4293 }
 0x4d1   : > { %v2089_v50 = vpop.f32.mrf.mxu0 }
 0x4d2   : > { %4319 = vrsqrt.f32 %v2106_v44  ;;  %v2109_v6 = vadd.f32 1e-05, %v2105_v55  ;;  %v2104_v11 = vsub.f32 %v2089_v50, %v2100_v40 }
 0x4d4   : > { %4321 = vrsqrt.f32 %v2109_v6  ;;  %v2108_v63 = vadd.f32 1e-05, %v2104_v11  ;;  %v5967_v37 = vpop.permute.xlu1 %4298 }
 0x4d5   : > { %7940 = vst [vmem:[#allocation11_spill] sm:$0xff] %v5967_v37 }
 0x4d6   : > { %4323 = vrsqrt.f32 %v2108_v63 }
 0x4d8   : > { %v5971_v53 = vpop.permute.xlu1 %4313 }
 0x4d9   : > { %7942 = vst [vmem:[#allocation8_spill] sm:$0xff] %v5971_v53 }
 0x4dd   : > { %v4318_v31 = vpop.eup %4317 }
 0x4de   : > { %v2115_v29 = vmul.f32 %v4318_v31, %v1808_v2 }
 0x4df   : > { %v4320_v34 = vpop.eup %4319 }
 0x4e0   : > { %2133 = vperm.xlu0 %4275, %v2115_v29   ;;  %v2119_v36 = vmul.f32 %v4164_v57, %v2115_v29  ;;  %v2114_v60 = vmul.f32 %v4320_v34, %v1807_v35  ;;  %v5957_v57 = vpop.permute.xlu0 %4278 }
 0x4e1   : > { %v4322_v48 = vpop.eup %4321 }
 0x4e2   : > { %v2123_v56 = vsub.f32 %v1812_v30, %v2119_v36  ;;  %v2117_v20 = vmul.f32 %v4322_v48, %v1810_v14  ;;  %v2118_v22 = vmul.f32 %v2114_v60, %v1994_v4 }
 0x4e3   : > { %v4324_v7 = vpop.eup %4323 }
 0x4e4   : > { %2169 = vperm.xlu1 %4276, %v2123_v56   ;;  %2128 = vperm.xlu0 %4275, %v2114_v60   ;;  %v2116_v19 = vmul.f32 %v4324_v7, %v1809_v49  ;;  %v2121_v21 = vmul.f32 %v4167_v13, %v2117_v20  ;;  %v2122_v32 = vsub.f32 %v1811_v47, %v2118_v22  ;;  %v5961_v4 = vpop.permute.xlu0 %4288 }
 0x4e5   : > { %7939 = vst [vmem:[#allocation5_spill] sm:$0xff] %v5961_v4 }
 0x4e6   : > { %v2125_v1 = vsub.f32 %v1814_v25, %v2121_v21  ;;  %v2120_v43 = vmul.f32 %v2116_v19, %v2004_v8 }
 0x4e8   : > { %2143 = vperm.xlu0 %4275, %v2117_v20   ;;  %2138 = vperm.xlu1 %4276, %v2116_v19   ;;  %v2124_v0 = vsub.f32 %v1813_v38, %v2120_v43  ;;  %v5965_v13 = vpop.permute.xlu0 %4303 }
 0x4ec   : > { %2164 = vperm.xlu0 %4275, %v2122_v32   ;;  %2179 = vperm.xlu1 %4276, %v2125_v1   ;;  %v5969_v9 = vpop.permute.xlu0 %4308 }
 0x4ed   : > { %7941 = vst [vmem:[#allocation6_spill] sm:$0xff] %v5969_v9 }
 0x4f0   : > { %2174 = vperm.xlu1 %4276, %v2124_v0  }
 0x55b   : > { %v2134_v5 = vpop.permute.xlu0 %2133 }
 0x55c   : > { %v2150_v8 = vmul.f32 %v2134_v5, %v5834_v10  ;;  %v2151_v42 = vmul.f32 %v2134_v5, %v5844_v54  ;;  %v2152_v62 = vmul.f32 %v2134_v5, %v5867_v39  ;;  %v2153_v40 = vmul.f32 %v2134_v5, %v5869_v3 }
 0x55f   : > { %v2129_v27 = vpop.permute.xlu0 %2128  ;;  %v2170_v44 = vpop.permute.xlu1 %2169 }
 0x560   : > { %v2186_v55 = vadd.f32 %v2170_v44, %v2150_v8  ;;  %v2187_v50 = vadd.f32 %v2170_v44, %v2151_v42  ;;  %v2188_v6 = vadd.f32 %v2170_v44, %v2152_v62  ;;  %v2189_v11 = vadd.f32 %v2170_v44, %v2153_v40 }
 0x561   : > { %v2146_v63 = vmul.f32 %v2129_v27, %v5830_v17  ;;  %v2147_v54 = vmul.f32 %v2129_v27, %v5832_v59  ;;  %v2148_v39 = vmul.f32 %v2129_v27, %v5884_v28  ;;  %v2149_v3 = vmul.f32 %v2129_v27, %v5886_v58 }
 0x562   : > { %v2202_v2 = vmax.f32 %v2186_v55, 0.0  ;;  %v2203_v31 = vmax.f32 %v2187_v50, 0.0  ;;  %v2204_v29 = vmax.f32 %v2188_v6, 0.0  ;;  %v2205_v34 = vmax.f32 %v2189_v11, 0.0 }
 0x563   : > { %v2144_v30 = vpop.permute.xlu0 %2143  ;;  %v2139_v10 = vpop.permute.xlu1 %2138 }
 0x564   : > { %v2158_v35 = vmul.f32 %v2144_v30, %v5824_v23  ;;  %v5983_v14 = vmul.f32 %v2202_v2, %v5822_v52  ;;  %v5986_v36 = vmul.f32 %v2203_v31, %v5828_v46  ;;  %v5989_v17 = vmul.f32 %v2204_v29, %v5846_v45 }
 0x565   : > { %v2221_v48 = vmul.f32 %v2205_v34, %v5848_v41  ;;  %v2159_v49 = vmul.f32 %v2144_v30, %v5826_v24  ;;  %v2160_v59 = vmul.f32 %v2144_v30, %v5874_v12  ;;  %v2161_v28 = vmul.f32 %v2144_v30, %v5881_v51 }
 0x566   : > { %v2154_v58 = vmul.f32 %v2139_v10, %v5818_v61  ;;  %v2155_v23 = vmul.f32 %v2139_v10, %v5820_v16  ;;  %v2156_v56 = vmul.f32 %v2139_v10, %v5853_v18  ;;  %v2157_v60 = vmul.f32 %v2139_v10, %v5861_v26  ;;  %2389 = vrot.lane.b32.xlu1 %v5986_v36, %s4355_s28 }
 0x567   : > { %2237 = vst.msk [vmem:[#allocation2 + $0x50] sm:$0xff] %vm397_vm0, %v2221_v48  ;;  %v2165_v20 = vpop.permute.xlu0 %2164  ;;  %v2180_v7 = vpop.permute.xlu1 %2179  ;;  %2387 = vrot.lane.b32.xlu0 %v5983_v14, %s4355_s28 }
 0x568   : > { %v2182_v24 = vadd.f32 %v2165_v20, %v2146_v63  ;;  %v2183_v12 = vadd.f32 %v2165_v20, %v2147_v54  ;;  %v2184_v51 = vadd.f32 %v2165_v20, %v2148_v39  ;;  %v2185_v61 = vadd.f32 %v2165_v20, %v2149_v3 }
 0x569   : > { %v2194_v19 = vadd.f32 %v2180_v7, %v2158_v35  ;;  %v2195_v21 = vadd.f32 %v2180_v7, %v2159_v49  ;;  %v2196_v25 = vadd.f32 %v2180_v7, %v2160_v59  ;;  %v2197_v16 = vadd.f32 %v2180_v7, %v2161_v28 }
 0x56a   : > { %v2198_v22 = vmax.f32 %v2182_v24, 0.0  ;;  %v2199_v18 = vmax.f32 %v2183_v12, 0.0  ;;  %v2200_v47 = vmax.f32 %v2184_v51, 0.0  ;;  %v2201_v26 = vmax.f32 %v2185_v61, 0.0  ;;  %2620 = vrot.lane.b32.xlu1 %v5986_v36, %s4362_s12 }
 0x56b   : > { %v2210_v1 = vmax.f32 %v2194_v19, 0.0  ;;  %v2211_v43 = vmax.f32 %v2195_v21, 0.0  ;;  %v2212_v38 = vmax.f32 %v2196_v25, 0.0  ;;  %v2213_v32 = vmax.f32 %v2197_v16, 0.0  ;;  %v2175_v0 = vpop.permute.xlu1 %2174  ;;  %2391 = vrot.lane.b32.xlu0 %v5989_v17, %s4355_s28 }
 0x56c   : > { %v6009_v5 = vmul.f32 %v2198_v22, %v5822_v52  ;;  %v6012_v8 = vmul.f32 %v2199_v18, %v5828_v46  ;;  %v6015_v42 = vmul.f32 %v2200_v47, %v5846_v45  ;;  %v2217_v62 = vmul.f32 %v2201_v26, %v5848_v41 }
 0x56d   : > { %v6019_v40 = vmul.f32 %v2210_v1, %v5822_v52  ;;  %v6022_v27 = vmul.f32 %v2211_v43, %v5828_v46  ;;  %v6025_v44 = vmul.f32 %v2212_v38, %v5846_v45  ;;  %v2229_v55 = vmul.f32 %v2213_v32, %v5848_v41 }
 0x56e   : > { %2233 = vst.msk [vmem:[#allocation2 + $0x20] sm:$0xff] %vm397_vm0, %v2217_v62  ;;  %v2190_v50 = vadd.f32 %v2175_v0, %v2154_v58  ;;  %v2191_v6 = vadd.f32 %v2175_v0, %v2155_v23  ;;  %v2192_v11 = vadd.f32 %v2175_v0, %v2156_v56  ;;  %v2193_v63 = vadd.f32 %v2175_v0, %v2157_v60  ;;  %v2263_v3 = vld [vmem:[#allocation2 + $0x50] sm:$0xff] }
 0x56f   : > { %2245 = vst.msk [vmem:[#allocation2 + $0xb0] sm:$0xff] %vm397_vm0, %v2229_v55  ;;  %2336 = vrot.lane.b32.xlu1 %v5983_v14, %s4360_s22  ;;  %2618 = vrot.lane.b32.xlu0 %v5983_v14, %s4362_s12 }
 0x570   : > { %v2206_v2 = vmax.f32 %v2190_v50, 0.0  ;;  %v2207_v31 = vmax.f32 %v2191_v6, 0.0  ;;  %v2208_v29 = vmax.f32 %v2192_v11, 0.0  ;;  %v2209_v34 = vmax.f32 %v2193_v63, 0.0 }
 0x572   : > { %v6035_v30 = vmul.f32 %v2206_v2, %v5822_v52  ;;  %v6038_v10 = vmul.f32 %v2207_v31, %v5828_v46  ;;  %v6041_v54 = vmul.f32 %v2208_v29, %v5846_v45  ;;  %v2225_v39 = vmul.f32 %v2209_v34, %v5848_v41 }
 0x573   : > { %2340 = vrot.lane.b32.xlu1 %v5989_v17, %s4360_s22  ;;  %2622 = vrot.lane.b32.xlu0 %v5989_v17, %s4362_s12 }
 0x574   : > { %2241 = vst.msk [vmem:[#allocation2 + $0x80] sm:$0xff] %vm397_vm0, %v2225_v39 }
 0x575   : > { %v2262_v35 = vld [vmem:[#allocation2 + $0x20] sm:$0xff] }
 0x576   : > { %v2265_v61 = vld [vmem:[#allocation2 + $0xb0] sm:$0xff] }
 0x577   : > { %2292 = vrot.lane.b32.xlu1 %v5983_v14, %s4352_s25  ;;  %2338 = vrot.lane.b32.xlu0 %v5986_v36, %s4360_s22 }
 0x57b   : > { %2296 = vrot.lane.b32.xlu1 %v5989_v17, %s4352_s25  ;;  %2393 = vrot.lane.b32.xlu0 %v2263_v3, %s4355_s28  ;;  %v2264_v52 = vld [vmem:[#allocation2 + $0x80] sm:$0xff] }
 0x57f   : > { %2573 = vrot.lane.b32.xlu1 %v5983_v14, %s4363_s16  ;;  %2294 = vrot.lane.b32.xlu0 %v5986_v36, %s4352_s25 }
 0x583   : > { %2577 = vrot.lane.b32.xlu1 %v5989_v17, %s4363_s16  ;;  %2575 = vrot.lane.b32.xlu0 %v5986_v36, %s4363_s16 }
 0x587   : > { %2528 = vrot.lane.b32.xlu1 %v5983_v14, %s4364_s19  ;;  %2530 = vrot.lane.b32.xlu0 %v5986_v36, %s4364_s19 }
 0x58b   : > { %2532 = vrot.lane.b32.xlu1 %v5989_v17, %s4364_s19  ;;  %2483 = vrot.lane.b32.xlu0 %v5983_v14, %s4365_s21 }
 0x58f   : > { %2579 = vrot.lane.b32.xlu1 %v2263_v3, %s4363_s16  ;;  %2487 = vrot.lane.b32.xlu0 %v5989_v17, %s4365_s21 }
 0x593   : > { %2485 = vrot.lane.b32.xlu1 %v5986_v36, %s4365_s21  ;;  %2439 = vrot.lane.b32.xlu0 %v5983_v14, %s4351_s24 }
 0x597   : > { %2534 = vrot.lane.b32.xlu1 %v2263_v3, %s4364_s19  ;;  %2443 = vrot.lane.b32.xlu0 %v5989_v17, %s4351_s24 }
 0x59b   : > { %2441 = vrot.lane.b32.xlu1 %v5986_v36, %s4351_s24  ;;  %2489 = vrot.lane.b32.xlu0 %v2263_v3, %s4365_s21 }
 0x59f   : > { %2445 = vrot.lane.b32.xlu1 %v2263_v3, %s4351_s24  ;;  %2624 = vrot.lane.b32.xlu0 %v2263_v3, %s4362_s12 }
 0x5a3   : > { %2701 = vrot.lane.b32.xlu1 %v5983_v14, %s4361_s26  ;;  %2703 = vrot.lane.b32.xlu0 %v5986_v36, %s4361_s26 }
 0x5a7   : > { %2379 = vrot.lane.b32.xlu1 %v6012_v8, %s4355_s28  ;;  %2705 = vrot.lane.b32.xlu0 %v5989_v17, %s4361_s26 }
 0x5ab   : > { %2612 = vrot.lane.b32.xlu1 %v6012_v8, %s4362_s12  ;;  %2377 = vrot.lane.b32.xlu0 %v6009_v5, %s4355_s28 }
 0x5af   : > { %2330 = vrot.lane.b32.xlu1 %v6012_v8, %s4360_s22  ;;  %2381 = vrot.lane.b32.xlu0 %v6015_v42, %s4355_s28 }
 0x5b3   : > { %2383 = vrot.lane.b32.xlu1 %v2262_v35, %s4355_s28  ;;  %2610 = vrot.lane.b32.xlu0 %v6009_v5, %s4362_s12 }
 0x5b7   : > { %2286 = vrot.lane.b32.xlu1 %v6012_v8, %s4352_s25  ;;  %2614 = vrot.lane.b32.xlu0 %v6015_v42, %s4362_s12 }
 0x5bb   : > { %2567 = vrot.lane.b32.xlu1 %v6012_v8, %s4363_s16  ;;  %2328 = vrot.lane.b32.xlu0 %v6009_v5, %s4360_s22 }
 0x5bf   : > { %2522 = vrot.lane.b32.xlu1 %v6012_v8, %s4364_s19  ;;  %2332 = vrot.lane.b32.xlu0 %v6015_v42, %s4360_s22 }
 0x5c3   : > { %2571 = vrot.lane.b32.xlu1 %v2262_v35, %s4363_s16  ;;  %2284 = vrot.lane.b32.xlu0 %v6009_v5, %s4352_s25 }
 0x5c7   : > { %2477 = vrot.lane.b32.xlu1 %v6012_v8, %s4365_s21  ;;  %2288 = vrot.lane.b32.xlu0 %v6015_v42, %s4352_s25 }
 0x5cb   : > { %2431 = vrot.lane.b32.xlu1 %v6009_v5, %s4351_s24  ;;  %2565 = vrot.lane.b32.xlu0 %v6009_v5, %s4363_s16 }
 0x5cf   : > { %2435 = vrot.lane.b32.xlu1 %v6015_v42, %s4351_s24  ;;  %2569 = vrot.lane.b32.xlu0 %v6015_v42, %s4363_s16 }
 0x5d3   : > { %2481 = vrot.lane.b32.xlu1 %v2262_v35, %s4365_s21  ;;  %2520 = vrot.lane.b32.xlu0 %v6009_v5, %s4364_s19 }
 0x5d7   : > { %2437 = vrot.lane.b32.xlu1 %v2262_v35, %s4351_s24  ;;  %2524 = vrot.lane.b32.xlu0 %v6015_v42, %s4364_s19 }
 0x5d8   : > { %v6141_v36 = vpop.permute.xlu1 %2389 }
 0x5d9   : > { %v6139_v14 = vpop.permute.xlu0 %2387 }
 0x5db   : > { %2616 = vrot.lane.b32.xlu1 %v2262_v35, %s4362_s12  ;;  %2475 = vrot.lane.b32.xlu0 %v6009_v5, %s4365_s21 }
 0x5dc   : > { %v6148_v48 = vpop.permute.xlu1 %2620 }
 0x5dd   : > { %v6146_v17 = vpop.permute.xlu0 %2391 }
 0x5df   : > { %2693 = vrot.lane.b32.xlu1 %v6009_v5, %s4361_s26  ;;  %2479 = vrot.lane.b32.xlu0 %v6015_v42, %s4365_s21 }
 0x5e1   : > { %v6154_v49 = vpop.permute.xlu0 %2618  ;;  %v6156_v59 = vpop.permute.xlu1 %2336 }
 0x5e3   : > { %2526 = vrot.lane.b32.xlu0 %v2262_v35, %s4364_s19  ;;  %2407 = vrot.lane.b32.xlu1 %v6019_v40, %s4355_s28 }
 0x5e5   : > { %v6161_v28 = vpop.permute.xlu0 %2622  ;;  %v6163_v58 = vpop.permute.xlu1 %2340 }
 0x5e6   : > { %7943 = vst [vmem:[#allocation21_spill] sm:$0xff] %v6161_v28 }
 0x5e7   : > { %2433 = vrot.lane.b32.xlu0 %v6012_v8, %s4351_s24  ;;  %2411 = vrot.lane.b32.xlu1 %v6025_v44, %s4355_s28 }
 0x5e9   : > { %v6169_v23 = vpop.permute.xlu0 %2338  ;;  %v6171_v56 = vpop.permute.xlu1 %2292 }
 0x5eb   : > { %2695 = vrot.lane.b32.xlu0 %v6012_v8, %s4361_s26  ;;  %2634 = vrot.lane.b32.xlu1 %v6019_v40, %s4362_s12 }
 0x5ed   : > { %v6177_v60 = vpop.permute.xlu0 %2393  ;;  %v6179_v20 = vpop.permute.xlu1 %2296 }
 0x5ef   : > { %2697 = vrot.lane.b32.xlu0 %v6015_v42, %s4361_s26  ;;  %2638 = vrot.lane.b32.xlu1 %v6025_v44, %s4362_s12 }
 0x5f1   : > { %v6185_v7 = vpop.permute.xlu0 %2294  ;;  %v6187_v24 = vpop.permute.xlu1 %2573 }
 0x5f3   : > { %2409 = vrot.lane.b32.xlu0 %v6022_v27, %s4355_s28  ;;  %2354 = vrot.lane.b32.xlu1 %v6022_v27, %s4360_s22 }
 0x5f5   : > { %v6193_v12 = vpop.permute.xlu0 %2575  ;;  %v6195_v51 = vpop.permute.xlu1 %2577 }
 0x5f7   : > { %2636 = vrot.lane.b32.xlu0 %v6022_v27, %s4362_s12  ;;  %2413 = vrot.lane.b32.xlu1 %v2265_v61, %s4355_s28 }
 0x5f9   : > { %v6200_v19 = vpop.permute.xlu0 %2530  ;;  %v6202_v21 = vpop.permute.xlu1 %2528 }
 0x5fb   : > { %2352 = vrot.lane.b32.xlu0 %v6019_v40, %s4360_s22  ;;  %2310 = vrot.lane.b32.xlu1 %v6022_v27, %s4352_s25 }
 0x5fd   : > { %v6208_v25 = vpop.permute.xlu0 %2483  ;;  %v6210_v16 = vpop.permute.xlu1 %2532 }
 0x5ff   : > { %2356 = vrot.lane.b32.xlu0 %v6025_v44, %s4360_s22  ;;  %2589 = vrot.lane.b32.xlu1 %v6019_v40, %s4363_s16 }
 0x601   : > { %v6216_v22 = vpop.permute.xlu0 %2487  ;;  %v6218_v18 = vpop.permute.xlu1 %2579 }
 0x603   : > { %2308 = vrot.lane.b32.xlu0 %v6019_v40, %s4352_s25  ;;  %2593 = vrot.lane.b32.xlu1 %v6025_v44, %s4363_s16 }
 0x605   : > { %v6224_v47 = vpop.permute.xlu0 %2439  ;;  %v6226_v26 = vpop.permute.xlu1 %2485 }
 0x606   : > { %7944 = vst [vmem:[#allocation22_spill] sm:$0xff] %v6224_v47 }
 0x607   : > { %2312 = vrot.lane.b32.xlu0 %v6025_v44, %s4352_s25  ;;  %2544 = vrot.lane.b32.xlu1 %v6019_v40, %s4364_s19 }
 0x609   : > { %v6232_v1 = vpop.permute.xlu0 %2443  ;;  %v6234_v43 = vpop.permute.xlu1 %2534 }
 0x60a   : > { %7945 = vst [vmem:[#allocation23_spill] sm:$0xff] %v6232_v1  ;;  %7946 = vst [vmem:[#allocation24_spill] sm:$0xff] %v6234_v43 }
 0x60b   : > { %2591 = vrot.lane.b32.xlu0 %v6022_v27, %s4363_s16  ;;  %2548 = vrot.lane.b32.xlu1 %v6025_v44, %s4364_s19 }
 0x60d   : > { %v6240_v38 = vpop.permute.xlu0 %2489  ;;  %v6242_v32 = vpop.permute.xlu1 %2441 }
 0x60e   : > { %7947 = vst [vmem:[#allocation25_spill] sm:$0xff] %v6240_v38  ;;  %7948 = vst [vmem:[#allocation3_spill] sm:$0xff] %v6242_v32 }
 0x60f   : > { %2546 = vrot.lane.b32.xlu0 %v6022_v27, %s4364_s19  ;;  %2595 = vrot.lane.b32.xlu1 %v2265_v61, %s4363_s16 }
 0x611   : > { %v6247_v0 = vpop.permute.xlu0 %2624  ;;  %v6249_v5 = vpop.permute.xlu1 %2445 }
 0x612   : > { %7949 = vst [vmem:[#allocation26_spill] sm:$0xff] %v6247_v0  ;;  %7950 = vst [vmem:[#allocation9_spill] sm:$0xff] %v6249_v5 }
 0x613   : > { %2499 = vrot.lane.b32.xlu0 %v6019_v40, %s4365_s21  ;;  %2501 = vrot.lane.b32.xlu1 %v6022_v27, %s4365_s21 }
 0x615   : > { %v6255_v8 = vpop.permute.xlu0 %2703  ;;  %v6257_v42 = vpop.permute.xlu1 %2701 }
 0x616   : > { %7951 = vst [vmem:[#allocation10_spill] sm:$0xff] %v6255_v8  ;;  %7952 = vst [vmem:[#allocation27_spill] sm:$0xff] %v6257_v42 }
 0x617   : > { %2503 = vrot.lane.b32.xlu0 %v6025_v44, %s4365_s21  ;;  %2550 = vrot.lane.b32.xlu1 %v2265_v61, %s4364_s19 }
 0x619   : > { %v6262_v62 = vpop.permute.xlu0 %2705  ;;  %v6264_v55 = vpop.permute.xlu1 %2379 }
 0x61a   : > { %7953 = vst [vmem:[#allocation28_spill] sm:$0xff] %v6262_v62 }
 0x61b   : > { %2455 = vrot.lane.b32.xlu0 %v6019_v40, %s4351_s24  ;;  %2457 = vrot.lane.b32.xlu1 %v6022_v27, %s4351_s24 }
 0x61d   : > { %v6270_v50 = vpop.permute.xlu0 %2377  ;;  %v6272_v6 = vpop.permute.xlu1 %2612 }
 0x61f   : > { %2459 = vrot.lane.b32.xlu0 %v6025_v44, %s4351_s24  ;;  %2505 = vrot.lane.b32.xlu1 %v2265_v61, %s4365_s21 }
 0x621   : > { %v6277_v11 = vpop.permute.xlu0 %2381  ;;  %v6279_v63 = vpop.permute.xlu1 %2330 }
 0x623   : > { %2461 = vrot.lane.b32.xlu0 %v2265_v61, %s4351_s24  ;;  %2719 = vrot.lane.b32.xlu1 %v6022_v27, %s4361_s26 }
 0x625   : > { %v6284_v2 = vpop.permute.xlu0 %2610  ;;  %v6286_v31 = vpop.permute.xlu1 %2383 }
 0x627   : > { %2640 = vrot.lane.b32.xlu0 %v2265_v61, %s4362_s12  ;;  %2397 = vrot.lane.b32.xlu1 %v6035_v30, %s4355_s28 }
 0x629   : > { %v6291_v29 = vpop.permute.xlu0 %2614  ;;  %v6293_v34 = vpop.permute.xlu1 %2286 }
 0x62b   : > { %2717 = vrot.lane.b32.xlu0 %v6019_v40, %s4361_s26  ;;  %2401 = vrot.lane.b32.xlu1 %v6041_v54, %s4355_s28 }
 0x62d   : > { %v6299_v27 = vpop.permute.xlu0 %2328  ;;  %v6301_v39 = vpop.permute.xlu1 %2567 }
 0x62f   : > { %2721 = vrot.lane.b32.xlu0 %v6025_v44, %s4361_s26  ;;  %2626 = vrot.lane.b32.xlu1 %v6035_v30, %s4362_s12 }
 0x631   : > { %v6307_v3 = vpop.permute.xlu0 %2332  ;;  %v6309_v35 = vpop.permute.xlu1 %2522 }
 0x633   : > { %2399 = vrot.lane.b32.xlu0 %v6038_v10, %s4355_s28  ;;  %2630 = vrot.lane.b32.xlu1 %v6041_v54, %s4362_s12 }
 0x635   : > { %v6315_v40 = vpop.permute.xlu0 %2284  ;;  %v6317_v61 = vpop.permute.xlu1 %2571 }
 0x637   : > { %2628 = vrot.lane.b32.xlu0 %v6038_v10, %s4362_s12  ;;  %2344 = vrot.lane.b32.xlu1 %v6035_v30, %s4360_s22 }
 0x639   : > { %v6323_v44 = vpop.permute.xlu0 %2288  ;;  %v6325_v41 = vpop.permute.xlu1 %2477 }
 0x63b   : > { %2346 = vrot.lane.b32.xlu0 %v6038_v10, %s4360_s22  ;;  %2348 = vrot.lane.b32.xlu1 %v6041_v54, %s4360_s22 }
 0x63d   : > { %v6331_v45 = vpop.permute.xlu0 %2565  ;;  %v6333_v46 = vpop.permute.xlu1 %2431 }
 0x63e   : > { %7954 = vst [vmem:[#allocation29_spill] sm:$0xff] %v6333_v46 }
 0x63f   : > { %2403 = vrot.lane.b32.xlu0 %v2264_v52, %s4355_s28  ;;  %2300 = vrot.lane.b32.xlu1 %v6035_v30, %s4352_s25 }
 0x641   : > { %v6338_v62 = vpop.permute.xlu0 %2569  ;;  %v6340_v42 = vpop.permute.xlu1 %2435 }
 0x642   : > { %7955 = vst [vmem:[#allocation30_spill] sm:$0xff] %v6340_v42 }
 0x643   : > { %2302 = vrot.lane.b32.xlu0 %v6038_v10, %s4352_s25  ;;  %2304 = vrot.lane.b32.xlu1 %v6041_v54, %s4352_s25 }
 0x645   : > { %v6346_v8 = vpop.permute.xlu0 %2520  ;;  %v6348_v53 = vpop.permute.xlu1 %2481 }
 0x646   : > { %7956 = vst [vmem:[#allocation32_spill] sm:$0xff] %v6348_v53 }
 0x647   : > { %2581 = vrot.lane.b32.xlu0 %v6035_v30, %s4363_s16  ;;  %2583 = vrot.lane.b32.xlu1 %v6038_v10, %s4363_s16 }
 0x649   : > { %v6354_v9 = vpop.permute.xlu0 %2524  ;;  %v6356_v0 = vpop.permute.xlu1 %2437 }
 0x64a   : > { %7957 = vst [vmem:[#allocation31_spill] sm:$0xff] %v6356_v0 }
 0x64b   : > { %2585 = vrot.lane.b32.xlu0 %v6041_v54, %s4363_s16  ;;  %2538 = vrot.lane.b32.xlu1 %v6038_v10, %s4364_s19 }
 0x64d   : > { %v6362_v5 = vpop.permute.xlu0 %2475  ;;  %v6364_v38 = vpop.permute.xlu1 %2616 }
 0x64e   : > { %7958 = vst [vmem:[#allocation35_spill] sm:$0xff] %v6364_v38 }
 0x64f   : > { %2536 = vrot.lane.b32.xlu0 %v6035_v30, %s4364_s19  ;;  %2587 = vrot.lane.b32.xlu1 %v2264_v52, %s4363_s16 }
 0x651   : > { %v6369_v53 = vpop.permute.xlu0 %2479  ;;  %v6371_v46 = vpop.permute.xlu1 %2693 }
 0x652   : > { %7959 = vst [vmem:[#allocation33_spill] sm:$0xff] %v6371_v46 }
 0x653   : > { %2540 = vrot.lane.b32.xlu0 %v6041_v54, %s4364_s19  ;;  %2493 = vrot.lane.b32.xlu1 %v6038_v10, %s4365_s21 }
 0x655   : > { %v6377_v0 = vpop.permute.xlu0 %2526  ;;  %v6379_v42 = vpop.permute.xlu1 %2407 }
 0x656   : > { %7960 = vst [vmem:[#allocation34_spill] sm:$0xff] %v6377_v0 }
 0x657   : > { %2491 = vrot.lane.b32.xlu0 %v6035_v30, %s4365_s21  ;;  %2542 = vrot.lane.b32.xlu1 %v2264_v52, %s4364_s19  ;;  %s7720_s19 = scalar_lea.vmem %s7764_s11, %s4120_s20 }
 0x659   : > { %v6384_v38 = vpop.permute.xlu0 %2433  ;;  %v6386_v47 = vpop.permute.xlu1 %2411 }
 0x65a   : > { %7961 = vst [vmem:[#allocation36_spill] sm:$0xff] %v6384_v38 }
 0x65b   : > { %2495 = vrot.lane.b32.xlu0 %v6041_v54, %s4365_s21  ;;  %2449 = vrot.lane.b32.xlu1 %v6038_v10, %s4351_s24 }
 0x65d   : > { %v6392_v46 = vpop.permute.xlu0 %2695  ;;  %v6394_v0 = vpop.permute.xlu1 %2634 }
 0x65e   : > { %7962 = vst [vmem:[#allocation17_spill] sm:$0xff] %v6392_v46 }
 0x65f   : > { %2447 = vrot.lane.b32.xlu0 %v6035_v30, %s4351_s24  ;;  %2497 = vrot.lane.b32.xlu1 %v2264_v52, %s4365_s21 }
 0x661   : > { %v6399_v32 = vpop.permute.xlu0 %2697  ;;  %v6401_v38 = vpop.permute.xlu1 %2638 }
 0x662   : > { %7963 = vst [vmem:[#allocation12_spill] sm:$0xff] %v6399_v32  ;;  %7964 = vst [vmem:[#allocation15_spill] sm:$0xff] %v6401_v38 }
 0x663   : > { %2451 = vrot.lane.b32.xlu0 %v6041_v54, %s4351_s24  ;;  %2453 = vrot.lane.b32.xlu1 %v2264_v52, %s4351_s24 }
 0x665   : > { %v6406_v1 = vpop.permute.xlu0 %2409  ;;  %v6408_v43 = vpop.permute.xlu1 %2354 }
 0x666   : > { %7965 = vst [vmem:[#allocation13_spill] sm:$0xff] %v6408_v43 }
 0x667   : > { %2632 = vrot.lane.b32.xlu0 %v2264_v52, %s4362_s12  ;;  %2711 = vrot.lane.b32.xlu1 %v6038_v10, %s4361_s26 }
 0x669   : > { %v6413_v46 = vpop.permute.xlu0 %2636  ;;  %v6415_v37 = vpop.permute.xlu1 %2413 }
 0x66a   : > { %7966 = vst [vmem:[#allocation14_spill] sm:$0xff] %v6413_v46  ;;  %7967 = vst [vmem:[#allocation16_spill] sm:$0xff] %v6415_v37  ;;  %v2363_v46 = vsel %vm2358_vm12, %v6156_v59, %v6169_v23 }
 0x66b   : > { %2709 = vrot.lane.b32.xlu0 %v6035_v30, %s4361_s26  ;;  %2955 = vrot.lane.b32.xlu1 %v6154_v49, %s4361_s26 }
 0x66d   : > { %v6421_v32 = vpop.permute.xlu0 %2352  ;;  %v6423_v4 = vpop.permute.xlu1 %2310 }
 0x66e   : > { %7968 = vst [vmem:[#allocation18_spill] sm:$0xff] %v6421_v32  ;;  %7969 = vst [vmem:[#allocation37_spill] sm:$0xff] %v6423_v4 }
 0x66f   : > { %2713 = vrot.lane.b32.xlu0 %v6041_v54, %s4361_s26  ;;  %2923 = vrot.lane.b32.xlu1 %v6187_v24, %s4361_s26  ;;  %v2421_v54 = vsel %vm758_vm7, %v6141_v36, %v6146_v17 }
 0x671   : > { %v6429_v52 = vpop.permute.xlu0 %2356  ;;  %v6431_v10 = vpop.permute.xlu1 %2589 }
 0x673   : > { %2769 = vrot.lane.b32.xlu0 %v6163_v58, %s4361_s26  ;;  %2891 = vrot.lane.b32.xlu1 %v6202_v21, %s4361_s26 }
 0x675   : > { %v6437_v30 = vpop.permute.xlu0 %2308  ;;  %v6439_v37 = vpop.permute.xlu1 %2593 }
 0x676   : > { %7970 = vst [vmem:[#allocation38_spill] sm:$0xff] %v6437_v30  ;;  %7971 = vst [vmem:[#allocation39_spill] sm:$0xff] %v6439_v37  ;;  %v2647_v30 = vsel %vm2642_vm11, %v6148_v48, %v6161_v28  ;;  %v4285_v28 = vunpack.i.l.bf16 %v5959_v15 }
 0x677   : > { %2737 = vrot.lane.b32.xlu0 %v6179_v20, %s4361_s26  ;;  %2799 = vrot.lane.b32.xlu1 %v2421_v54, %s4361_s26  ;;  %v2420_v54 = vsel %vm758_vm7, %v6139_v14, %v6141_v36 }
 0x678   : > { %v2419_v36 = vsel %vm758_vm7, %v4285_v28, %v6139_v14  ;;  %v2602_v28 = vsel %vm2597_vm13, %v6193_v12, %v6195_v51 }
 0x679   : > { %v6447_v4 = vpop.permute.xlu0 %2312  ;;  %v6449_v32 = vpop.permute.xlu1 %2544 }
 0x67b   : > { %2859 = vrot.lane.b32.xlu0 %v6208_v25, %s4361_s26  ;;  %2959 = vrot.lane.b32.xlu1 %v2647_v30, %s4361_s26  ;;  %v4295_v30 = vunpack.i.l.bf16 %v5963_v33 }
 0x67d   : > { %v6457_v37 = vpop.permute.xlu0 %2591  ;;  %v6459_v43 = vpop.permute.xlu1 %2548  ;;  %v2362_v38 = vsel %vm2358_vm12, %v4295_v30, %v6156_v59 }
 0x67e   : > { %7972 = vst [vmem:[#allocation40_spill] sm:$0xff] %v6457_v37  ;;  %7973 = vst [vmem:[#allocation41_spill] sm:$0xff] %v6459_v43 }
 0x67f   : > { %2797 = vrot.lane.b32.xlu0 %v2420_v54, %s4361_s26  ;;  %2765 = vrot.lane.b32.xlu1 %v2363_v46, %s4361_s26 }
 0x681   : > { %v6471_v37 = vpop.permute.xlu0 %2546  ;;  %v6473_v43 = vpop.permute.xlu1 %2595 }
 0x682   : > { %7974 = vst [vmem:[#allocation42_spill] sm:$0xff] %v6471_v37  ;;  %7975 = vst [vmem:[#allocation43_spill] sm:$0xff] %v6473_v43  ;;  %v2319_v37 = vsel %vm562_vm3, %v6185_v7, %v6179_v20  ;;  %v2646_v43 = vsel %vm2642_vm11, %v6154_v49, %v6148_v48  ;;  %v2364_v20 = vsel %vm2358_vm12, %v6169_v23, %v6163_v58 }
 0x683   : > { %2763 = vrot.lane.b32.xlu1 %v2362_v38, %s4361_s26  ;;  %2795 = vrot.lane.b32.xlu0 %v2419_v36, %s4361_s26  ;;  %v2422_v49 = vsel %vm758_vm7, %v6146_v17, %v6177_v60  ;;  %v2603_v38 = vsel %vm2597_vm13, %v6195_v51, %v6218_v18  ;;  %v2318_v17 = vsel %vm562_vm3, %v6171_v56, %v6185_v7  ;;  %v4305_v60 = vunpack.i.l.bf16 %v5965_v13 }
 0x685   : > { %v6481_v54 = vpop.permute.xlu0 %2499  ;;  %v6483_v46 = vpop.permute.xlu1 %2501  ;;  %v2317_v51 = vsel %vm562_vm3, %v4305_v60, %v6171_v56  ;;  %v2511_v60 = vsel %vm2507_vm15, %v6208_v25, %v6226_v26 }
 0x687   : > { %2735 = vrot.lane.b32.xlu1 %v2319_v37, %s4361_s26  ;;  %2957 = vrot.lane.b32.xlu0 %v2646_v43, %s4361_s26  ;;  %v2557_v43 = vsel %vm2552_vm14, %v6200_v19, %v6210_v16 }
 0x689   : > { %v6493_v14 = vpop.permute.xlu0 %2503  ;;  %v6495_v59 = vpop.permute.xlu1 %2550 }
 0x68b   : > { %2927 = vrot.lane.b32.xlu1 %v2602_v28, %s4361_s26  ;;  %2767 = vrot.lane.b32.xlu0 %v2364_v20, %s4361_s26  ;;  %v2512_v28 = vsel %vm2507_vm15, %v6226_v26, %v6216_v22  ;;  %v2601_v20 = vsel %vm2597_vm13, %v6187_v24, %v6193_v12 }
 0x68d   : > { %v6505_v37 = vpop.permute.xlu0 %2455  ;;  %v6507_v48 = vpop.permute.xlu1 %2457 }
 0x68f   : > { %2895 = vrot.lane.b32.xlu1 %v2557_v43, %s4361_s26  ;;  %2801 = vrot.lane.b32.xlu0 %v2422_v49, %s4361_s26  ;;  %v2417_v43 = vsel %vm758_vm7, %v6264_v55, %v6277_v11 }
 0x691   : > { %v6517_v58 = vpop.permute.xlu0 %2459  ;;  %v6519_v23 = vpop.permute.xlu1 %2505 }
 0x693   : > { %2929 = vrot.lane.b32.xlu1 %v2603_v38, %s4361_s26  ;;  %2733 = vrot.lane.b32.xlu0 %v2318_v17, %s4361_s26  ;;  %v2556_v38 = vsel %vm2552_vm14, %v6202_v21, %v6200_v19  ;;  %v2643_v17 = vsel %vm2642_vm11, %v6284_v2, %v6272_v6 }
 0x695   : > { %v6530_v30 = vpop.permute.xlu0 %2461  ;;  %v6532_v36 = vpop.permute.xlu1 %2719 }
 0x696   : > { %7976 = vst [vmem:[#allocation44_spill] sm:$0xff] %v6532_v36  ;;  %v7988_v36 = vld [vmem:[#allocation13_spill] sm:$0xff] }
 0x697   : > { %2863 = vrot.lane.b32.xlu1 %v2512_v28, %s4361_s26  ;;  %2731 = vrot.lane.b32.xlu0 %v2317_v51, %s4361_s26  ;;  %v2360_v28 = vsel %vm2358_vm12, %v6299_v27, %v6279_v63  ;;  %v4296_v51 = vunpack.i.h.bf16 %v5963_v33  ;;  %v2418_v33 = vsel %vm758_vm7, %v6277_v11, %v6286_v31  ;;  %v2599_v31 = vsel %vm2597_vm13, %v6301_v39, %v6338_v62 }
 0x699   : > { %v6541_v7 = vpop.permute.xlu0 %2640  ;;  %v6543_v18 = vpop.permute.xlu1 %2397 }
 0x69b   : > { %2915 = vrot.lane.b32.xlu1 %v6331_v45, %s4361_s26  ;;  %2925 = vrot.lane.b32.xlu0 %v2601_v20, %s4361_s26  ;;  %v2359_v20 = vsel %vm2358_vm12, %v4296_v51, %v6299_v27  ;;  %v2554_v51 = vsel %vm2552_vm14, %v6309_v35, %v6354_v9 }
 0x69d   : > { %v6551_v49 = vpop.permute.xlu0 %2717  ;;  %v6553_v56 = vpop.permute.xlu1 %2401 }
 0x69e   : > { %7977 = vst [vmem:[#allocation45_spill] sm:$0xff] %v6551_v49 }
 0x69f   : > { %2791 = vrot.lane.b32.xlu1 %v2417_v43, %s4361_s26  ;;  %2893 = vrot.lane.b32.xlu0 %v2556_v38, %s4361_s26 }
 0x6a1   : > { %v6563_v24 = vpop.permute.xlu0 %2721  ;;  %v6565_v12 = vpop.permute.xlu1 %2626 }
 0x6a2   : > { %7978 = vst [vmem:[#allocation46_spill] sm:$0xff] %v6563_v24  ;;  %v2600_v24 = vsel %vm2597_vm13, %v6338_v62, %v6317_v61  ;;  %v2361_v61 = vsel %vm2358_vm12, %v6279_v63, %v6307_v3  ;;  %v4306_v63 = vunpack.i.h.bf16 %v5965_v13  ;;  %v2598_v13 = vsel %vm2597_vm13, %v6331_v45, %v6301_v39 }
 0x6a3   : > { %2949 = vrot.lane.b32.xlu1 %v2643_v17, %s4361_s26  ;;  %2861 = vrot.lane.b32.xlu0 %v2511_v60, %s4361_s26  ;;  %v2316_v17 = vsel %vm562_vm3, %v6293_v34, %v6323_v44  ;;  %v2429_v39 = vsel %vm758_vm7, %v6406_v1, %v6386_v47 }
 0x6a5   : > { %v6575_v19 = vpop.permute.xlu0 %2399  ;;  %v6577_v21 = vpop.permute.xlu1 %2630 }
 0x6a7   : > { %2757 = vrot.lane.b32.xlu1 %v2360_v28, %s4361_s26  ;;  %2947 = vrot.lane.b32.xlu0 %v6284_v2, %s4361_s26 }
 0x6a9   : > { %v6586_v25 = vpop.permute.xlu0 %2628  ;;  %v6588_v26 = vpop.permute.xlu1 %2344 }
 0x6ab   : > { %2755 = vrot.lane.b32.xlu1 %v2359_v20, %s4361_s26  ;;  %2761 = vrot.lane.b32.xlu0 %v6307_v3, %s4361_s26  ;;  %v2416_v20 = vsel %vm758_vm7, %v6270_v50, %v6264_v55 }
 0x6ad   : > { %v6595_v43 = vpop.permute.xlu0 %2346  ;;  %v6597_v38 = vpop.permute.xlu1 %2348 }
 0x6af   : > { %2793 = vrot.lane.b32.xlu1 %v2418_v33, %s4361_s26  ;;  %2729 = vrot.lane.b32.xlu0 %v6323_v44, %s4361_s26  ;;  %v4286_v33 = vunpack.i.h.bf16 %v5959_v15  ;;  %v2509_v15 = vsel %vm2507_vm15, %v6325_v41, %v6369_v53 }
 0x6b1   : > { %v6605_v2 = vpop.permute.xlu0 %2403  ;;  %v6607_v27 = vpop.permute.xlu1 %2300  ;;  %v2415_v49 = vsel %vm758_vm7, %v4286_v33, %v6270_v50 }
 0x6b3   : > { %2727 = vrot.lane.b32.xlu1 %v2316_v17, %s4361_s26  ;;  %2883 = vrot.lane.b32.xlu0 %v6346_v8, %s4361_s26 }
 0x6b5   : > { %v6615_v60 = vpop.permute.xlu0 %2302  ;;  %v6617_v11 = vpop.permute.xlu1 %2304 }
 0x6b7   : > { %2919 = vrot.lane.b32.xlu1 %v2599_v31, %s4361_s26  ;;  %2851 = vrot.lane.b32.xlu0 %v6362_v5, %s4361_s26 }
 0x6b9   : > { %v6625_v28 = vpop.permute.xlu0 %2581  ;;  %v6627_v44 = vpop.permute.xlu1 %2583 }
 0x6bb   : > { %2887 = vrot.lane.b32.xlu1 %v2554_v51, %s4361_s26  ;;  %2789 = vrot.lane.b32.xlu0 %v2416_v20, %s4361_s26  ;;  %v2644_v20 = vsel %vm2642_vm11, %v6272_v6, %v6291_v29 }
 0x6bd   : > { %v6638_v17 = vpop.permute.xlu0 %2585  ;;  %v6640_v31 = vpop.permute.xlu1 %2538 }
 0x6bf   : > { %2921 = vrot.lane.b32.xlu1 %v2600_v24, %s4361_s26  ;;  %2787 = vrot.lane.b32.xlu0 %v2415_v49, %s4361_s26  ;;  %v2315_v24 = vsel %vm562_vm3, %v6315_v40, %v6293_v34 }
 0x6c1   : > { %v6649_v55 = vpop.permute.xlu0 %2536  ;;  %v6651_v51 = vpop.permute.xlu1 %2587 }
 0x6c3   : > { %2855 = vrot.lane.b32.xlu1 %v2509_v15, %s4361_s26  ;;  %2951 = vrot.lane.b32.xlu0 %v2644_v20, %s4361_s26  ;;  %v2314_v15 = vsel %vm562_vm3, %v4306_v63, %v6315_v40 }
 0x6c5   : > { %v6661_v62 = vpop.permute.xlu0 %2540  ;;  %v6663_v50 = vpop.permute.xlu1 %2493 }
 0x6c7   : > { %2971 = vrot.lane.b32.xlu1 %v6394_v0, %s4361_s26  ;;  %2759 = vrot.lane.b32.xlu0 %v2361_v61, %s4361_s26 }
 0x6c9   : > { %v6671_v49 = vpop.permute.xlu0 %2491  ;;  %v6673_v6 = vpop.permute.xlu1 %2542 }
 0x6cb   : > { %2785 = vrot.lane.b32.xlu1 %v6429_v52, %s4361_s26  ;;  %2725 = vrot.lane.b32.xlu0 %v2315_v24, %s4361_s26  ;;  %v2553_v24 = vsel %vm2552_vm14, %v6346_v8, %v6309_v35  ;;  %v4280_v8 = vunpack.i.l.bf16 %v5957_v57 }
 0x6cd   : > { %v6682_v3 = vpop.permute.xlu0 %2495  ;;  %v6684_v33 = vpop.permute.xlu1 %2449 }
 0x6cf   : > { %2753 = vrot.lane.b32.xlu1 %v6447_v4, %s4361_s26  ;;  %2723 = vrot.lane.b32.xlu0 %v2314_v15, %s4361_s26  ;;  %v2508_v15 = vsel %vm2507_vm15, %v6362_v5, %v6325_v41  ;;  %v7984_v5 = vld [vmem:[#allocation15_spill] sm:$0xff] }
 0x6d1   : > { %v6691_v34 = vpop.permute.xlu0 %2447  ;;  %v6693_v20 = vpop.permute.xlu1 %2497 }
 0x6d3   : > { %2939 = vrot.lane.b32.xlu1 %v6431_v10, %s4361_s26  ;;  %2917 = vrot.lane.b32.xlu0 %v2598_v13, %s4361_s26 }
 0x6d5   : > { %v6701_v61 = vpop.permute.xlu0 %2451  ;;  %v6703_v40 = vpop.permute.xlu1 %2453 }
 0x6d7   : > { %2907 = vrot.lane.b32.xlu1 %v6449_v32, %s4361_s26  ;;  %2885 = vrot.lane.b32.xlu0 %v2553_v24, %s4361_s26  ;;  %v2427_v24 = vsel %vm758_vm7, %v4280_v8, %v6379_v42 }
 0x6d9   : > { %v6711_v63 = vpop.permute.xlu0 %2632  ;;  %v6713_v45 = vpop.permute.xlu1 %2711 }
 0x6da   : > { %7979 = vst [vmem:[#allocation47_spill] sm:$0xff] %v6713_v45 }
 0x6db   : > { %2815 = vrot.lane.b32.xlu1 %v2429_v39, %s4361_s26  ;;  %2853 = vrot.lane.b32.xlu0 %v2508_v15, %s4361_s26  ;;  %v7985_v39 = vld [vmem:[#allocation14_spill] sm:$0xff] }
 0x6dc   : > { %v2653_v15 = vsel %vm2642_vm11, %v7985_v39, %v7984_v5 }
 0x6dd   : > { %v6724_v35 = vpop.permute.xlu0 %2709  ;;  %v6726_v13 = vpop.permute.xlu1 %2955 }
 0x6de   : > { %7980 = vst [vmem:[#allocation48_spill] sm:$0xff] %v6724_v35  ;;  %7981 = vst [vmem:[#allocation49_spill] sm:$0xff] %v6726_v13  ;;  %v2428_v35 = vsel %vm758_vm7, %v6379_v42, %v6406_v1  ;;  %v2652_v13 = vsel %vm2642_vm11, %v6394_v0, %v7985_v39  ;;  %v7990_v1 = vld [vmem:[#allocation5_spill] sm:$0xff] }
 0x6df   : > { %2811 = vrot.lane.b32.xlu1 %v2427_v24, %s4361_s26  ;;  %2875 = vrot.lane.b32.xlu0 %v6481_v54, %s4361_s26  ;;  %v4290_v42 = vunpack.i.l.bf16 %v7990_v1 }
 0x6e1   : > { %v6733_v45 = vpop.permute.xlu0 %2713  ;;  %v6735_v41 = vpop.permute.xlu1 %2923 }
 0x6e2   : > { %7982 = vst [vmem:[#allocation50_spill] sm:$0xff] %v6733_v45  ;;  %7983 = vst [vmem:[#allocation51_spill] sm:$0xff] %v6735_v41  ;;  %v7989_v45 = vld [vmem:[#allocation18_spill] sm:$0xff] }
 0x6e3   : > { %2975 = vrot.lane.b32.xlu1 %v2653_v15, %s4361_s26  ;;  %2813 = vrot.lane.b32.xlu0 %v2428_v35, %s4361_s26  ;;  %v2369_v41 = vsel %vm2358_vm12, %v7989_v45, %v7988_v36 }
 0x6e5   : > { %v6745_v8 = vpop.permute.xlu0 %2769  ;;  %v6747_v24 = vpop.permute.xlu1 %2891 }
 0x6e6   : > { %7986 = vst [vmem:[#allocation15_spill] sm:$0xff] %v6745_v8  ;;  %7987 = vst [vmem:[#allocation14_spill] sm:$0xff] %v6747_v24  ;;  %v2368_v24 = vsel %vm2358_vm12, %v4290_v42, %v7989_v45  ;;  %v2370_v8 = vsel %vm2358_vm12, %v7988_v36, %v6429_v52  ;;  %v7998_v52 = vld [vmem:[#allocation11_spill] sm:$0xff] }
 0x6e7   : > { %2781 = vrot.lane.b32.xlu1 %v2369_v41, %s4361_s26  ;;  %2973 = vrot.lane.b32.xlu0 %v2652_v13, %s4361_s26  ;;  %v7995_v41 = vld [vmem:[#allocation16_spill] sm:$0xff]  ;;  %v4300_v36 = vunpack.i.l.bf16 %v7998_v52 }
 0x6e8   : > { %v2430_v39 = vsel %vm758_vm7, %v6386_v47, %v7995_v41 }
 0x6e9   : > { %v6758_v15 = vpop.permute.xlu0 %2737  ;;  %v6760_v35 = vpop.permute.xlu1 %2799 }
 0x6ea   : > { %7991 = vst [vmem:[#allocation13_spill] sm:$0xff] %v6758_v15  ;;  %7992 = vst [vmem:[#allocation18_spill] sm:$0xff] %v6760_v35  ;;  %v7996_v15 = vld [vmem:[#allocation37_spill] sm:$0xff]  ;;  %v7997_v35 = vld [vmem:[#allocation38_spill] sm:$0xff] }
 0x6eb   : > { %2779 = vrot.lane.b32.xlu1 %v2368_v24, %s4361_s26  ;;  %2783 = vrot.lane.b32.xlu0 %v2370_v8, %s4361_s26  ;;  %v2324_v45 = vsel %vm562_vm3, %v7997_v35, %v7996_v15  ;;  %v2323_v42 = vsel %vm562_vm3, %v4300_v36, %v7997_v35  ;;  %v2325_v47 = vsel %vm562_vm3, %v7996_v15, %v6447_v4  ;;  %v8003_v36 = vld [vmem:[#allocation41_spill] sm:$0xff] }
 0x6ed   : > { %v6769_v0 = vpop.permute.xlu0 %2859  ;;  %v6771_v13 = vpop.permute.xlu1 %2959 }
 0x6ee   : > { %7993 = vst [vmem:[#allocation5_spill] sm:$0xff] %v6769_v0  ;;  %7994 = vst [vmem:[#allocation52_spill] sm:$0xff] %v6771_v13  ;;  %v8001_v0 = vld [vmem:[#allocation40_spill] sm:$0xff] }
 0x6ef   : > { %2749 = vrot.lane.b32.xlu1 %v2324_v45, %s4361_s26  ;;  %2817 = vrot.lane.b32.xlu0 %v2430_v39, %s4361_s26  ;;  %v8000_v45 = vld [vmem:[#allocation39_spill] sm:$0xff]  ;;  %v2607_v35 = vsel %vm2597_vm13, %v6431_v10, %v8001_v0 }
 0x6f0   : > { %v2608_v13 = vsel %vm2597_vm13, %v8001_v0, %v8000_v45 }
 0x6f1   : > { %v6782_v24 = vpop.permute.xlu0 %2797  ;;  %v6784_v8 = vpop.permute.xlu1 %2765 }
 0x6f3   : > { %2747 = vrot.lane.b32.xlu1 %v2323_v42, %s4361_s26  ;;  %2751 = vrot.lane.b32.xlu0 %v2325_v47, %s4361_s26  ;;  %v8004_v42 = vld [vmem:[#allocation42_spill] sm:$0xff] }
 0x6f4   : > { %v2563_v47 = vsel %vm2552_vm14, %v8004_v42, %v8003_v36 }
 0x6f5   : > { %v6793_v41 = vpop.permute.xlu1 %2763  ;;  %v6795_v39 = vpop.permute.xlu0 %2795 }
 0x6f6   : > { %7999 = vst [vmem:[#allocation16_spill] sm:$0xff] %v6793_v41  ;;  %v2562_v41 = vsel %vm2552_vm14, %v6449_v32, %v8004_v42 }
 0x6f7   : > { %2943 = vrot.lane.b32.xlu1 %v2608_v13, %s4361_s26  ;;  %2941 = vrot.lane.b32.xlu0 %v2607_v35, %s4361_s26  ;;  %v8005_v13 = vld [vmem:[#allocation43_spill] sm:$0xff] }
 0x6f8   : > { %v2609_v35 = vsel %vm2597_vm13, %v8000_v45, %v8005_v13  ;;  %v2472_v45 = vsel %vm848_vm2, %v6505_v37, %v6507_v48 }
 0x6f9   : > { %v6805_v4 = vpop.permute.xlu1 %2735  ;;  %v6807_v15 = vpop.permute.xlu0 %2957 }
 0x6fa   : > { %8002 = vst [vmem:[#allocation37_spill] sm:$0xff] %v6805_v4  ;;  %v2517_v4 = vsel %vm2507_vm15, %v6481_v54, %v6483_v46 }
 0x6fb   : > { %2911 = vrot.lane.b32.xlu1 %v2563_v47, %s4361_s26  ;;  %2909 = vrot.lane.b32.xlu0 %v2562_v41, %s4361_s26  ;;  %v2518_v41 = vsel %vm2507_vm15, %v6483_v46, %v6493_v14 }
 0x6fd   : > { %v6817_v10 = vpop.permute.xlu1 %2927  ;;  %v6819_v0 = vpop.permute.xlu0 %2767 }
 0x6ff   : > { %2945 = vrot.lane.b32.xlu1 %v2609_v35, %s4361_s26  ;;  %2877 = vrot.lane.b32.xlu0 %v2517_v4, %s4361_s26  ;;  %v2564_v4 = vsel %vm2552_vm14, %v8003_v36, %v6495_v59  ;;  %v2473_v35 = vsel %vm848_vm2, %v6507_v48, %v6517_v58  ;;  %v2425_v48 = vsel %vm758_vm7, %v6575_v19, %v6553_v56 }
 0x701   : > { %v6829_v32 = vpop.permute.xlu1 %2895  ;;  %v6831_v42 = vpop.permute.xlu0 %2801 }
 0x702   : > { %8006 = vst [vmem:[#allocation38_spill] sm:$0xff] %v6829_v32 }
 0x703   : > { %2879 = vrot.lane.b32.xlu1 %v2518_v41, %s4361_s26  ;;  %2845 = vrot.lane.b32.xlu0 %v2472_v45, %s4361_s26 }
 0x705   : > { %v6841_v54 = vpop.permute.xlu1 %2929  ;;  %v6843_v47 = vpop.permute.xlu0 %2733 }
 0x706   : > { %8007 = vst [vmem:[#allocation11_spill] sm:$0xff] %v6841_v54 }
 0x707   : > { %2913 = vrot.lane.b32.xlu1 %v2564_v4, %s4361_s26  ;;  %2963 = vrot.lane.b32.xlu0 %v6565_v12, %s4361_s26  ;;  %v4281_v4 = vunpack.i.h.bf16 %v5957_v57  ;;  %v2424_v57 = vsel %vm758_vm7, %v6543_v18, %v6575_v19  ;;  %v4291_v19 = vunpack.i.h.bf16 %v7990_v1  ;;  %v2426_v1 = vsel %vm758_vm7, %v6553_v56, %v6605_v2 }
 0x708   : > { %v2322_v56 = vsel %vm562_vm3, %v6615_v60, %v6617_v11  ;;  %v4301_v2 = vunpack.i.h.bf16 %v7998_v52 }
 0x709   : > { %v6851_v46 = vpop.permute.xlu1 %2863  ;;  %v6853_v13 = vpop.permute.xlu0 %2731  ;;  %v2423_v54 = vsel %vm758_vm7, %v4281_v4, %v6543_v18  ;;  %v2366_v18 = vsel %vm2358_vm12, %v6588_v26, %v6595_v43 }
 0x70a   : > { %8008 = vst [vmem:[#allocation39_spill] sm:$0xff] %v6851_v46 }
 0x70b   : > { %2847 = vrot.lane.b32.xlu1 %v2473_v35, %s4361_s26  ;;  %2745 = vrot.lane.b32.xlu0 %v6617_v11, %s4361_s26  ;;  %v8017_v11 = vld [vmem:[#allocation23_spill] sm:$0xff] }
 0x70d   : > { %v6861_v41 = vpop.permute.xlu1 %2915  ;;  %v6863_v59 = vpop.permute.xlu0 %2925 }
 0x70e   : > { %8009 = vst [vmem:[#allocation40_spill] sm:$0xff] %v6861_v41  ;;  %v2367_v41 = vsel %vm2358_vm12, %v6595_v43, %v6597_v38 }
 0x70f   : > { %2777 = vrot.lane.b32.xlu1 %v6597_v38, %s4361_s26  ;;  %2867 = vrot.lane.b32.xlu0 %v6671_v49, %s4361_s26  ;;  %v8014_v38 = vld [vmem:[#allocation24_spill] sm:$0xff] }
 0x711   : > { %v6869_v36 = vpop.permute.xlu1 %2791  ;;  %v6871_v45 = vpop.permute.xlu0 %2893 }
 0x712   : > { %8010 = vst [vmem:[#allocation41_spill] sm:$0xff] %v6871_v45 }
 0x713   : > { %2931 = vrot.lane.b32.xlu1 %v6625_v28, %s4361_s26  ;;  %2807 = vrot.lane.b32.xlu0 %v2425_v48, %s4361_s26  ;;  %v2650_v48 = vsel %vm2642_vm11, %v6586_v25, %v6577_v21 }
 0x715   : > { %v6880_v35 = vpop.permute.xlu1 %2949  ;;  %v6882_v46 = vpop.permute.xlu0 %2861 }
 0x716   : > { %8011 = vst [vmem:[#allocation42_spill] sm:$0xff] %v6882_v46 }
 0x717   : > { %2899 = vrot.lane.b32.xlu1 %v6649_v55, %s4361_s26  ;;  %2803 = vrot.lane.b32.xlu0 %v2423_v54, %s4361_s26  ;;  %v2649_v54 = vsel %vm2642_vm11, %v6565_v12, %v6586_v25  ;;  %v2365_v12 = vsel %vm2358_vm12, %v4291_v19, %v6588_v26 }
 0x719   : > { %v6889_v45 = vpop.permute.xlu1 %2757  ;;  %v6891_v32 = vpop.permute.xlu0 %2947 }
 0x71b   : > { %2805 = vrot.lane.b32.xlu1 %v2424_v57, %s4361_s26  ;;  %2967 = vrot.lane.b32.xlu0 %v2650_v48, %s4361_s26 }
 0x71d   : > { %v6901_v4 = vpop.permute.xlu1 %2755  ;;  %v6903_v46 = vpop.permute.xlu0 %2761 }
 0x71f   : > { %2965 = vrot.lane.b32.xlu1 %v2649_v54, %s4361_s26  ;;  %2773 = vrot.lane.b32.xlu0 %v2366_v18, %s4361_s26  ;;  %v2321_v18 = vsel %vm562_vm3, %v6607_v27, %v6615_v60 }
 0x721   : > { %v6914_v57 = vpop.permute.xlu1 %2793  ;;  %v6916_v48 = vpop.permute.xlu0 %2729 }
 0x723   : > { %2775 = vrot.lane.b32.xlu1 %v2367_v41, %s4361_s26  ;;  %2771 = vrot.lane.b32.xlu0 %v2365_v12, %s4361_s26  ;;  %v2558_v41 = vsel %vm2552_vm14, %v6210_v16, %v8014_v38 }
 0x725   : > { %v6925_v25 = vpop.permute.xlu1 %2727  ;;  %v6927_v54 = vpop.permute.xlu0 %2883 }
 0x726   : > { %8012 = vst [vmem:[#allocation43_spill] sm:$0xff] %v6927_v54  ;;  %v8024_v54 = vld [vmem:[#allocation29_spill] sm:$0xff] }
 0x727   : > { %2741 = vrot.lane.b32.xlu1 %v2321_v18, %s4361_s26  ;;  %2809 = vrot.lane.b32.xlu0 %v2426_v1, %s4361_s26  ;;  %v2320_v1 = vsel %vm562_vm3, %v4301_v2, %v6607_v27  ;;  %v8018_v18 = vld [vmem:[#allocation3_spill] sm:$0xff] }
 0x728   : > { %v2467_v52 = vsel %vm848_vm2, %v8018_v18, %v8017_v11 }
 0x729   : > { %v6937_v26 = vpop.permute.xlu1 %2919  ;;  %v6939_v43 = vpop.permute.xlu0 %2851 }
 0x72a   : > { %8013 = vst [vmem:[#allocation53_spill] sm:$0xff] %v6939_v43  ;;  %v2605_v43 = vsel %vm2597_vm13, %v6627_v44, %v6638_v17 }
 0x72b   : > { %2897 = vrot.lane.b32.xlu1 %v2558_v41, %s4361_s26  ;;  %2743 = vrot.lane.b32.xlu0 %v2322_v56, %s4361_s26  ;;  %v8020_v41 = vld [vmem:[#allocation34_spill] sm:$0xff] }
 0x72c   : > { %v8021_v56 = vld [vmem:[#allocation22_spill] sm:$0xff] }
 0x72d   : > { %v6950_v19 = vpop.permute.xlu1 %2887  ;;  %v6952_v12 = vpop.permute.xlu0 %2789  ;;  %v2466_v2 = vsel %vm848_vm2, %v8021_v56, %v8018_v18 }
 0x72e   : > { %8015 = vst [vmem:[#allocation24_spill] sm:$0xff] %v6950_v19 }
 0x72f   : > { %2739 = vrot.lane.b32.xlu1 %v2320_v1, %s4361_s26  ;;  %2843 = vrot.lane.b32.xlu0 %v6505_v37, %s4361_s26  ;;  %v2555_v37 = vsel %vm2552_vm14, %v6354_v9, %v8020_v41  ;;  %v8022_v41 = vld [vmem:[#allocation30_spill] sm:$0xff] }
 0x731   : > { %v6959_v16 = vpop.permute.xlu1 %2921  ;;  %v6961_v60 = vpop.permute.xlu0 %2787 }
 0x732   : > { %8016 = vst [vmem:[#allocation54_spill] sm:$0xff] %v6959_v16 }
 0x733   : > { %2831 = vrot.lane.b32.xlu1 %v2467_v52, %s4361_s26  ;;  %2835 = vrot.lane.b32.xlu0 %v6691_v34, %s4361_s26 }
 0x735   : > { %v6969_v38 = vpop.permute.xlu1 %2855  ;;  %v6971_v27 = vpop.permute.xlu0 %2951 }
 0x736   : > { %8019 = vst [vmem:[#allocation23_spill] sm:$0xff] %v6969_v38  ;;  %v2604_v38 = vsel %vm2597_vm13, %v6625_v28, %v6627_v44  ;;  %v2560_v44 = vsel %vm2552_vm14, %v6640_v31, %v6661_v62 }
 0x737   : > { %2889 = vrot.lane.b32.xlu1 %v2555_v37, %s4361_s26  ;;  %2829 = vrot.lane.b32.xlu0 %v2466_v2, %s4361_s26  ;;  %v8023_v37 = vld [vmem:[#allocation36_spill] sm:$0xff] }
 0x738   : > { %v2464_v2 = vsel %vm848_vm2, %v8023_v37, %v8022_v41  ;;  %v2463_v19 = vsel %vm848_vm2, %v8024_v54, %v8023_v37 }
 0x739   : > { %v2972_v1 = vpop.permute.xlu1 %2971  ;;  %v6981_v52 = vpop.permute.xlu0 %2759 }
 0x73b   : > { %2935 = vrot.lane.b32.xlu1 %v2605_v43, %s4361_s26  ;;  %2933 = vrot.lane.b32.xlu0 %v2604_v38, %s4361_s26  ;;  %v2559_v43 = vsel %vm2552_vm14, %v6649_v55, %v6640_v31 }
 0x73d   : > { %v6991_v9 = vpop.permute.xlu1 %2785  ;;  %v6993_v18 = vpop.permute.xlu0 %2725 }
 0x73f   : > { %2823 = vrot.lane.b32.xlu1 %v2464_v2, %s4361_s26  ;;  %2827 = vrot.lane.b32.xlu0 %v8021_v56, %s4361_s26  ;;  %v2606_v56 = vsel %vm2597_vm13, %v6638_v17, %v6651_v51  ;;  %v2514_v17 = vsel %vm2507_vm15, %v6671_v49, %v6663_v50 }
 0x741   : > { %v7001_v16 = vpop.permute.xlu1 %2753  ;;  %v7003_v28 = vpop.permute.xlu0 %2723 }
 0x743   : > { %2903 = vrot.lane.b32.xlu1 %v2560_v44, %s4361_s26  ;;  %2901 = vrot.lane.b32.xlu0 %v2559_v43, %s4361_s26  ;;  %v2519_v44 = vsel %vm2507_vm15, %v6493_v14, %v6519_v23  ;;  %v7050_v14 = vld [vmem:[%s7758_s5 + $0x8] sm:$0xff]  ;;  %v2561_v43 = vsel %vm2552_vm14, %v6661_v62, %v6673_v6 }
 0x744   : > { %8026 = vst [vmem:[#allocation34_spill] sm:$0xff] %v7050_v14  ;;  %3308 = vmatprep.mubr.f32.mxu1 %v7050_v14 }
 0x745   : > { %v7013_v38 = vpop.permute.xlu1 %2939  ;;  %v7015_v2 = vpop.permute.xlu0 %2917 }
 0x747   : > { %2937 = vrot.lane.b32.xlu1 %v2606_v56, %s4361_s26  ;;  %2821 = vrot.lane.b32.xlu0 %v2463_v19, %s4361_s26  ;;  %v2515_v19 = vsel %vm2507_vm15, %v6663_v50, %v6682_v3  ;;  %v2469_v50 = vsel %vm848_vm2, %v6691_v34, %v6684_v33 }
 0x749   : > { %v7025_v31 = vpop.permute.xlu1 %2907  ;;  %v7027_v55 = vpop.permute.xlu0 %2885 }
 0x74b   : > { %2881 = vrot.lane.b32.xlu1 %v2519_v44, %s4361_s26  ;;  %2869 = vrot.lane.b32.xlu0 %v2514_v17, %s4361_s26  ;;  %v2470_v17 = vsel %vm848_vm2, %v6684_v33, %v6701_v61 }
 0x74d   : > { %v7037_v51 = vpop.permute.xlu1 %2815  ;;  %v7039_v37 = vpop.permute.xlu0 %2853 }
 0x74e   : > { %8025 = vst [vmem:[#allocation3_spill] sm:$0xff] %v7039_v37  ;;  %v3019_v37 = vsel %vm2979_vm1, %v6795_v39, %v6782_v24  ;;  %v8041_v39 = vld [vmem:[#allocation52_spill] sm:$0xff] }
 0x74f   : > { %2871 = vrot.lane.b32.xlu1 %v2515_v19, %s4361_s26  ;;  %2819 = vrot.lane.b32.xlu0 %v8024_v54, %s4361_s26  ;;  %v8028_v19 = vld [vmem:[#allocation32_spill] sm:$0xff] }
 0x750   : > { %v2510_v62 = vsel %vm2507_vm15, %v6369_v53, %v8028_v19  ;;  %v2516_v53 = vsel %vm2507_vm15, %v6682_v3, %v6693_v20  ;;  %v2474_v3 = vsel %vm848_vm2, %v6517_v58, %v6530_v30 }
 0x751   : > { %v2812_v23 = vpop.permute.xlu1 %2811  ;;  %v7052_v49 = vpop.permute.xlu0 %2875 }
 0x753   : > { %2905 = vrot.lane.b32.xlu1 %v2561_v43, %s4361_s26  ;;  %2837 = vrot.lane.b32.xlu0 %v2469_v50, %s4361_s26  ;;  %v8029_v43 = vld [vmem:[#allocation25_spill] sm:$0xff] }
 0x754   : > { %v2513_v33 = vsel %vm2507_vm15, %v6216_v22, %v8029_v43  ;;  %v8030_v22 = vld [vmem:[#allocation9_spill] sm:$0xff] }
 0x755   : > { %v7063_v54 = vpop.permute.xlu1 %2975  ;;  %v2814_v56 = vpop.permute.xlu0 %2813  ;;  %v2468_v19 = vsel %vm848_vm2, %v8017_v11, %v8030_v22  ;;  %v2471_v11 = vsel %vm848_vm2, %v6701_v61, %v6703_v40  ;;  %v8033_v43 = vld [vmem:[#allocation21_spill] sm:$0xff] }
 0x756   : > { %8027 = vst [vmem:[#allocation22_spill] sm:$0xff] %v7063_v54  ;;  %v3025_v44 = vsel %vm2979_vm1, %v2812_v23, %v2814_v56  ;;  %v3026_v6 = vsel %vm2979_vm1, %v2814_v56, %v7037_v51 }
 0x757   : > { %2839 = vrot.lane.b32.xlu1 %v2470_v17, %s4361_s26  ;;  %2857 = vrot.lane.b32.xlu0 %v2510_v62, %s4361_s26  ;;  %v2654_v62 = vsel %vm2642_vm11, %v7984_v5, %v6541_v7  ;;  %v2651_v7 = vsel %vm2642_vm11, %v6577_v21, %v6711_v63  ;;  %v8032_v5 = vld [vmem:[#allocation26_spill] sm:$0xff] }
 0x758   : > { %3244 = vmatprep.subr.mxu1 %v3026_v6  ;;  %v8031_v6 = vld [vmem:[#allocation31_spill] sm:$0xff]  ;;  %v2670_v63 = vld [vmem:[%s7759_s6 + $0x18] sm:$0xff] }
 0x759   : > { %3245 = vmatpush1.msra.mxu1 %v3025_v44  ;;  %v7076_v34 = vpop.permute.xlu1 %2781  ;;  %v2974_v23 = vpop.permute.xlu0 %2973 }
 0x75a   : > { %v3085_v50 = vsel %vm2979_vm1, %v2972_v1, %v2974_v23  ;;  %v3086_v56 = vsel %vm2979_vm1, %v2974_v23, %v7063_v54  ;;  %v2465_v23 = vsel %vm848_vm2, %v8022_v41, %v8031_v6 }
 0x75b   : > { %2865 = vrot.lane.b32.xlu1 %v2513_v33, %s4361_s26  ;;  %2873 = vrot.lane.b32.xlu0 %v2516_v53, %s4361_s26  ;;  %v2648_v33 = vsel %vm2642_vm11, %v8033_v43, %v8032_v5  ;;  %v8034_v53 = vld [vmem:[#allocation35_spill] sm:$0xff] }
 0x75c   : > { %3357 = vmatprep.subr.mxu0 %v3086_v56 }
 0x75d   : > { %3358 = vmatpush1.msra.mxu0 %v3085_v50  ;;  %v7089_v44 = vpop.permute.xlu1 %2779  ;;  %v7091_v17 = vpop.permute.xlu0 %2783  ;;  %v2645_v50 = vsel %vm2642_vm11, %v6291_v29, %v8034_v53  ;;  %v2669_v29 = vld [vmem:[%s7759_s6 + $0x10] sm:$0xff] }
 0x75f   : > { %2849 = vrot.lane.b32.xlu1 %v2474_v3, %s4361_s26  ;;  %2833 = vrot.lane.b32.xlu0 %v2468_v19, %s4361_s26  ;;  %v2668_v3 = vld [vmem:[%s7759_s6 + $0x8] sm:$0xff] }
 0x761   : > { %v7101_v20 = vpop.permute.xlu1 %2749  ;;  %v7103_v1 = vpop.permute.xlu0 %2817 }
 0x763   : > { %2977 = vrot.lane.b32.xlu1 %v2654_v62, %s4361_s26  ;;  %2841 = vrot.lane.b32.xlu0 %v2471_v11, %s4361_s26  ;;  %v2667_v62 = vld [vmem:[%s7759_s6] sm:$0xff] }
 0x765   : > { %v7113_v58 = vpop.permute.xlu1 %2747  ;;  %v7115_v30 = vpop.permute.xlu0 %2751 }
 0x767   : > { %2969 = vrot.lane.b32.xlu1 %v2651_v7, %s4361_s26  ;;  %2825 = vrot.lane.b32.xlu0 %v2465_v23, %s4361_s26 }
 0x769   : > { %v7125_v61 = vpop.permute.xlu1 %2943  ;;  %v2942_v40 = vpop.permute.xlu0 %2941 }
 0x76a   : > { %v7135_v41 = vsel %vm2979_vm1, %v7013_v38, %v2942_v40  ;;  %v7139_v21 = vsel %vm2979_vm1, %v2942_v40, %v7125_v61 }
 0x76b   : > { %2961 = vrot.lane.b32.xlu1 %v2648_v33, %s4361_s26  ;;  %2953 = vrot.lane.b32.xlu0 %v2645_v50, %s4361_s26 }
 0x76d   : > { %v7149_v56 = vpop.permute.xlu1 %2911  ;;  %v2910_v38 = vpop.permute.xlu0 %2909 }
 0x76e   : > { %8035 = vst [vmem:[#allocation30_spill] sm:$0xff] %v7149_v56  ;;  %v7153_v22 = vsel %vm2979_vm1, %v7025_v31, %v2910_v38  ;;  %v7157_v19 = vsel %vm2979_vm1, %v2910_v38, %v7149_v56 }
 0x76f   : > { %2688 = vperm.xlu1 %4276, %v2670_v63   ;;  %2683 = vperm.xlu0 %4275, %v2669_v29  }
 0x771   : > { %v7165_v11 = vpop.permute.xlu1 %2945  ;;  %v7167_v6 = vpop.permute.xlu0 %2877 }
 0x772   : > { %v7172_v31 = vsel %vm2979_vm1, %v7052_v49, %v7167_v6 }
 0x773   : > { %2678 = vperm.xlu1 %4276, %v2668_v3   ;;  %2673 = vperm.xlu0 %4275, %v2667_v62  }
 0x775   : > { %v7174_v23 = vpop.permute.xlu1 %2879  ;;  %v7176_v7 = vpop.permute.xlu0 %2845 }
 0x776   : > { %8036 = vst [vmem:[#allocation36_spill] sm:$0xff] %v7176_v7  ;;  %v8040_v7 = vld [vmem:[#allocation18_spill] sm:$0xff] }
 0x779   : > { %v7178_v40 = vpop.permute.xlu1 %2913  ;;  %v2964_v5 = vpop.permute.xlu0 %2963 }
 0x77a   : > { %8037 = vst [vmem:[#allocation29_spill] sm:$0xff] %v7178_v40 }
 0x77d   : > { %v7180_v43 = vpop.permute.xlu1 %2847  ;;  %v7182_v33 = vpop.permute.xlu0 %2745 }
 0x77e   : > { %8038 = vst [vmem:[#allocation32_spill] sm:$0xff] %v7180_v43  ;;  %v3020_v43 = vsel %vm2979_vm1, %v6782_v24, %v8040_v7  ;;  %v3014_v24 = vsel %vm2979_vm1, %v7076_v34, %v7091_v17 }
 0x781   : > { %v7184_v53 = vpop.permute.xlu1 %2777  ;;  %v7186_v50 = vpop.permute.xlu0 %2867 }
 0x782   : > { %8039 = vst [vmem:[#allocation25_spill] sm:$0xff] %v7186_v50 }
 0x785   : > { %v7188_v63 = vpop.permute.xlu1 %2931  ;;  %v2808_v49 = vpop.permute.xlu0 %2807 }
 0x789   : > { %v7190_v29 = vpop.permute.xlu1 %2899  ;;  %v2804_v38 = vpop.permute.xlu0 %2803 }
 0x78d   : > { %v2806_v3 = vpop.permute.xlu1 %2805  ;;  %v7192_v62 = vpop.permute.xlu0 %2967 }
 0x78e   : > { %v3022_v14 = vsel %vm2979_vm1, %v2804_v38, %v2806_v3  ;;  %v3023_v54 = vsel %vm2979_vm1, %v2806_v3, %v2808_v49  ;;  %v3017_v38 = vsel %vm2979_vm1, %v6952_v12, %v6869_v36 }
 0x78f   : > { %3246 = vmatprep.subr.mxu1 %v3023_v54  ;;  %v3016_v54 = vsel %vm2979_vm1, %v6961_v60, %v6952_v12  ;;  %v8042_v60 = vld [vmem:[#allocation49_spill] sm:$0xff] }
 0x790   : > { %3247 = vmatpush1.msra.mxu1 %v3022_v14 }
 0x791   : > { %v2966_v50 = vpop.permute.xlu1 %2965  ;;  %3248 = vmatprep.subr.mxu1 %v3020_v43  ;;  %v2774_v56 = vpop.permute.xlu0 %2773 }
 0x792   : > { %v3082_v40 = vsel %vm2979_vm1, %v2964_v5, %v2966_v50  ;;  %3249 = vmatpush1.msra.mxu1 %v3019_v37  ;;  %v3083_v14 = vsel %vm2979_vm1, %v2966_v50, %v7192_v62  ;;  %v3080_v37 = vsel %vm2979_vm1, %v6807_v15, %v8041_v39  ;;  %v3013_v5 = vsel %vm2979_vm1, %v7089_v44, %v7076_v34 }
 0x793   : > { %3250 = vmatprep.subr.mxu1 %v3017_v38  ;;  %3359 = vmatprep.subr.mxu0 %v3083_v14  ;;  %v3077_v38 = vsel %vm2979_vm1, %v6880_v35, %v6971_v27  ;;  %v3076_v34 = vsel %vm2979_vm1, %v6891_v32, %v6880_v35  ;;  %v3008_v44 = vsel %vm2979_vm1, %v6784_v8, %v6819_v0 }
 0x794   : > { %3251 = vmatpush1.msra.mxu1 %v3016_v54  ;;  %3360 = vmatpush1.msra.mxu0 %v3082_v40  ;;  %v3079_v40 = vsel %vm2979_vm1, %v8042_v60, %v6807_v15  ;;  %v7234_v15 = vld [vmem:[%s7758_s5 + $0x10] sm:$0xff]  ;;  %v3027_v35 = vsel %vm2979_vm1, %v7037_v51, %v7103_v1  ;;  %v3002_v51 = vsel %vm2979_vm1, %v7101_v20, %v7115_v30 }
 0x795   : > { %v2776_v43 = vpop.permute.xlu1 %2775  ;;  %3252 = vmatprep.subr.mxu1 %v3014_v24  ;;  %3361 = vmatprep.subr.mxu0 %v3080_v37  ;;  %v2772_v12 = vpop.permute.xlu0 %2771  ;;  %v3005_v37 = vsel %vm2979_vm1, %v6889_v45, %v6981_v52  ;;  %v3015_v60 = vsel %vm2979_vm1, %v7091_v17, %v6991_v9 }
 0x796   : > { %v3010_v50 = vsel %vm2979_vm1, %v2772_v12, %v2774_v56  ;;  %3253 = vmatpush1.msra.mxu1 %v3013_v5  ;;  %3362 = vmatpush1.msra.mxu0 %v3079_v40  ;;  %v3011_v3 = vsel %vm2979_vm1, %v2774_v56, %v2776_v43  ;;  %v8043_v56 = vld [vmem:[#allocation16_spill] sm:$0xff]  ;;  %v7277_v12 = vld [vmem:[#allocation2 + $0x60] sm:$0xff]  ;;  %v3012_v17 = vsel %vm2979_vm1, %v2776_v43, %v7184_v53 }
 0x797   : > { %3254 = vmatprep.subr.mxu1 %v3011_v3  ;;  %3363 = vmatprep.subr.mxu0 %v3077_v38  ;;  %v3007_v14 = vsel %vm2979_vm1, %v8043_v56, %v6784_v8  ;;  %v3004_v8 = vsel %vm2979_vm1, %v6901_v4, %v6889_v45  ;;  %v3021_v45 = vsel %vm2979_vm1, %v8040_v7, %v6831_v42  ;;  %v8047_v43 = vld [vmem:[#allocation44_spill] sm:$0xff]  ;;  %v8048_v56 = vld [vmem:[#allocation45_spill] sm:$0xff] }
 0x798   : > { %3255 = vmatpush1.msra.mxu1 %v3010_v50  ;;  %3364 = vmatpush1.msra.mxu0 %v3076_v34  ;;  %v2995_v50 = vsel %vm2979_vm1, %v6853_v13, %v6843_v47  ;;  %v2993_v38 = vsel %vm2979_vm1, %v6993_v18, %v6925_v25  ;;  %v8045_v34 = vld [vmem:[#allocation6_spill] sm:$0xff]  ;;  %v8046_v13 = vld [vmem:[#allocation15_spill] sm:$0xff] }
 0x799   : > { %v2742_v54 = vpop.permute.xlu1 %2741  ;;  %3256 = vmatprep.subr.mxu1 %v3008_v44  ;;  %3422 = vmatprep.subr.mxu0 %v7103_v1  ;;  %v2810_v32 = vpop.permute.xlu0 %2809  ;;  %v3001_v1 = vsel %vm2979_vm1, %v7113_v58, %v7101_v20  ;;  %v7271_v20 = vld [vmem:[%s7758_s5 + $0x28] sm:$0xff]  ;;  %v3018_v58 = vsel %vm2979_vm1, %v6869_v36, %v6914_v57  ;;  %v8044_v36 = vld [vmem:[#allocation37_spill] sm:$0xff]  ;;  %v4310_v44 = vunpack.i.l.bf16 %v8045_v34 }
 0x79a   : > { %v3024_v24 = vsel %vm2979_vm1, %v2808_v49, %v2810_v32  ;;  %3257 = vmatpush1.msra.mxu1 %v3007_v14  ;;  %4102 = vmatmul.mubr.msk.f32.vlgmr.msra.gmra.mxu0 %vm1438_vm8, %v7234_v15  ;;  %v2990_v14 = vsel %vm2979_vm1, %v8048_v56, %v8047_v43 }
 0x79b   : > { %3423 = vmatpush1.msra.mxu0 %v3027_v35  ;;  %3258 = vmatprep.subr.mxu1 %v3005_v37  ;;  %v8049_v35 = vld [vmem:[#allocation47_spill] sm:$0xff] }
 0x79c   : > { %3424 = vmatprep.subr.mxu0 %v2810_v32  ;;  %3259 = vmatpush1.msra.mxu1 %v3004_v8  ;;  %v8051_v8 = vld [vmem:[#allocation8_spill] sm:$0xff] }
 0x79d   : > { %3425 = vmatpush1.msra.mxu0 %v3024_v24  ;;  %v7261_v49 = vpop.permute.xlu1 %2897  ;;  %3260 = vmatprep.subr.mxu1 %v3002_v51  ;;  %v2744_v5 = vpop.permute.xlu0 %2743  ;;  %v8050_v24 = vld [vmem:[#allocation48_spill] sm:$0xff]  ;;  %v4315_v51 = vunpack.i.l.bf16 %v8051_v8 }
 0x79e   : > { %3426 = vmatprep.subr.mxu0 %v6831_v42  ;;  %3261 = vmatpush1.msra.mxu1 %v3001_v1  ;;  %v2999_v4 = vsel %vm2979_vm1, %v2742_v54, %v2744_v5  ;;  %v2987_v37 = vsel %vm2979_vm1, %v8050_v24, %v8049_v35  ;;  %v3003_v1 = vsel %vm2979_vm1, %v7115_v30, %v7001_v16 }
 0x79f   : > { %3427 = vmatpush1.msra.mxu0 %v3021_v45  ;;  %3262 = vmatprep.subr.mxu1 %v2999_v4  ;;  %v8053_v45 = vld [vmem:[#allocation27_spill] sm:$0xff] }
 0x7a0   : > { %3428 = vmatprep.subr.mxu0 %v6914_v57  ;;  %3403 = vmatprep.mubr.f32.mxu0 %v7277_v12  ;;  %v2996_v57 = vsel %vm2979_vm1, %v6843_v47, %v8044_v36  ;;  %v2992_v47 = vsel %vm2979_vm1, %v7003_v28, %v6993_v18  ;;  %v3006_v18 = vsel %vm2979_vm1, %v6981_v52, %v6903_v46  ;;  %v8052_v52 = vld [vmem:[#allocation10_spill] sm:$0xff] }
 0x7a1   : > { %3429 = vmatpush1.msra.mxu0 %v3018_v58  ;;  %v2740_v42 = vpop.permute.xlu1 %2739  ;;  %v7280_v7 = vpop.permute.xlu0 %2843  ;;  %v2989_v28 = vsel %vm2979_vm1, %v4310_v44, %v8048_v56  ;;  %v2984_v4 = vsel %vm2979_vm1, %v8053_v45, %v8052_v52  ;;  %v4316_v58 = vunpack.i.h.bf16 %v8051_v8 }
 0x7a2   : > { %v2998_v40 = vsel %vm2979_vm1, %v2740_v42, %v2742_v54  ;;  %3430 = vmatprep.subr.mxu0 %v6991_v9  ;;  %4103 = vmatmul.mubr.msk.f32.gmra.mxu0 %vm1438_vm8, %v7271_v20  ;;  %v4311_v54 = vunpack.i.h.bf16 %v8045_v34  ;;  %v3000_v42 = vsel %vm2979_vm1, %v2744_v5, %v7182_v33 }
 0x7a3   : > { %3431 = vmatpush1.msra.mxu0 %v3015_v60  ;;  %3263 = vmatpush1.msra.mxu1 %v2998_v40  ;;  %v8054_v40 = vld [vmem:[#allocation17_spill] sm:$0xff] }
 0x7a4   : > { %3432 = vmatprep.subr.mxu0 %v7184_v53  ;;  %3264 = vmatprep.subr.mxu1 %v2996_v57  ;;  %v3009_v53 = vsel %vm2979_vm1, %v6819_v0, %v8046_v13  ;;  %v8055_v57 = vld [vmem:[#allocation33_spill] sm:$0xff] }
 0x7a5   : > { %3433 = vmatpush1.msra.mxu0 %v3012_v17  ;;  %v7298_v9 = vpop.permute.xlu1 %2831  ;;  %3265 = vmatpush1.msra.mxu1 %v2995_v50  ;;  %v7300_v3 = vpop.permute.xlu0 %2835  ;;  %v2981_v50 = vsel %vm2979_vm1, %v8055_v57, %v8054_v40  ;;  %v8056_v17 = vld [vmem:[#allocation13_spill] sm:$0xff] }
 0x7a6   : > { %3434 = vmatprep.subr.mxu0 %v8046_v13  ;;  %3266 = vmatprep.subr.mxu1 %v2993_v38  ;;  %v2997_v5 = vsel %vm2979_vm1, %v8044_v36, %v8056_v17  ;;  %v2994_v38 = vsel %vm2979_vm1, %v6925_v25, %v6916_v48  ;;  %v8057_v13 = vld [vmem:[#allocation46_spill] sm:$0xff] }
 0x7a7   : > { %3435 = vmatpush1.msra.mxu0 %v3009_v53  ;;  %3267 = vmatpush1.msra.mxu1 %v2992_v47  ;;  %v8058_v25 = vld [vmem:[#allocation50_spill] sm:$0xff] }
 0x7a8   : > { %3436 = vmatprep.subr.mxu0 %v6903_v46  ;;  %3268 = vmatprep.subr.mxu1 %v2990_v14  ;;  %v2986_v46 = vsel %vm2979_vm1, %v4311_v54, %v8050_v24  ;;  %v3065_v14 = vsel %vm2979_vm1, %v7015_v2, %v6937_v26  ;;  %v8060_v54 = vld [vmem:[#allocation40_spill] sm:$0xff] }
 0x7a9   : > { %3437 = vmatpush1.msra.mxu0 %v3006_v18  ;;  %v7323_v0 = vpop.permute.xlu1 %2889  ;;  %3269 = vmatpush1.msra.mxu1 %v2989_v28  ;;  %v7325_v32 = vpop.permute.xlu0 %2829  ;;  %v3064_v18 = vsel %vm2979_vm1, %v8060_v54, %v7015_v2  ;;  %v8061_v28 = vld [vmem:[#allocation28_spill] sm:$0xff]  ;;  %v8078_v54 = vld [vmem:[#allocation53_spill] sm:$0xff] }
 0x7aa   : > { %3438 = vmatprep.subr.mxu0 %v7001_v16  ;;  %3270 = vmatprep.subr.mxu1 %v2987_v37  ;;  %v2983_v16 = vsel %vm2979_vm1, %v4315_v51, %v8053_v45  ;;  %v3075_v51 = vsel %vm2979_vm1, %v7125_v61, %v7165_v11  ;;  %v8065_v45 = vld [vmem:[#allocation14_spill] sm:$0xff] }
 0x7ab   : > { %3439 = vmatpush1.msra.mxu0 %v3003_v1  ;;  %3271 = vmatpush1.msra.mxu1 %v2986_v46  ;;  %v8064_v46 = vld [vmem:[#allocation41_spill] sm:$0xff] }
 0x7ac   : > { %3440 = vmatprep.subr.mxu0 %v7182_v33  ;;  %3272 = vmatprep.subr.mxu1 %v2984_v4  ;;  %v2980_v33 = vsel %vm2979_vm1, %v4316_v58, %v8055_v57  ;;  %v3055_v61 = vsel %vm2979_vm1, %v8065_v45, %v8064_v46  ;;  %v8066_v58 = vld [vmem:[#allocation24_spill] sm:$0xff]  ;;  %v8069_v57 = vld [vmem:[#allocation54_spill] sm:$0xff] }
 0x7ad   : > { %3441 = vmatpush1.msra.mxu0 %v3000_v42  ;;  %v2936_v30 = vpop.permute.xlu1 %2935  ;;  %3273 = vmatpush1.msra.mxu1 %v2983_v16  ;;  %v2934_v60 = vpop.permute.xlu0 %2933  ;;  %v8067_v42 = vld [vmem:[#allocation43_spill] sm:$0xff] }
 0x7ae   : > { %3442 = vmatprep.subr.mxu0 %v8056_v17  ;;  %3274 = vmatprep.subr.mxu1 %v2981_v50  ;;  %v3071_v36 = vsel %vm2979_vm1, %v2934_v60, %v2936_v30  ;;  %v3070_v47 = vsel %vm2979_vm1, %v7188_v63, %v2934_v60  ;;  %v8059_v63 = vld [vmem:[#allocation51_spill] sm:$0xff]  ;;  %v3052_v16 = vsel %vm2979_vm1, %v8067_v42, %v7027_v55 }
 0x7af   : > { %3443 = vmatpush1.msra.mxu0 %v2997_v5  ;;  %3275 = vmatpush1.msra.mxu1 %v2980_v33  ;;  %v3067_v53 = vsel %vm2979_vm1, %v8059_v63, %v6863_v59  ;;  %v8070_v5 = vld [vmem:[#allocation29_spill] sm:$0xff]  ;;  %v8071_v33 = vld [vmem:[#allocation30_spill] sm:$0xff] }
 0x7b0   : > { %3444 = vmatprep.subr.mxu0 %v6916_v48  ;;  %3276 = vmatprep.subr.mxu1 %v7139_v21  ;;  %v2991_v21 = vsel %vm2979_vm1, %v8047_v43, %v8057_v13  ;;  %v3068_v48 = vsel %vm2979_vm1, %v6863_v59, %v6817_v10  ;;  %v2985_v59 = vsel %vm2979_vm1, %v8052_v52, %v8061_v28 }
 0x7b1   : > { %3445 = vmatpush1.msra.mxu0 %v2994_v38  ;;  %v7360_v34 = vpop.permute.xlu1 %2823  ;;  %3277 = vmatpush2.msra.mxu1 %v7135_v41  ;;  %v7363_v44 = vpop.permute.xlu0 %2827  ;;  %v2988_v41 = vsel %vm2979_vm1, %v8049_v35, %v8058_v25  ;;  %v8062_v35 = vld [vmem:[#allocation12_spill] sm:$0xff] }
 0x7b2   : > { %3446 = vmatprep.subr.mxu0 %v8057_v13  ;;  %3278 = vmatprep.subr.mxu1 %v3071_v36  ;;  %v2982_v24 = vsel %vm2979_vm1, %v8054_v40, %v8062_v35  ;;  %v3050_v40 = vsel %vm2979_vm1, %v7167_v6, %v7174_v23  ;;  %v3063_v6 = vsel %vm2979_vm1, %v8071_v33, %v8070_v5  ;;  %v2665_v33 = vld [vmem:[%s7758_s5 + $0x50] sm:$0xff] }
 0x7b3   : > { %3447 = vmatpush1.msra.mxu0 %v2991_v21  ;;  %3279 = vmatpush2.msra.mxu1 %v3070_v47  ;;  %v8074_v47 = vld [vmem:[#allocation42_spill] sm:$0xff] }
 0x7b4   : > { %3448 = vmatprep.subr.mxu0 %v8058_v25  ;;  %3280 = vmatprep.subr.mxu1 %v3068_v48  ;;  %v8075_v25 = vld [vmem:[#allocation5_spill] sm:$0xff] }
 0x7b5   : > { %3449 = vmatpush1.msra.mxu0 %v2988_v41  ;;  %v7382_v56 = vpop.permute.xlu1 %2903  ;;  %3281 = vmatpush2.msra.mxu1 %v3067_v53  ;;  %v2902_v43 = vpop.permute.xlu0 %2901  ;;  %v3043_v41 = vsel %vm2979_vm1, %v8075_v25, %v8074_v47  ;;  %v8076_v53 = vld [vmem:[#allocation23_spill] sm:$0xff] }
 0x7b6   : > { %3450 = vmatprep.subr.mxu0 %v8061_v28  ;;  %3282 = vmatprep.subr.mxu1 %v3065_v14  ;;  %v3059_v8 = vsel %vm2979_vm1, %v2902_v43, %v7382_v56 }
 0x7b7   : > { %3451 = vmatpush1.msra.mxu0 %v2985_v59  ;;  %3283 = vmatpush2.msra.mxu1 %v3064_v18  ;;  %v8080_v59 = vld [vmem:[#allocation36_spill] sm:$0xff] }
 0x7b8   : > { %3452 = vmatprep.subr.mxu0 %v8062_v35  ;;  %3284 = vmatprep.subr.mxu1 %v7157_v19  ;;  %v3058_v19 = vsel %vm2979_vm1, %v7190_v29, %v2902_v43  ;;  %v8077_v43 = vld [vmem:[#allocation3_spill] sm:$0xff] }
 0x7b9   : > { %3453 = vmatpush1.msra.mxu0 %v2982_v24  ;;  %v2938_v37 = vpop.permute.xlu1 %2937  ;;  %3285 = vmatpush2.msra.mxu1 %v7153_v22  ;;  %v7400_v2 = vpop.permute.xlu0 %2821  ;;  %v8063_v22 = vld [vmem:[#allocation38_spill] sm:$0xff]  ;;  %v3041_v14 = vsel %vm2979_vm1, %v8077_v43, %v8076_v53  ;;  %v3040_v18 = vsel %vm2979_vm1, %v8078_v54, %v8077_v43  ;;  %v3037_v24 = vsel %vm2979_vm1, %v7280_v7, %v8080_v59 }
 0x7ba   : > { %v3072_v1 = vsel %vm2979_vm1, %v2936_v30, %v2938_v37  ;;  %3454 = vmatprep.subr.mxu0 %v7165_v11  ;;  %3286 = vmatprep.subr.mxu1 %v3059_v8  ;;  %v3056_v52 = vsel %vm2979_vm1, %v8064_v46, %v8063_v22  ;;  %v3053_v11 = vsel %vm2979_vm1, %v7027_v55, %v8066_v58  ;;  %v8068_v30 = vld [vmem:[#allocation11_spill] sm:$0xff] }
 0x7bb   : > { %3455 = vmatpush2.msra.mxu0 %v3075_v51  ;;  %3287 = vmatpush2.msra.mxu1 %v3058_v19  ;;  %v3069_v60 = vsel %vm2979_vm1, %v6817_v10, %v8068_v30  ;;  %v3066_v55 = vsel %vm2979_vm1, %v6937_v26, %v8069_v57  ;;  %v7438_v10 = vld [vmem:[%s7758_s5 + $0x40] sm:$0xff]  ;;  %v8072_v26 = vld [vmem:[#allocation25_spill] sm:$0xff]  ;;  %v3057_v28 = vsel %vm2979_vm1, %v8063_v22, %v7261_v49 }
 0x7bc   : > { %3456 = vmatprep.subr.mxu0 %v2938_v37  ;;  %3288 = vmatprep.subr.mxu1 %v3056_v52  ;;  %v3054_v51 = vsel %vm2979_vm1, %v8066_v58, %v7323_v0  ;;  %v2655_v52 = vld [vmem:[%s7758_s5] sm:$0xff]  ;;  %v2658_v58 = vld [vmem:[%s7758_s5 + $0x18] sm:$0xff] }
 0x7bd   : > { %3457 = vmatpush2.msra.mxu0 %v3072_v1  ;;  %v2882_v4 = vpop.permute.xlu1 %2881  ;;  %3289 = vmatpush2.msra.mxu1 %v3055_v61  ;;  %v2870_v29 = vpop.permute.xlu0 %2869  ;;  %v3032_v1 = vsel %vm2979_vm1, %v7325_v32, %v7298_v9 }
 0x7be   : > { %3458 = vmatprep.subr.mxu0 %v8068_v30  ;;  %3290 = vmatprep.subr.mxu1 %v3053_v11  ;;  %v3046_v36 = vsel %vm2979_vm1, %v8072_v26, %v2870_v29  ;;  %v3051_v7 = vsel %vm2979_vm1, %v7174_v23, %v2882_v4  ;;  %v3029_v23 = vsel %vm2979_vm1, %v7400_v2, %v7360_v34  ;;  %v2662_v30 = vld [vmem:[%s7758_s5 + $0x38] sm:$0xff] }
 0x7bf   : > { %3459 = vmatpush2.msra.mxu0 %v3069_v60  ;;  %3291 = vmatpush2.msra.mxu1 %v3052_v16  ;;  %v8081_v60 = vld [vmem:[#allocation22_spill] sm:$0xff] }
 0x7c0   : > { %3460 = vmatprep.subr.mxu0 %v8069_v57  ;;  %3292 = vmatprep.subr.mxu1 %v3050_v40  ;;  %v8082_v26 = vld [vmem:[#allocation34_spill] sm:$0xff] }
 0x7c1   : > { %3461 = vmatpush2.msra.mxu0 %v3066_v55  ;;  %v2872_v50 = vpop.permute.xlu1 %2871  ;;  %3293 = vmatpush2.msra.mxu1 %v7172_v31  ;;  %v2820_v17 = vpop.permute.xlu0 %2819  ;;  %v8073_v31 = vld [vmem:[#allocation39_spill] sm:$0xff]  ;;  %v2661_v55 = vld [vmem:[%s7758_s5 + $0x30] sm:$0xff] }
 0x7c2   : > { %3462 = vmatprep.subr.mxu0 %v8070_v5  ;;  %v3047_v38 = vsel %vm2979_vm1, %v2870_v29, %v2872_v50  ;;  %3409 = vmatprep.mubr.f32.mxu0 %v7277_v12  ;;  %v3044_v13 = vsel %vm2979_vm1, %v8074_v47, %v8073_v31  ;;  %v3028_v45 = vsel %vm2979_vm1, %v2820_v17, %v7400_v2  ;;  %v7507_v29 = vld [vmem:[%s7758_s5 + $0x58] sm:$0xff] }
 0x7c3   : > { %3463 = vmatpush2.msra.mxu0 %v3063_v6  ;;  %3294 = vmatprep.subr.mxu1 %v3047_v38 }
 0x7c4   : > { %3295 = vmatpush2.msra.mxu1 %v3046_v36  ;;  %4104 = vmatmul.mubr.msk.f32.gmra.mxu0 %vm1438_vm8, %v7438_v10 }
 0x7c5   : > { %v2906_v21 = vpop.permute.xlu1 %2905  ;;  %3296 = vmatprep.subr.mxu1 %v3044_v13  ;;  %v2838_v48 = vpop.permute.xlu0 %2837  ;;  %3415 = vmatprep.mubr.f32.mxu0 %v7277_v12 }
 0x7c6   : > { %v3060_v63 = vsel %vm2979_vm1, %v7382_v56, %v2906_v21  ;;  %3297 = vmatpush2.msra.mxu1 %v3043_v41  ;;  %3464 = vmatprep.subr.mxu0 %v2906_v21  ;;  %v8079_v56 = vld [vmem:[#allocation32_spill] sm:$0xff]  ;;  %v3034_v19 = vsel %vm2979_vm1, %v7300_v3, %v2838_v48 }
 0x7c7   : > { %3298 = vmatprep.subr.mxu1 %v3041_v14  ;;  %3465 = vmatpush2.msra.mxu0 %v3060_v63  ;;  %v3038_v35 = vsel %vm2979_vm1, %v8080_v59, %v8079_v56 }
 0x7c8   : > { %3299 = vmatpush2.msra.mxu1 %v3040_v18  ;;  %3466 = vmatprep.subr.mxu0 %v7261_v49 }
 0x7c9   : > { %v2840_v37 = vpop.permute.xlu1 %2839  ;;  %3300 = vmatprep.subr.mxu1 %v3038_v35  ;;  %3467 = vmatpush2.msra.mxu0 %v3057_v28  ;;  %v2858_v8 = vpop.permute.xlu0 %2857 }
 0x7ca   : > { %3301 = vmatpush2.msra.mxu1 %v3037_v24  ;;  %3468 = vmatprep.subr.mxu0 %v7323_v0  ;;  %v3035_v49 = vsel %vm2979_vm1, %v2838_v48, %v2840_v37  ;;  %v3031_v0 = vsel %vm2979_vm1, %v7363_v44, %v7325_v32  ;;  %v2659_v32 = vld [vmem:[%s7758_s5 + $0x20] sm:$0xff]  ;;  %v3042_v2 = vsel %vm2979_vm1, %v8076_v53, %v2858_v8 }
 0x7cb   : > { %3302 = vmatprep.subr.mxu1 %v3035_v49  ;;  %3469 = vmatpush2.msra.mxu0 %v3054_v51 }
 0x7cc   : > { %3303 = vmatpush2.msra.mxu1 %v3034_v19  ;;  %3470 = vmatprep.subr.mxu0 %v2882_v4 }
 0x7cd   : > { %v2866_v22 = vpop.permute.xlu1 %2865  ;;  %3304 = vmatprep.subr.mxu1 %v3032_v1  ;;  %3471 = vmatpush2.msra.mxu0 %v3051_v7  ;;  %v2874_v46 = vpop.permute.xlu0 %2873 }
 0x7ce   : > { %v3048_v3 = vsel %vm2979_vm1, %v2872_v50, %v2874_v46  ;;  %3305 = vmatpush2.msra.mxu1 %v3031_v0  ;;  %3472 = vmatprep.subr.mxu0 %v2874_v46  ;;  %v3045_v44 = vsel %vm2979_vm1, %v8073_v31, %v2866_v22 }
 0x7cf   : > { %3306 = vmatprep.subr.mxu1 %v3029_v23  ;;  %3473 = vmatpush2.msra.mxu0 %v3048_v3 }
 0x7d0   : > { %3307 = vmatpush2.msra.mxu1 %v3028_v45  ;;  %3474 = vmatprep.subr.mxu0 %v2866_v22 }
 0x7d1   : > { %v2850_v61 = vpop.permute.xlu1 %2849  ;;  %3309 = vmatmul.mubr.f32.vlgmr.msra.gmra.mxu1 %v2655_v52  ;;  %3475 = vmatpush2.msra.mxu0 %v3045_v44  ;;  %v2834_v4 = vpop.permute.xlu0 %2833 }
 0x7d2   : > { %3476 = vmatprep.subr.mxu0 %v2858_v8  ;;  %3314 = vmatprep.mubr.f32.mxu1 %v2659_v32  ;;  %v3039_v11 = vsel %vm2979_vm1, %v8079_v56, %v2850_v61  ;;  %v3033_v50 = vsel %vm2979_vm1, %v7298_v9, %v2834_v4  ;;  %v2664_v9 = vld [vmem:[%s7758_s5 + $0x48] sm:$0xff] }
 0x7d3   : > { %3477 = vmatpush2.msra.mxu0 %v3042_v2 }
 0x7d4   : > { %3478 = vmatprep.subr.mxu0 %v2850_v61  ;;  %4105 = vmatmul.mubr.msk.f32.gmra.mxu0 %vm1438_vm8, %v7507_v29  ;;  %v8084_v61 = vld [vmem:[#allocation20_spill] sm:$0xff] }
 0x7d5   : > { %v2978_v42 = vpop.permute.xlu1 %2977  ;;  %3315 = vmatmul.mubr.f32.gmra.mxu1 %v2658_v58  ;;  %3479 = vmatpush2.msra.mxu0 %v3039_v11  ;;  %v2842_v16 = vpop.permute.xlu0 %2841 }
 0x7d6   : > { %v3087_v40 = vsel %vm2979_vm1, %v8081_v60, %v2978_v42  ;;  %v3036_v57 = vsel %vm2979_vm1, %v2840_v37, %v2842_v16  ;;  %3480 = vmatprep.subr.mxu0 %v2842_v16  ;;  %3535 = vmatprep.subr.mxu1 %v2978_v42 }
 0x7d7   : > { %3481 = vmatpush2.msra.mxu0 %v3036_v57  ;;  %3536 = vmatpush1.msra.mxu1 %v3087_v40 }
 0x7d8   : > { %3320 = vmatprep.mubr.f32.mxu1 %v2662_v30  ;;  %3482 = vmatprep.subr.mxu0 %v2834_v4 }
 0x7d9   : > { %v2970_v17 = vpop.permute.xlu1 %2969  ;;  %3321 = vmatmul.mubr.f32.gmra.mxu1 %v2661_v55  ;;  %3483 = vmatpush2.msra.mxu0 %v3033_v50  ;;  %v2826_v5 = vpop.permute.xlu0 %2825 }
 0x7da   : > { %v3084_v6 = vsel %vm2979_vm1, %v7192_v62, %v2970_v17  ;;  %v3030_v38 = vsel %vm2979_vm1, %v7360_v34, %v2826_v5  ;;  %3484 = vmatprep.subr.mxu0 %v2826_v5  ;;  %3537 = vmatprep.subr.mxu1 %v2970_v17 }
 0x7db   : > { %3485 = vmatpush2.msra.mxu0 %v3030_v38  ;;  %3486 = vmatprep.mubr.f32.mxu0 %v8082_v26 }
 0x7dc   : > { %3538 = vmatpush1.msra.mxu1 %v3084_v6  ;;  %3326 = vmatprep.mubr.f32.mxu1 %v2665_v33 }
 0x7dd   : > { %3487 = vmatmul.mubr.f32.vlgmr.msra.gmra.mxu0 %v2655_v52  ;;  %v2962_v36 = vpop.permute.xlu1 %2961  ;;  %3327 = vmatmul.mubr.f32.gmra.mxu1 %v2664_v9  ;;  %v2954_v31 = vpop.permute.xlu0 %2953 }
 0x7de   : > { %v3081_v62 = vsel %vm2979_vm1, %v8041_v39, %v2962_v36  ;;  %3539 = vmatprep.subr.mxu1 %v2962_v36  ;;  %3492 = vmatprep.mubr.f32.mxu0 %v2659_v32  ;;  %v3078_v34 = vsel %vm2979_vm1, %v6971_v27, %v2954_v31  ;;  %v4337_v27 = vld [vmem:[%s7763_s10] sm:$0xff]  ;;  %v8085_v36 = vld [vmem:[#allocation4_spill] sm:$0xff] }
 0x7df   : > { %3540 = vmatpush1.msra.mxu1 %v3081_v62  ;;  %3575 = vmatprep.mubr.f32.mxu1 %v7277_v12  ;;  %v8083_v32 = vld [vmem:[#allocation19_spill] sm:$0xff] }
 0x7e0   : > { %3541 = vmatprep.subr.mxu1 %v2954_v31 }
 0x7e1   : > { %3493 = vmatmul.mubr.f32.gmra.mxu0 %v2658_v58  ;;  %3542 = vmatpush1.msra.mxu1 %v3078_v34 }
 0x7e2   : > { %4106 = vmatmul.mubr.msk.f32.vlgmr.msra.gmra.mxu1 %vm1438_vm8, %v7234_v15  ;;  %3498 = vmatprep.mubr.f32.mxu0 %v2662_v30 }
 0x7e3   : > { %3581 = vmatprep.mubr.f32.mxu1 %v7277_v12 }
 0x7e5   : > { %3499 = vmatmul.mubr.f32.gmra.mxu0 %v2661_v55 }
 0x7e6   : > { %4107 = vmatmul.mubr.msk.f32.gmra.mxu1 %vm1438_vm8, %v7271_v20  ;;  %3504 = vmatprep.mubr.f32.mxu0 %v2665_v33 }
 0x7e7   : > { %3587 = vmatprep.mubr.f32.mxu1 %v7277_v12 }
 0x7e9   : > { %3505 = vmatmul.mubr.f32.gmra.mxu0 %v2664_v9 }
 0x7ea   : > { %4108 = vmatmul.mubr.msk.f32.gmra.mxu1 %vm1438_vm8, %v7438_v10  ;;  %4190 = vmatprep.mubr.msk.f32.mxu0 %vm1438_vm8, %v4337_v27  ;;  %v2684_v25 = vpop.permute.xlu0 %2683  ;;  %v7561_v53 = vpop.permute.xlu1 %2688 }
 0x7eb   : > { %3593 = vmatprep.mubr.f32.mxu1 %v7277_v12 }
 0x7ee   : > { %4109 = vmatmul.mubr.msk.f32.gmra.mxu1 %vm1438_vm8, %v7507_v29  ;;  %v2674_v54 = vpop.permute.xlu0 %2673  ;;  %v2679_v28 = vpop.permute.xlu1 %2678 }
 0x7ef   : > { %4204 = vmatprep.mubr.msk.f32.mxu1 %vm1438_vm8, %v4337_v27 }
 0x85a   : > { %v3399_v39 = vpop.f32.mrf.mxu0 }
 0x85c   : > { %v3401_v15 = vpop.f32.mrf.mxu0 }
 0x862   : > { %v3405_v20 = vpop.f32.mrf.mxu0 }
 0x864   : > { %v3407_v47 = vpop.f32.mrf.mxu0 }
 0x884   : > { %v3411_v13 = vpop.f32.mrf.mxu0 }
 0x886   : > { %v3413_v10 = vpop.f32.mrf.mxu0 }
 0x891   : > { %v3310_v21 = vpop.f32.mrf.mxu1 }
 0x892   : > { %v3311_v56 = vadd.f32 %v3310_v21, %v2674_v54 }
 0x893   : > { %v3312_v48 = vpop.f32.mrf.mxu1 }
 0x894   : > { %v3417_v63 = vpop.f32.mrf.mxu0  ;;  %v3313_v59 = vadd.f32 %v3312_v48, %v2674_v54  ;;  %v7563_v7 = vadd.f32 %v3399_v39, %v3311_v56  ;;  %v8086_v48 = vld [vmem:[#allocation7_spill] sm:$0xff] }
 0x895   : > { %v3316_v41 = vpop.f32.mrf.mxu1 }
 0x896   : > { %v3419_v14 = vpop.f32.mrf.mxu0  ;;  %v3317_v51 = vadd.f32 %v3316_v41, %v2679_v28  ;;  %v7565_v1 = vadd.f32 %v3401_v15, %v3313_v59  ;;  %v3608_v44 = vmul.f32 %v7563_v7, %v8083_v32 }
 0x897   : > { %v3318_v43 = vpop.f32.mrf.mxu1 }
 0x898   : > { %v3319_v35 = vadd.f32 %v3318_v43, %v2679_v28  ;;  %v7571_v52 = vadd.f32 %v3405_v20, %v3317_v51  ;;  %v7577_v4 = vmul.f32 %v7565_v1, %v8084_v61  ;;  %v7593_v5 = vmul.f32 %v3608_v44, %v3608_v44 }
 0x899   : > { %v3322_v12 = vpop.f32.mrf.mxu1 }
 0x89a   : > { %v3323_v8 = vadd.f32 %v3322_v12, %v2684_v25  ;;  %v7567_v22 = vadd.f32 %v3407_v47, %v3319_v35  ;;  %v3612_v57 = vmul.f32 %v7571_v52, %v8083_v32  ;;  %v3624_v38 = vadd.f32 %v7577_v4, %v3608_v44 }
 0x89b   : > { %v3324_v18 = vpop.f32.mrf.mxu1 }
 0x89c   : > { %v3325_v0 = vadd.f32 %v3324_v18, %v2684_v25  ;;  %v7569_v3 = vadd.f32 %v3411_v13, %v3323_v8  ;;  %v7584_v11 = vmul.f32 %v7567_v22, %v8084_v61 }
 0x89d   : > { %v3488_v24 = vpop.f32.mrf.mxu0  ;;  %v3328_v37 = vpop.f32.mrf.mxu1 }
 0x89e   : > { %v7579_v29 = vadd.f32 %v3413_v10, %v3325_v0  ;;  %v3616_v30 = vmul.f32 %v7569_v3, %v8083_v32  ;;  %v3329_v60 = vadd.f32 %v3328_v37, %v7561_v53  ;;  %v3630_v62 = vadd.f32 %v7584_v11, %v3612_v57 }
 0x89f   : > { %v3490_v49 = vpop.f32.mrf.mxu0  ;;  %v3330_v19 = vpop.f32.mrf.mxu1  ;;  %v3489_v15 = vadd.f32 %v3488_v24, %v2674_v54 }
 0x8a0   : > { %v3331_v2 = vadd.f32 %v3330_v19, %v7561_v53  ;;  %v3617_v33 = vmul.f32 %v7579_v29, %v8084_v61  ;;  %v3656_v39 = vmul.f32 %v3616_v30, %v3616_v30  ;;  %v7605_v20 = vadd.f32 %v3417_v63, %v3329_v60 }
 0x8a1   : > { %v3494_v46 = vpop.f32.mrf.mxu0  ;;  %v3491_v47 = vadd.f32 %v3490_v49, %v2674_v54 }
 0x8a2   : > { %v3577_v23 = vpop.f32.mrf.mxu1  ;;  %v3495_v42 = vadd.f32 %v3494_v46, %v2679_v28  ;;  %v7597_v6 = vadd.f32 %v3419_v14, %v3331_v2  ;;  %v3657_v14 = vmul.f32 %v3617_v33, %v3617_v33  ;;  %v3636_v56 = vadd.f32 %v3617_v33, %v3616_v30 }
 0x8a3   : > { %v3496_v45 = vpop.f32.mrf.mxu0  ;;  %v3620_v24 = vmul.f32 %v7605_v20, %v8083_v32 }
 0x8a4   : > { %v3579_v58 = vpop.f32.mrf.mxu1  ;;  %v3497_v55 = vadd.f32 %v3496_v45, %v2679_v28  ;;  %v3621_v18 = vmul.f32 %v7597_v6, %v8084_v61  ;;  %v7613_v28 = vadd.f32 %v3577_v23, %v3489_v15  ;;  %v3676_v32 = vadd.f32 %v3657_v14, %v3656_v39 }
 0x8a5   : > { %v3500_v16 = vpop.f32.mrf.mxu0  ;;  %v7623_v37 = vadd.f32 %v3579_v58, %v3491_v47  ;;  %v3660_v30 = vmul.f32 %v3620_v24, %v3620_v24 }
 0x8a6   : > { %v3583_v40 = vpop.f32.mrf.mxu1  ;;  %v3501_v26 = vadd.f32 %v3500_v16, %v2684_v25  ;;  %v3661_v45 = vmul.f32 %v3621_v18, %v3621_v18  ;;  %v3610_v44 = vmul.f32 %v7613_v28, %v8085_v36  ;;  %v3642_v61 = vadd.f32 %v3621_v18, %v3620_v24 }
 0x8a7   : > { %v3502_v50 = vpop.f32.mrf.mxu0  ;;  %v7591_v17 = vadd.f32 %v3583_v40, %v3495_v42  ;;  %v3611_v60 = vmul.f32 %v7623_v37, %v8086_v48 }
 0x8a8   : > { %v3585_v9 = vpop.f32.mrf.mxu1  ;;  %v3503_v21 = vadd.f32 %v3502_v50, %v2684_v25  ;;  %v3682_v39 = vadd.f32 %v3661_v45, %v3660_v30  ;;  %v3625_v15 = vadd.f32 %v3624_v38, %v3610_v44  ;;  %v3650_v47 = vmul.f32 %v3610_v44, %v3610_v44  ;;  %v4338_v44 = vld [vmem:[%s7763_s10 + $0x8] sm:$0xff] }
 0x8a9   : > { %v3614_v31 = vmul.f32 %v7591_v17, %v8085_v36  ;;  %v3506_v34 = vpop.f32.mrf.mxu0  ;;  %v7603_v27 = vadd.f32 %v3585_v9, %v3497_v55  ;;  %v3626_v18 = vsel %vm397_vm0, %v3611_v60, 0.0 }
 0x8aa   : > { %v3589_v13 = vpop.f32.mrf.mxu1  ;;  %v3507_v63 = vadd.f32 %v3506_v34, %v7561_v53  ;;  %v3652_v34 = vmul.f32 %v3612_v57, %v3612_v57 }
 0x8ab   : > { %v3631_v10 = vadd.f32 %v3630_v62, %v3614_v31  ;;  %v3615_v41 = vmul.f32 %v7603_v27, %v8086_v48  ;;  %v3508_v43 = vpop.f32.mrf.mxu0  ;;  %v7609_v12 = vadd.f32 %v3589_v13, %v3501_v26  ;;  %v3649_v62 = vmul.f32 %v7577_v4, %v7577_v4 }
 0x8ac   : > { %v3591_v59 = vpop.f32.mrf.mxu1  ;;  %v3509_v8 = vadd.f32 %v3508_v43, %v7561_v53 }
 0x8ad   : > { %v3632_v54 = vsel %vm397_vm0, %v3615_v41, 0.0  ;;  %v3618_v25 = vmul.f32 %v7609_v12, %v8085_v36  ;;  %v7619_v35 = vadd.f32 %v3591_v59, %v3503_v21  ;;  %v3655_v59 = vmul.f32 %v3615_v41, %v3615_v41 }
 0x8ae   : > { %v3595_v51 = vpop.f32.mrf.mxu1  ;;  %v3633_v49 = vadd.f32 %v3632_v54, %v3631_v10  ;;  %v3654_v10 = vmul.f32 %v3614_v31, %v3614_v31  ;;  %v3664_v57 = vadd.f32 %v3649_v62, %v7593_v5 }
 0x8af   : > { %v3637_v19 = vadd.f32 %v3636_v56, %v3618_v25  ;;  %v3658_v0 = vmul.f32 %v3618_v25, %v3618_v25  ;;  %v3619_v46 = vmul.f32 %v7619_v35, %v8086_v48  ;;  %v7628_v23 = vadd.f32 %v3595_v51, %v3507_v63 }
 0x8b0   : > { %v3597_v2 = vpop.f32.mrf.mxu1  ;;  %3634 = vadd.xlane.f32.xlu1 %v3633_v49  ;;  %v3651_v56 = vmul.f32 %v3611_v60, %v3611_v60  ;;  %v3627_v63 = vadd.f32 %v3626_v18, %v3625_v15  ;;  %v3665_v25 = vadd.f32 %v3664_v57, %v3650_v47  ;;  %v3672_v31 = vsel %vm397_vm0, %v3655_v59, 0.0  ;;  %v3602_v57 = vld [vmem:[%s7760_s7 + $0x10] sm:$0xff] }
 0x8b1   : > { %v3638_v58 = vsel %vm397_vm0, %v3619_v46, 0.0  ;;  %v3659_v53 = vmul.f32 %v3619_v46, %v3619_v46  ;;  %v3622_v42 = vmul.f32 %v7628_v23, %v8085_v36  ;;  %v7635_v16 = vadd.f32 %v3597_v2, %v3509_v8  ;;  %v4339_v2 = vld [vmem:[%s7763_s10 + $0x10] sm:$0xff] }
 0x8b2   : > { %v3639_v40 = vadd.f32 %v3638_v58, %v3637_v19  ;;  %v3677_v55 = vadd.f32 %v3676_v32, %v3658_v0  ;;  %v3653_v36 = vmul.f32 %v7584_v11, %v7584_v11  ;;  %v3666_v24 = vsel %vm397_vm0, %v3651_v56, 0.0  ;;  %v4340_v32 = vld [vmem:[%s7763_s10 + $0x18] sm:$0xff] }
 0x8b3   : > { %v3643_v50 = vadd.f32 %v3642_v61, %v3622_v42  ;;  %v3662_v33 = vmul.f32 %v3622_v42, %v3622_v42  ;;  %v3623_v9 = vmul.f32 %v7635_v16, %v8086_v48  ;;  %v3678_v26 = vsel %vm397_vm0, %v3659_v53, 0.0 }
 0x8b4   : > { %3640 = vadd.xlane.f32.xlu0 %v3639_v40  ;;  %v3679_v14 = vadd.f32 %v3678_v26, %v3677_v55  ;;  %v3670_v11 = vadd.f32 %v3653_v36, %v3652_v34  ;;  %v3667_v51 = vadd.f32 %v3666_v24, %v3665_v25  ;;  %v3605_v24 = vld [vmem:[%s7761_s8 + $0x8] sm:$0xff] }
 0x8b5   : > { %v3644_v13 = vsel %vm397_vm0, %v3623_v9, 0.0  ;;  %v3663_v21 = vmul.f32 %v3623_v9, %v3623_v9  ;;  %v3683_v48 = vadd.f32 %v3682_v39, %v3662_v33 }
 0x8b6   : > { %v3645_v43 = vadd.f32 %v3644_v13, %v3643_v50  ;;  %v3671_v54 = vadd.f32 %v3670_v11, %v3654_v10  ;;  %v3603_v11 = vld [vmem:[%s7760_s7 + $0x18] sm:$0xff] }
 0x8b7   : > { %v3684_v4 = vsel %vm397_vm0, %v3663_v21, 0.0 }
 0x8b8   : > { %3646 = vadd.xlane.f32.xlu1 %v3645_v43  ;;  %3680 = vadd.xlane.f32.xlu0 %v3679_v14  ;;  %v3685_v38 = vadd.f32 %v3684_v4, %v3683_v48  ;;  %v3673_v8 = vadd.f32 %v3672_v31, %v3671_v54  ;;  %v3601_v43 = vld [vmem:[%s7760_s7 + $0x8] sm:$0xff]  ;;  %v3600_v48 = vld [vmem:[%s7760_s7] sm:$0xff] }
 0x8bc   : > { %3686 = vadd.xlane.f32.xlu0 %v3685_v38  ;;  %3628 = vadd.xlane.f32.xlu1 %v3627_v63 }
 0x8c0   : > { %3674 = vadd.xlane.f32.xlu0 %v3673_v8  ;;  %3668 = vadd.xlane.f32.xlu1 %v3667_v51  ;;  %v3604_v8 = vld [vmem:[%s7761_s8] sm:$0xff] }
 0x939   : > { %v3635_v41 = vpop.xlane.xlu1 %3634 }
 0x93d   : > { %v3641_v49 = vpop.xlane.xlu0 %3640 }
 0x941   : > { %v3647_v19 = vpop.xlane.xlu1 %3646  ;;  %v3681_v0 = vpop.xlane.xlu0 %3680 }
 0x942   : > { %4182 = vmatprep.subr.mxu0 %v3647_v19 }
 0x943   : > { %4183 = vmatpush3.msra.mxu0 %v3647_v19 }
 0x944   : > { %4184 = vmatprep.subr.mxu0 %v3641_v49 }
 0x945   : > { %v3629_v5 = vpop.xlane.xlu1 %3628  ;;  %4185 = vmatpush3.msra.mxu0 %v3641_v49  ;;  %v3687_v46 = vpop.xlane.xlu0 %3686 }
 0x946   : > { %4186 = vmatprep.subr.mxu0 %v3635_v41  ;;  %4196 = vmatprep.subr.mxu1 %v3687_v46 }
 0x947   : > { %4187 = vmatpush3.msra.mxu0 %v3635_v41  ;;  %4197 = vmatpush3.msra.mxu1 %v3687_v46 }
 0x948   : > { %4188 = vmatprep.subr.mxu0 %v3629_v5  ;;  %4198 = vmatprep.subr.mxu1 %v3681_v0 }
 0x949   : > { %4189 = vmatpush3.msra.mxu0 %v3629_v5  ;;  %4199 = vmatpush3.msra.mxu1 %v3681_v0  ;;  %v3675_v45 = vpop.xlane.xlu0 %3674  ;;  %v3669_v61 = vpop.xlane.xlu1 %3668  ;;  %v3607_v0 = vld [vmem:[%s7761_s8 + $0x18] sm:$0xff]  ;;  %v3606_v5 = vld [vmem:[%s7761_s8 + $0x10] sm:$0xff] }
 0x94a   : > { %4200 = vmatprep.subr.mxu1 %v3675_v45  ;;  %4191 = vmatmul.mubr.msk.f32.vlgmr.msra.gmra.mxu0 %vm1438_vm8, %v4338_v44 }
 0x94b   : > { %4201 = vmatpush3.msra.mxu1 %v3675_v45  ;;  %4193 = vmatprep.mubr.msk.f32.mxu0 %vm1438_vm8, %v4339_v2 }
 0x94c   : > { %4202 = vmatprep.subr.mxu1 %v3669_v61 }
 0x94d   : > { %4203 = vmatpush3.msra.mxu1 %v3669_v61 }
 0x94e   : > { %4205 = vmatmul.mubr.msk.f32.vlgmr.msra.gmra.mxu1 %vm1438_vm8, %v4338_v44  ;;  %4194 = vmatmul.mubr.msk.f32.gmra.mxu0 %vm1438_vm8, %v4340_v32 }
 0x94f   : > { %4207 = vmatprep.mubr.msk.f32.mxu1 %vm1438_vm8, %v4339_v2 }
 0x952   : > { %4208 = vmatmul.mubr.msk.f32.gmra.mxu1 %vm1438_vm8, %v4340_v32 }
 0xa0a   : > { %v4192_v58 = vpop.f32.mrf.mxu0 }
 0xa0b   : > { %v3859_v53 = vmul.f32 %v4192_v58, %v4192_v58 }
 0xa0c   : > { %v3754_v42 = vpop.f32.mrf.mxu0 }
 0xa0d   : > { %v3858_v40 = vmul.f32 %v3754_v42, %v3754_v42 }
 0xa0e   : > { %v4206_v30 = vpop.f32.mrf.mxu1  ;;  %v4195_v60 = vpop.f32.mrf.mxu0 }
 0xa0f   : > { %v3863_v55 = vsub.f32 %v4206_v30, %v3859_v53  ;;  %v3861_v50 = vmul.f32 %v4195_v60, %v4195_v60 }
 0xa10   : > { %v3839_v33 = vpop.f32.mrf.mxu1  ;;  %v3764_v9 = vpop.f32.mrf.mxu0 }
 0xa11   : > { %v3867_v26 = vadd.f32 1e-05, %v3863_v55  ;;  %v3862_v62 = vsub.f32 %v3839_v33, %v3858_v40  ;;  %v3860_v39 = vmul.f32 %v3764_v9, %v3764_v9  ;;  %v3962_v33 = vld [vmem:[%s4450_s23 + $0x20] sm:$0xff] }
 0xa12   : > { %v4209_v34 = vpop.f32.mrf.mxu1 }
 0xa13   : > { %4325 = vrsqrt.f32 %v3867_v26  ;;  %v3866_v36 = vadd.f32 1e-05, %v3862_v62  ;;  %v3865_v15 = vsub.f32 %v4209_v34, %v3861_v50  ;;  %v3958_v62 = vld [vmem:[%s4450_s23] sm:$0xff] }
 0xa14   : > { %v3849_v47 = vpop.f32.mrf.mxu1 }
 0xa15   : > { %4327 = vrsqrt.f32 %v3866_v36  ;;  %v3869_v13 = vadd.f32 1e-05, %v3865_v15  ;;  %v3864_v21 = vsub.f32 %v3849_v47, %v3860_v39  ;;  %v3960_v47 = vld [vmem:[%s4450_s23 + $0x10] sm:$0xff] }
 0xa17   : > { %4329 = vrsqrt.f32 %v3869_v13  ;;  %v3868_v10 = vadd.f32 1e-05, %v3864_v21  ;;  %v3961_v13 = vld [vmem:[%s4450_s23 + $0x18] sm:$0xff] }
 0xa19   : > { %4331 = vrsqrt.f32 %v3868_v10 }
 0xa20   : > { %v4326_v14 = vpop.eup %4325 }
 0xa21   : > { %v3875_v18 = vmul.f32 %v4326_v14, %v3601_v43 }
 0xa22   : > { %v4328_v56 = vpop.eup %4327 }
 0xa23   : > { %3893 = vperm.xlu1 %4276, %v3875_v18   ;;  %v3874_v59 = vmul.f32 %v4328_v56, %v3600_v48  ;;  %v3879_v25 = vmul.f32 %v4192_v58, %v3875_v18 }
 0xa24   : > { %v4330_v4 = vpop.eup %4329 }
 0xa25   : > { %3888 = vperm.xlu0 %4275, %v3874_v59   ;;  %v3877_v63 = vmul.f32 %v4330_v4, %v3603_v11  ;;  %v3878_v31 = vmul.f32 %v3874_v59, %v3754_v42  ;;  %v3883_v51 = vsub.f32 %v3605_v24, %v3879_v25  ;;  %v3970_v4 = vld [vmem:[%s4450_s23 + $0x60] sm:$0xff]  ;;  %v3971_v25 = vld [vmem:[%s4450_s23 + $0x68] sm:$0xff] }
 0xa26   : > { %v4332_v38 = vpop.eup %4331 }
 0xa27   : > { %v3876_v54 = vmul.f32 %v4332_v38, %v3602_v57  ;;  %v3882_v41 = vsub.f32 %v3604_v8, %v3878_v31  ;;  %v3881_v49 = vmul.f32 %v4195_v60, %v3877_v63  ;;  %v3972_v31 = vld [vmem:[%s4450_s23 + $0x70] sm:$0xff] }
 0xa29   : > { %3903 = vperm.xlu0 %4275, %v3877_v63   ;;  %3898 = vperm.xlu1 %4276, %v3876_v54   ;;  %v3880_v19 = vmul.f32 %v3876_v54, %v3764_v9  ;;  %v3885_v46 = vsub.f32 %v3607_v0, %v3881_v49  ;;  %v3963_v9 = vld [vmem:[%s4450_s23 + $0x28] sm:$0xff]  ;;  %v3966_v0 = vld [vmem:[%s4450_s23 + $0x40] sm:$0xff] }
 0xa2b   : > { %v3884_v45 = vsub.f32 %v3606_v5, %v3880_v19  ;;  %v3973_v19 = vld [vmem:[%s4450_s23 + $0x78] sm:$0xff] }
 0xa2d   : > { %3929 = vperm.xlu0 %4275, %v3883_v51   ;;  %3924 = vperm.xlu1 %4276, %v3882_v41  }
 0xa31   : > { %3939 = vperm.xlu0 %4275, %v3885_v46   ;;  %3934 = vperm.xlu1 %4276, %v3884_v45  }
 0xa9e   : > { %v3894_v44 = vpop.permute.xlu1 %3893 }
 0xa9f   : > { %v3910_v58 = vmul.f32 %v3894_v44, %v7571_v52  ;;  %v3911_v53 = vmul.f32 %v3894_v44, %v7567_v22  ;;  %v3912_v42 = vmul.f32 %v3894_v44, %v7591_v17  ;;  %v3913_v30 = vmul.f32 %v3894_v44, %v7603_v27  ;;  %v3965_v27 = vld [vmem:[%s4450_s23 + $0x38] sm:$0xff] }
 0xaa0   : > { %v3889_v61 = vpop.permute.xlu0 %3888 }
 0xaa1   : > { %v3906_v60 = vmul.f32 %v3889_v61, %v7563_v7  ;;  %v3907_v40 = vmul.f32 %v3889_v61, %v7565_v1  ;;  %v3908_v55 = vmul.f32 %v3889_v61, %v7613_v28  ;;  %v3909_v50 = vmul.f32 %v3889_v61, %v7623_v37  ;;  %v3964_v7 = vld [vmem:[%s4450_s23 + $0x30] sm:$0xff]  ;;  %v3967_v61 = vld [vmem:[%s4450_s23 + $0x48] sm:$0xff] }
 0xaa4   : > { %v3904_v2 = vpop.permute.xlu0 %3903  ;;  %v3899_v32 = vpop.permute.xlu1 %3898 }
 0xaa5   : > { %v3918_v26 = vmul.f32 %v3904_v2, %v7605_v20  ;;  %v3919_v52 = vmul.f32 %v3904_v2, %v7597_v6  ;;  %v3920_v22 = vmul.f32 %v3904_v2, %v7628_v23  ;;  %v3921_v17 = vmul.f32 %v3904_v2, %v7635_v16  ;;  %v3959_v16 = vld [vmem:[%s4450_s23 + $0x8] sm:$0xff]  ;;  %v3968_v2 = vld [vmem:[%s4450_s23 + $0x50] sm:$0xff] }
 0xaa6   : > { %v3914_v37 = vmul.f32 %v3899_v32, %v7569_v3  ;;  %v3915_v34 = vmul.f32 %v3899_v32, %v7579_v29  ;;  %v3916_v20 = vmul.f32 %v3899_v32, %v7609_v12  ;;  %v3917_v6 = vmul.f32 %v3899_v32, %v7619_v35  ;;  %v3969_v32 = vld [vmem:[%s4450_s23 + $0x58] sm:$0xff] }
 0xaa8   : > { %v3930_v1 = vpop.permute.xlu0 %3929  ;;  %v3925_v28 = vpop.permute.xlu1 %3924 }
 0xaa9   : > { %v3946_v36 = vadd.f32 %v3930_v1, %v3910_v58  ;;  %v3947_v23 = vadd.f32 %v3930_v1, %v3911_v53  ;;  %v3948_v39 = vadd.f32 %v3930_v1, %v3912_v42  ;;  %v3949_v15 = vadd.f32 %v3930_v1, %v3913_v30 }
 0xaaa   : > { %v3942_v21 = vadd.f32 %v3925_v28, %v3906_v60  ;;  %v3943_v10 = vadd.f32 %v3925_v28, %v3907_v40  ;;  %v3944_v43 = vadd.f32 %v3925_v28, %v3908_v55  ;;  %v3945_v14 = vadd.f32 %v3925_v28, %v3909_v50 }
 0xaab   : > { %v3978_v3 = vadd.f32 %v3962_v33, %v3946_v36  ;;  %v3979_v29 = vadd.f32 %v3963_v9, %v3947_v23  ;;  %v3980_v12 = vadd.f32 %v3964_v7, %v3948_v39  ;;  %v3981_v48 = vadd.f32 %v3965_v27, %v3949_v15 }
 0xaac   : > { %v3974_v35 = vadd.f32 %v3958_v62, %v3942_v21  ;;  %v3975_v18 = vadd.f32 %v3959_v16, %v3943_v10  ;;  %v3976_v56 = vadd.f32 %v3960_v47, %v3944_v43  ;;  %v3977_v59 = vadd.f32 %v3961_v13, %v3945_v14  ;;  %v3940_v11 = vpop.permute.xlu0 %3939  ;;  %v3935_v24 = vpop.permute.xlu1 %3934 }
 0xaad   : > { %v3994_v57 = vmax.f32 %v3978_v3, 0.0  ;;  %v3995_v38 = vmax.f32 %v3979_v29, 0.0  ;;  %v3996_v63 = vmax.f32 %v3980_v12, 0.0  ;;  %v3997_v54 = vmax.f32 %v3981_v48, 0.0 }
 0xaae   : > { %v3990_v8 = vmax.f32 %v3974_v35, 0.0  ;;  %v3991_v51 = vmax.f32 %v3975_v18, 0.0  ;;  %v3992_v41 = vmax.f32 %v3976_v56, 0.0  ;;  %v3993_v49 = vmax.f32 %v3977_v59, 0.0 }
 0xaaf   : > { %4010 = vst [vmem:[%s7720_s19 + $0x20] sm:$0xff] %v3994_v57  ;;  %4011 = vst [vmem:[%s7720_s19 + $0x28] sm:$0xff] %v3995_v38  ;;  %v3954_v5 = vadd.f32 %v3940_v11, %v3918_v26  ;;  %v3955_v46 = vadd.f32 %v3940_v11, %v3919_v52  ;;  %v3956_v45 = vadd.f32 %v3940_v11, %v3920_v22 }
 0xab0   : > { %4012 = vst [vmem:[%s7720_s19 + $0x30] sm:$0xff] %v3996_v63  ;;  %4013 = vst.msk [vmem:[%s7720_s19 + $0x38] sm:$0xff] %vm397_vm0, %v3997_v54  ;;  %v3957_v44 = vadd.f32 %v3940_v11, %v3921_v17  ;;  %v3950_v58 = vadd.f32 %v3935_v24, %v3914_v37  ;;  %v3951_v53 = vadd.f32 %v3935_v24, %v3915_v34 }
 0xab1   : > { %4006 = vst [vmem:[%s7720_s19] sm:$0xff] %v3990_v8  ;;  %4007 = vst [vmem:[%s7720_s19 + $0x8] sm:$0xff] %v3991_v51  ;;  %v3952_v42 = vadd.f32 %v3935_v24, %v3916_v20  ;;  %v3953_v30 = vadd.f32 %v3935_v24, %v3917_v6  ;;  %v3986_v60 = vadd.f32 %v3970_v4, %v3954_v5 }
 0xab2   : > { %4008 = vst [vmem:[%s7720_s19 + $0x10] sm:$0xff] %v3992_v41  ;;  %4009 = vst.msk [vmem:[%s7720_s19 + $0x18] sm:$0xff] %vm397_vm0, %v3993_v49  ;;  %v3987_v40 = vadd.f32 %v3971_v25, %v3955_v46  ;;  %v3988_v55 = vadd.f32 %v3972_v31, %v3956_v45  ;;  %v3989_v50 = vadd.f32 %v3973_v19, %v3957_v44 }
 0xab3   : > { %v3982_v33 = vadd.f32 %v3966_v0, %v3950_v58  ;;  %v3983_v9 = vadd.f32 %v3967_v61, %v3951_v53  ;;  %v3984_v26 = vadd.f32 %v3968_v2, %v3952_v42  ;;  %v3985_v52 = vadd.f32 %v3969_v32, %v3953_v30 }
 0xab4   : > { %v4002_v22 = vmax.f32 %v3986_v60, 0.0  ;;  %v4003_v17 = vmax.f32 %v3987_v40, 0.0  ;;  %v4004_v7 = vmax.f32 %v3988_v55, 0.0  ;;  %v4005_v27 = vmax.f32 %v3989_v50, 0.0 }
 0xab5   : > { %v3998_v1 = vmax.f32 %v3982_v33, 0.0  ;;  %v3999_v62 = vmax.f32 %v3983_v9, 0.0  ;;  %v4000_v28 = vmax.f32 %v3984_v26, 0.0  ;;  %v4001_v37 = vmax.f32 %v3985_v52, 0.0 }
 0xab6   : > { %4018 = vst [vmem:[%s7720_s19 + $0x60] sm:$0xff] %v4002_v22  ;;  %4019 = vst [vmem:[%s7720_s19 + $0x68] sm:$0xff] %v4003_v17 }
 0xab7   : > { %4020 = vst [vmem:[%s7720_s19 + $0x70] sm:$0xff] %v4004_v7  ;;  %4021 = vst.msk [vmem:[%s7720_s19 + $0x78] sm:$0xff] %vm397_vm0, %v4005_v27 }
 0xab8   : > { %4014 = vst [vmem:[%s7720_s19 + $0x40] sm:$0xff] %v3998_v1  ;;  %4015 = vst [vmem:[%s7720_s19 + $0x48] sm:$0xff] %v3999_v62 }
 0xab9   : > { %4016 = vst [vmem:[%s7720_s19 + $0x50] sm:$0xff] %v4000_v28  ;;  %4017 = vst.msk [vmem:[%s7720_s19 + $0x58] sm:$0xff] %vm397_vm0, %v4001_v37 }
 0xaba PF: > { %s21_s17 = sadd.s32 1, %s4347_s17  }
 0xabb   : > { %p18_p4 = scmp.ge.s32.totalorder %s21_s17, 4  }
 0xabd   :  { %20 = sbr.rel (!%p18_p4) target bundleno = 1 (0x1), region = 94 }

</bundles_post_ra>
